<compile_context>
chip_gen: v7x
topology: tpu7x:2x2x1
jax: 0.10.0
libtpu: 0.0.40
codegen_flags: <defaults>
</compile_context>

<pallas_src>
import jax
import jax.numpy as jnp
from jax.experimental import pallas as pl
from jax.experimental.pallas import tpu as pltpu

LANE = 128      # lane width
SUBLANE = 8     # sublane width
B_BLK = 8       # batch rows per grid step


def _round_up(x, m):
    return (x + m - 1) // m * m


def lsa_kernel(enc_ref, dec_ref, loc_ref, lens_ref,
               w_enc_ref, b_enc_ref, w_dec_ref, w_loc_ref, w_w_ref,
               ctx_ref, wts_ref,
               dec_sc, m_sc, acc_sc, erg_sc):
    """One (batch block, time tile) step of location-sensitive attention.

    enc_ref  : (Bb, Tt, E)   encoder outputs tile           (compute_dtype)
    dec_ref  : (Bb, D)       decoder hidden state           (compute_dtype)
    loc_ref  : (Bb, Tt, Kp)  im2col windows of prev. attention
    lens_ref : (Bb, 1)       effective (unmasked) length per row, int32
    w_enc_ref: (E, H), b_enc_ref: (1, H) f32
    w_dec_ref: (D, H)
    w_loc_ref: (Kp, H)       folded conv + mlp_att weight
    w_w_ref  : (1, H) f32
    ctx_ref  : (Bb, E)       attention context (output, written on last tile)
    wts_ref  : (Bb, Tp)      attention weights (output, written on last tile)
    dec_sc   : (Bb, H)  f32  decoder projection (+ b_enc), computed once per block
    m_sc     : (Bb, 1)  f32  running max of energies
    acc_sc   : (Bb, E)  f32  rescaled (unnormalized) context accumulator
    erg_sc   : (Bb, Tp) f32  full energies (tiny; lets us emit exact softmax weights)
    """
    j = pl.program_id(1)
    nt = pl.num_programs(1)
    Bb, Tt, E = enc_ref.shape
    H = w_enc_ref.shape[1]
    Kp = loc_ref.shape[2]

    # ---- per batch-block init (first time tile) ----
    @pl.when(j == 0)
    def _():
        # b_enc folded into the small (Bb, H) decoder term instead of (Bb*Tt, H) pm.
        dec_sc[...] = (jnp.dot(dec_ref[...], w_dec_ref[...],
                               preferred_element_type=jnp.float32)
                       + b_enc_ref[...])
        m_sc[...] = jnp.full_like(m_sc, -1e30)
        acc_sc[...] = jnp.zeros_like(acc_sc)

    enc = enc_ref[...]                                        # (Bb, Tt, E)

    # ---- processed memory for this tile: lane-dense 2-D MXU matmul (f32 acc)
    pm = jnp.dot(enc.reshape(Bb * Tt, E), w_enc_ref[...],
                 preferred_element_type=jnp.float32)          # (Bb*Tt, H)

    # ---- location term (conv folded into mlp_att)
    att_loc = jnp.dot(loc_ref[...].reshape(Bb * Tt, Kp), w_loc_ref[...],
                      preferred_element_type=jnp.float32)     # (Bb*Tt, H)

    # ---- energies: erg = w^T tanh(pm + att_loc + dec)  ('+ b_w' is softmax-invariant)
    s = (pm + att_loc).reshape(Bb, Tt, H) + dec_sc[...][:, None, :]
    s = jnp.tanh(s.astype(enc.dtype))                         # bf16 EUP on v6e/v7x
    w_row = w_w_ref[...]                                      # (1, H), f32
    erg = jnp.sum(s * w_row, axis=-1)                         # (Bb, Tt), f32

    # ---- in-kernel pad/length mask (finite negative avoids NaN on empty rows)
    t_idx = jax.lax.broadcasted_iota(jnp.int32, (Bb, Tt), 1) + j * Tt
    erg = jnp.where(t_idx >= lens_ref[...], -1e30, erg)

    # ---- stash energies + online-softmax running max / rescaled context acc
    erg_sc[:, pl.ds(pl.multiple_of(j * Tt, Tt), Tt)] = erg
    m_prev = m_sc[...]
    m_new = jnp.maximum(m_prev, jnp.max(erg, axis=-1, keepdims=True))
    p = jnp.exp(erg - m_new)                                  # (Bb, Tt)
    scale = jnp.exp(m_prev - m_new)                           # (Bb, 1)
    # VPU multiply + sublane reduce on the already-resident encoder tile
    # (avoids degenerate M=1 MXU matmuls).
    ctx_part = jnp.sum(enc * p[:, :, None], axis=1)           # (Bb, E), f32
    acc_sc[...] = scale * acc_sc[...] + ctx_part
    m_sc[...] = m_new

    # ---- finalize on the last time tile ----
    @pl.when(j == nt - 1)
    def _():
        p_full = jnp.exp(erg_sc[...] - m_sc[...])             # (Bb, Tp)
        denom = jnp.sum(p_full, axis=-1, keepdims=True)       # (Bb, 1)
        inv_l = pl.reciprocal(denom, approx=True)             # EUP slot
        wts_ref[...] = (p_full * inv_l).astype(wts_ref.dtype)
        ctx_ref[...] = (acc_sc[...] * inv_l).astype(ctx_ref.dtype)


def init_params(key, encoder_dim, decoder_dim, hidden_dim,
                conv_channels, conv_kernel_size):
    """Deterministic synthetic parameters (stored pre-transposed for x @ W)."""
    ks = jax.random.split(key, 6)
    s = 0.1
    return {
        'w_enc': jax.random.normal(ks[0], (encoder_dim, hidden_dim), jnp.float32) * s,
        'b_enc': jax.random.normal(ks[1], (1, hidden_dim), jnp.float32) * s,
        'w_dec': jax.random.normal(ks[2], (decoder_dim, hidden_dim), jnp.float32) * s,
        'w_att': jax.random.normal(ks[3], (conv_channels, hidden_dim), jnp.float32) * s,
        'w_conv': jax.random.normal(ks[4], (conv_channels, conv_kernel_size), jnp.float32) * s,
        'w_w': jax.random.normal(ks[5], (1, hidden_dim), jnp.float32) * s,
        'b_w': jnp.zeros((1, 1), jnp.float32),
    }


def location_sensitive_attention(encoder_outs, src_lens, decoder_state,
                                 att_prev, params, mask=None,
                                 compute_dtype=jnp.bfloat16, t_tile=256):
    """Wrapper mirroring LocationSensitiveAttention.forward.

    encoder_outs : (B, T, E) float32
    src_lens     : (B,) int32
    decoder_state: (B, D) float32
    att_prev     : (B, T) float32 or None
    mask         : (B, T) bool or None  (True = padded; standard suffix pad mask)
    t_tile       : time frames per tile (~256 on v7x/v5e, 512-1024 on v6e)
    returns (attention_context (B, E), attention_weights (B, T))
    """
    B, T, E = encoder_outs.shape
    D = decoder_state.shape[1]
    C, K = params['w_conv'].shape
    H = params['w_enc'].shape[1]
    P = (K - 1) // 2          # 'same' padding (conv_kernel_size asserted odd)

    src_lens = jnp.asarray(src_lens, jnp.int32)

    if att_prev is None:
        # att_prev = (1 - pad_mask) / src_lens
        t_range = jnp.arange(T, dtype=jnp.int32)[None, :]
        pad_mask = (t_range >= src_lens[:, None]).astype(jnp.float32)
        att_prev = (1.0 - pad_mask) / src_lens[:, None].astype(jnp.float32)

    # Effective per-row length (mask in Tacotron is the suffix pad mask).
    # TODO(synk): arbitrary (non-suffix) masks would need an explicit mask-array path.
    if mask is not None:
        eff_lens = jnp.sum(jnp.logical_not(mask), axis=1).astype(jnp.int32)
    else:
        eff_lens = src_lens

    # ---- tiling: batch to 8-row blocks, time to lane-aligned tiles ----
    Tt = max(LANE, _round_up(min(int(t_tile), _round_up(T, LANE)), LANE))
    Tp = _round_up(T, Tt)
    nt = Tp // Tt
    Bp = _round_up(B, B_BLK)
    nb = Bp // B_BLK
    Kp = _round_up(K, SUBLANE)

    # ---- fold the location conv into mlp_att: W_loc = w_conv^T @ w_att  (K, H)
    w_loc = params['w_conv'].T @ params['w_att']

    # ---- im2col windows of previous attention: loc_win[b,t,k] = attp_pad[b, t+k]
    attp_t = jnp.pad(att_prev.astype(jnp.float32), ((0, 0), (0, Tp - T)))
    attp_ext = jnp.pad(attp_t, ((0, 0), (P, P)))                    # (B, Tp + K - 1)
    win_idx = jnp.arange(Tp)[:, None] + jnp.arange(K)[None, :]      # (Tp, K)
    loc_win = attp_ext[:, win_idx]                                  # (B, Tp, K)

    def pad_to(x, shape):
        return jnp.pad(x, [(0, s - d) for d, s in zip(x.shape, shape)])

    enc_p = pad_to(encoder_outs, (Bp, Tp, E)).astype(compute_dtype)
    dec_p = pad_to(decoder_state, (Bp, D)).astype(compute_dtype)
    loc_p = pad_to(loc_win, (Bp, Tp, Kp)).astype(compute_dtype)
    # padded batch rows get length 0 -> fully masked, finite softmax, sliced off.
    lens_p = pad_to(eff_lens.reshape(B, 1), (Bp, 1))

    w_enc_p = params['w_enc'].astype(compute_dtype)                 # (E, H)
    b_enc_p = params['b_enc']                                       # (1, H) f32
    w_dec_p = params['w_dec'].astype(compute_dtype)                 # (D, H)
    w_loc_p = pad_to(w_loc, (Kp, H)).astype(compute_dtype)          # (Kp, H)
    w_w_p = params['w_w']                                           # (1, H) f32

    itemsize = jnp.dtype(compute_dtype).itemsize
    flops = (2 * Bp * Tp * H * (E + Kp) + 2 * Bp * D * H
             + 2 * Bp * Tp * H + 2 * Bp * Tp * E)
    transcendentals = Bp * Tp * (H + 2)
    bytes_accessed = (itemsize * (enc_p.size + dec_p.size + loc_p.size
                                  + w_enc_p.size + w_dec_p.size + w_loc_p.size)
                      + 4 * (lens_p.size + b_enc_p.size + w_w_p.size
                             + Bp * E + Bp * Tp))

    def _lane(n):
        return max(_round_up(n, LANE), LANE)

    vmem_need = (
        2 * B_BLK * Tt * (_lane(E) + _lane(Kp)) * itemsize      # enc + loc double buffers
        + 2 * B_BLK * _lane(D) * itemsize                       # dec
        + 2 * _lane(H) * (E + D + Kp + 2) * 4                   # resident weights
        + 2 * B_BLK * (_lane(E) + _lane(Tp)) * 4                # outputs
        + B_BLK * (_lane(Tp) + _lane(E) + _lane(H) + LANE) * 4  # scratch
        + 4 * B_BLK * Tt * _lane(H) * 4                         # live f32 tile intermediates
    )
    vmem_limit = int(min(max(2 * vmem_need, 16 << 20), 64 << 20))

    fn = pl.pallas_call(
        lsa_kernel,
        out_shape=(jax.ShapeDtypeStruct((Bp, E), jnp.float32),
                   jax.ShapeDtypeStruct((Bp, Tp), jnp.float32)),
        grid=(nb, nt),
        in_specs=[
            pl.BlockSpec((B_BLK, Tt, E), lambda b, j: (b, j, 0)),    # encoder tile
            pl.BlockSpec((B_BLK, D), lambda b, j: (b, 0)),           # decoder state
            pl.BlockSpec((B_BLK, Tt, Kp), lambda b, j: (b, j, 0)),   # attention windows
            pl.BlockSpec((B_BLK, 1), lambda b, j: (b, 0)),           # effective lengths
            pl.BlockSpec((E, H), lambda b, j: (0, 0)),               # w_enc (resident)
            pl.BlockSpec((1, H), lambda b, j: (0, 0)),               # b_enc
            pl.BlockSpec((D, H), lambda b, j: (0, 0)),               # w_dec
            pl.BlockSpec((Kp, H), lambda b, j: (0, 0)),              # folded conv+att
            pl.BlockSpec((1, H), lambda b, j: (0, 0)),               # w (energy)
        ],
        out_specs=(pl.BlockSpec((B_BLK, E), lambda b, j: (b, 0)),    # context (acc)
                   pl.BlockSpec((B_BLK, Tp), lambda b, j: (b, 0))),  # weights (acc)
        scratch_shapes=[
            pltpu.VMEM((B_BLK, H), jnp.float32),    # dec_sc
            pltpu.VMEM((B_BLK, 1), jnp.float32),    # m_sc
            pltpu.VMEM((B_BLK, E), jnp.float32),    # acc_sc
            pltpu.VMEM((B_BLK, Tp), jnp.float32),   # erg_sc
        ],
        compiler_params=pltpu.CompilerParams(
            dimension_semantics=("parallel", "arbitrary"),
            vmem_limit_bytes=vmem_limit),
        cost_estimate=pl.CostEstimate(flops=int(flops),
                                      transcendentals=int(transcendentals),
                                      bytes_accessed=int(bytes_accessed)),
    )
    ctx_p, wts_p = fn(enc_p, dec_p, loc_p, lens_p,
                      w_enc_p, b_enc_p, w_dec_p, w_loc_p, w_w_p)
    return ctx_p[:B, :E], wts_p[:B, :T]


def reference_forward(encoder_outs, decoder_state, att_prev, mask_f, params):
    """Plain-JAX reference (mirrors the PyTorch semantics) for validation."""
    C, K = params['w_conv'].shape
    P = (K - 1) // 2
    pm = encoder_outs @ params['w_enc'] + params['b_enc'][0]
    conv = jax.lax.conv_general_dilated(
        att_prev[:, None, :], params['w_conv'][:, None, :],
        window_strides=(1,), padding=[(P, P)],
        dimension_numbers=('NCH', 'OIH', 'NCH'))
    att_h = jnp.transpose(conv, (0, 2, 1)) @ params['w_att']
    dec = decoder_state @ params['w_dec']
    erg = jnp.tanh(att_h + pm + dec[:, None, :]) @ params['w_w'][0] + params['b_w'][0, 0]
    erg = jnp.where(mask_f > 0.0, -jnp.inf, erg)
    wts = jax.nn.softmax(erg, axis=1)
    ctx = jnp.sum(encoder_outs * wts[..., None], axis=1)
    return ctx, wts


if __name__ == "__main__":
    # Small shapes consistent with the module's forward.
    B, T = 2, 8
    encoder_dim, decoder_dim, hidden_dim = 32, 32, 32
    conv_channels, conv_kernel_size = 4, 5

    key = jax.random.PRNGKey(0)
    k_enc, k_dec, k_par = jax.random.split(key, 3)

    encoder_outs = jax.random.normal(k_enc, (B, T, encoder_dim), jnp.float32)
    decoder_state = jax.random.normal(k_dec, (B, decoder_dim), jnp.float32)
    src_lens = jnp.array([8, 6], jnp.int32)
    pad_mask = jnp.arange(T, dtype=jnp.int32)[None, :] >= src_lens[:, None]

    params = init_params(k_par, encoder_dim, decoder_dim, hidden_dim,
                         conv_channels, conv_kernel_size)

    # Plain-JAX reference (unfolded conv formulation).
    att_prev0 = (1.0 - pad_mask.astype(jnp.float32)) / src_lens[:, None].astype(jnp.float32)
    ctx_ref, wts_ref = reference_forward(encoder_outs, decoder_state, att_prev0,
                                         pad_mask.astype(jnp.float32), params)

    # f32 compute path: tight validation (only the approx reciprocal differs).
    ctx32, wts32 = location_sensitive_attention(
        encoder_outs, src_lens, decoder_state, att_prev=None,
        params=params, mask=pad_mask, compute_dtype=jnp.float32)
    jax.block_until_ready((ctx32, wts32))
    assert jnp.allclose(ctx32, ctx_ref, atol=2e-3, rtol=2e-3), "context mismatch (f32)"
    assert jnp.allclose(wts32, wts_ref, atol=2e-3, rtol=2e-3), "weights mismatch (f32)"
    assert jnp.allclose(jnp.sum(wts32, axis=1), 1.0, atol=5e-3), "weights not normalized"

    # Default bf16 compute path (HBM-bound on all generations -> ~2x traffic win).
    ctx16, wts16 = location_sensitive_attention(
        encoder_outs, src_lens, decoder_state, att_prev=None,
        params=params, mask=pad_mask)
    jax.block_until_ready((ctx16, wts16))
    assert jnp.allclose(ctx16, ctx_ref, atol=5e-2, rtol=5e-2), "context mismatch (bf16)"
    assert jnp.allclose(wts16, wts_ref, atol=5e-2, rtol=5e-2), "weights mismatch (bf16)"

    print("KERNEL_OK")
</pallas_src>

<mosaic_0001>
module attributes {stable_mosaic.version = 11 : i64} {
  func.func @lsa_kernel(%arg0: i32, %arg1: i32, %arg2: memref<8x128x32xf32, #tpu.memory_space<vmem>>, %arg3: memref<8x32xf32, #tpu.memory_space<vmem>>, %arg4: memref<8x128x8xf32, #tpu.memory_space<vmem>>, %arg5: memref<8x1xi32, #tpu.memory_space<vmem>>, %arg6: memref<32x32xf32, #tpu.memory_space<vmem>>, %arg7: memref<1x32xf32, #tpu.memory_space<vmem>>, %arg8: memref<32x32xf32, #tpu.memory_space<vmem>>, %arg9: memref<8x32xf32, #tpu.memory_space<vmem>>, %arg10: memref<1x32xf32, #tpu.memory_space<vmem>>, %arg11: memref<8x32xf32, #tpu.memory_space<vmem>>, %arg12: memref<8x128xf32, #tpu.memory_space<vmem>>, %arg13: memref<8x32xf32, #tpu.memory_space<vmem>>, %arg14: memref<8x1xf32, #tpu.memory_space<vmem>>, %arg15: memref<8x32xf32, #tpu.memory_space<vmem>>, %arg16: memref<8x128xf32, #tpu.memory_space<vmem>>) attributes {dimension_semantics = [#tpu.dimension_semantics<parallel>, #tpu.dimension_semantics<arbitrary>], iteration_bounds = array<i64: 1, 1>, scalar_prefetch = 0 : i64, scratch_operands = 4 : i64, tpu.core_type = #tpu.core_type<tc>, window_params = [{transform_indices = @transform_0, window_bounds = array<i64: 8, 128, 32>}, {transform_indices = @transform_1, window_bounds = array<i64: 8, 32>}, {transform_indices = @transform_2, window_bounds = array<i64: 8, 128, 8>}, {transform_indices = @transform_3, window_bounds = array<i64: 8, 1>}, {pipeline_mode = #tpu.pipeline_mode<synchronous>, transform_indices = @transform_4, window_bounds = array<i64: 32, 32>}, {pipeline_mode = #tpu.pipeline_mode<synchronous>, transform_indices = @transform_5, window_bounds = array<i64: 1, 32>}, {pipeline_mode = #tpu.pipeline_mode<synchronous>, transform_indices = @transform_6, window_bounds = array<i64: 32, 32>}, {pipeline_mode = #tpu.pipeline_mode<synchronous>, transform_indices = @transform_7, window_bounds = array<i64: 8, 32>}, {pipeline_mode = #tpu.pipeline_mode<synchronous>, transform_indices = @transform_8, window_bounds = array<i64: 1, 32>}, {transform_indices = @transform_9, window_bounds = array<i64: 8, 32>}, {transform_indices = @transform_10, window_bounds = array<i64: 8, 128>}]} {
    %c0_i32 = arith.constant 0 : i32
    %0 = arith.cmpi eq, %arg1, %c0_i32 : i32
    %1 = arith.extui %0 : i1 to i32
    %c0_i32_0 = arith.constant 0 : i32
    %2 = arith.cmpi ne, %1, %c0_i32_0 : i32
    scf.if %2 {
      %c0_33 = arith.constant 0 : index
      %c0_34 = arith.constant 0 : index
      %58 = vector.load %arg3[%c0_33, %c0_34] : memref<8x32xf32, #tpu.memory_space<vmem>>, vector<8x32xf32>
      %c0_35 = arith.constant 0 : index
      %c0_36 = arith.constant 0 : index
      %59 = vector.load %arg8[%c0_35, %c0_36] : memref<32x32xf32, #tpu.memory_space<vmem>>, vector<32x32xf32>
      %cst_37 = arith.constant dense<0.000000e+00> : vector<8x32xf32>
      %60 = tpu.matmul %58, %59, %cst_37 {dimension_numbers = #tpu.dot_dimension_numbers<[1], [0], [0], [1], [0, 0, 1, 1], [], []>} : vector<8x32xf32>, vector<32x32xf32>, vector<8x32xf32> -> vector<8x32xf32>
      %c0_38 = arith.constant 0 : index
      %c0_39 = arith.constant 0 : index
      %61 = vector.load %arg7[%c0_38, %c0_39] : memref<1x32xf32, #tpu.memory_space<vmem>>, vector<1x32xf32>
      %62 = vector.broadcast %61 : vector<1x32xf32> to vector<8x32xf32>
      %63 = arith.addf %60, %62 : vector<8x32xf32>
      %c0_40 = arith.constant 0 : index
      %c0_41 = arith.constant 0 : index
      %64 = vector.load %arg13[%c0_40, %c0_41] : memref<8x32xf32, #tpu.memory_space<vmem>>, vector<8x32xf32>
      tpu.vector_store %arg13[%c0_40, %c0_41], %63 {strides = array<i32>} : memref<8x32xf32, #tpu.memory_space<vmem>>, vector<8x32xf32>,
      %cst_42 = arith.constant -1.000000e+30 : f32
      %65 = vector.broadcast %cst_42 : f32 to vector<8x1xf32>
      %c0_43 = arith.constant 0 : index
      %c0_44 = arith.constant 0 : index
      %66 = vector.load %arg14[%c0_43, %c0_44] : memref<8x1xf32, #tpu.memory_space<vmem>>, vector<8x1xf32>
      tpu.vector_store %arg14[%c0_43, %c0_44], %65 {strides = array<i32>} : memref<8x1xf32, #tpu.memory_space<vmem>>, vector<8x1xf32>,
      %cst_45 = arith.constant 0.000000e+00 : f32
      %67 = vector.broadcast %cst_45 : f32 to vector<8x32xf32>
      %c0_46 = arith.constant 0 : index
      %c0_47 = arith.constant 0 : index
      %68 = vector.load %arg15[%c0_46, %c0_47] : memref<8x32xf32, #tpu.memory_space<vmem>>, vector<8x32xf32>
      tpu.vector_store %arg15[%c0_46, %c0_47], %67 {strides = array<i32>} : memref<8x32xf32, #tpu.memory_space<vmem>>, vector<8x32xf32>,
    } else {
    }
    %c0 = arith.constant 0 : index
    %c0_1 = arith.constant 0 : index
    %c0_2 = arith.constant 0 : index
    %3 = vector.load %arg2[%c0, %c0_1, %c0_2] : memref<8x128x32xf32, #tpu.memory_space<vmem>>, vector<8x128x32xf32>
    %4 = vector.shape_cast %3 : vector<8x128x32xf32> to vector<1024x32xf32>
    %c0_3 = arith.constant 0 : index
    %c0_4 = arith.constant 0 : index
    %5 = vector.load %arg6[%c0_3, %c0_4] : memref<32x32xf32, #tpu.memory_space<vmem>>, vector<32x32xf32>
    %cst = arith.constant dense<0.000000e+00> : vector<1024x32xf32>
    %6 = tpu.matmul %4, %5, %cst {dimension_numbers = #tpu.dot_dimension_numbers<[1], [0], [0], [1], [0, 0, 1, 1], [], []>} : vector<1024x32xf32>, vector<32x32xf32>, vector<1024x32xf32> -> vector<1024x32xf32>
    %c0_5 = arith.constant 0 : index
    %c0_6 = arith.constant 0 : index
    %c0_7 = arith.constant 0 : index
    %7 = vector.load %arg4[%c0_5, %c0_6, %c0_7] : memref<8x128x8xf32, #tpu.memory_space<vmem>>, vector<8x128x8xf32>
    %8 = vector.shape_cast %7 : vector<8x128x8xf32> to vector<1024x8xf32>
    %c0_8 = arith.constant 0 : index
    %c0_9 = arith.constant 0 : index
    %9 = vector.load %arg9[%c0_8, %c0_9] : memref<8x32xf32, #tpu.memory_space<vmem>>, vector<8x32xf32>
    %cst_10 = arith.constant dense<0.000000e+00> : vector<1024x32xf32>
    %10 = tpu.matmul %8, %9, %cst_10 {dimension_numbers = #tpu.dot_dimension_numbers<[1], [0], [0], [1], [0, 0, 1, 1], [], []>} : vector<1024x8xf32>, vector<8x32xf32>, vector<1024x32xf32> -> vector<1024x32xf32>
    %11 = arith.addf %6, %10 : vector<1024x32xf32>
    %12 = vector.shape_cast %11 : vector<1024x32xf32> to vector<8x128x32xf32>
    %c0_11 = arith.constant 0 : index
    %c0_12 = arith.constant 0 : index
    %13 = vector.load %arg13[%c0_11, %c0_12] : memref<8x32xf32, #tpu.memory_space<vmem>>, vector<8x32xf32>
    %14 = vector.shape_cast %13 : vector<8x32xf32> to vector<8x1x32xf32>
    %15 = vector.broadcast %14 : vector<8x1x32xf32> to vector<8x128x32xf32>
    %16 = arith.addf %12, %15 : vector<8x128x32xf32>
    %17 = math.tanh %16 : vector<8x128x32xf32>
    %c0_13 = arith.constant 0 : index
    %c0_14 = arith.constant 0 : index
    %18 = vector.load %arg10[%c0_13, %c0_14] : memref<1x32xf32, #tpu.memory_space<vmem>>, vector<1x32xf32>
    %19 = vector.shape_cast %18 : vector<1x32xf32> to vector<1x1x32xf32>
    %20 = vector.broadcast %19 : vector<1x1x32xf32> to vector<8x128x32xf32>
    %21 = arith.mulf %17, %20 : vector<8x128x32xf32>
    %cst_15 = arith.constant dense<0.000000e+00> : vector<8x128xf32>
    %22 = vector.multi_reduction <add>, %21, %cst_15 [2] : vector<8x128x32xf32> to vector<8x128xf32>
    %23 = tpu.iota {dimensions = array<i32: 1>} : vector<8x128xi32>
    %c128_i32 = arith.constant 128 : i32
    %24 = arith.muli %arg1, %c128_i32 : i32
    %25 = vector.broadcast %24 : i32 to vector<8x128xi32>
    %26 = arith.addi %23, %25 : vector<8x128xi32>
    %c0_16 = arith.constant 0 : index
    %c0_17 = arith.constant 0 : index
    %27 = vector.load %arg5[%c0_16, %c0_17] : memref<8x1xi32, #tpu.memory_space<vmem>>, vector<8x1xi32>
    %28 = vector.broadcast %27 : vector<8x1xi32> to vector<8x128xi32>
    %29 = arith.cmpi sge, %26, %28 : vector<8x128xi32>
    %cst_18 = arith.constant -1.000000e+30 : f32
    %30 = vector.broadcast %cst_18 : f32 to vector<8x128xf32>
    %31 = arith.select %29, %30, %22 : vector<8x128xi1>, vector<8x128xf32>
    %c128_i32_19 = arith.constant 128 : i32
    %32 = arith.muli %arg1, %c128_i32_19 : i32
    %33 = tpu.assume_multiple %32, 128 : i32
    %c0_20 = arith.constant 0 : index
    %34 = arith.index_cast %33 : i32 to index
    %35 = vector.load %arg16[%c0_20, %34] : memref<8x128xf32, #tpu.memory_space<vmem>>, vector<8x128xf32>
    tpu.vector_store %arg16[%c0_20, %34], %31 {strides = array<i32>} : memref<8x128xf32, #tpu.memory_space<vmem>>, vector<8x128xf32>,
    %c0_21 = arith.constant 0 : index
    %c0_22 = arith.constant 0 : index
    %36 = vector.load %arg14[%c0_21, %c0_22] : memref<8x1xf32, #tpu.memory_space<vmem>>, vector<8x1xf32>
    %cst_23 = arith.constant dense<0xFF800000> : vector<8xf32>
    %37 = vector.multi_reduction <maximumf>, %31, %cst_23 [1] : vector<8x128xf32> to vector<8xf32>
    %38 = vector.shape_cast %37 : vector<8xf32> to vector<8x1xf32>
    %39 = arith.maximumf %36, %38 : vector<8x1xf32>
    %40 = vector.broadcast %39 : vector<8x1xf32> to vector<8x128xf32>
    %41 = arith.subf %31, %40 : vector<8x128xf32>
    %42 = math.exp %41 : vector<8x128xf32>
    %43 = arith.subf %36, %39 : vector<8x1xf32>
    %44 = math.exp %43 : vector<8x1xf32>
    %45 = vector.shape_cast %42 : vector<8x128xf32> to vector<8x128x1xf32>
    %46 = vector.broadcast %45 : vector<8x128x1xf32> to vector<8x128x32xf32>
    %47 = arith.mulf %3, %46 : vector<8x128x32xf32>
    %cst_24 = arith.constant dense<0.000000e+00> : vector<8x32xf32>
    %48 = vector.multi_reduction <add>, %47, %cst_24 [1] : vector<8x128x32xf32> to vector<8x32xf32>
    %c0_25 = arith.constant 0 : index
    %c0_26 = arith.constant 0 : index
    %49 = vector.load %arg15[%c0_25, %c0_26] : memref<8x32xf32, #tpu.memory_space<vmem>>, vector<8x32xf32>
    %50 = vector.broadcast %44 : vector<8x1xf32> to vector<8x32xf32>
    %51 = arith.mulf %50, %49 : vector<8x32xf32>
    %52 = arith.addf %51, %48 : vector<8x32xf32>
    %c0_27 = arith.constant 0 : index
    %c0_28 = arith.constant 0 : index
    %53 = vector.load %arg15[%c0_27, %c0_28] : memref<8x32xf32, #tpu.memory_space<vmem>>, vector<8x32xf32>
    tpu.vector_store %arg15[%c0_27, %c0_28], %52 {strides = array<i32>} : memref<8x32xf32, #tpu.memory_space<vmem>>, vector<8x32xf32>,
    %c0_29 = arith.constant 0 : index
    %c0_30 = arith.constant 0 : index
    %54 = vector.load %arg14[%c0_29, %c0_30] : memref<8x1xf32, #tpu.memory_space<vmem>>, vector<8x1xf32>
    tpu.vector_store %arg14[%c0_29, %c0_30], %39 {strides = array<i32>} : memref<8x1xf32, #tpu.memory_space<vmem>>, vector<8x1xf32>,
    %c0_i32_31 = arith.constant 0 : i32
    %55 = arith.cmpi eq, %arg1, %c0_i32_31 : i32
    %56 = arith.extui %55 : i1 to i32
    %c0_i32_32 = arith.constant 0 : i32
    %57 = arith.cmpi ne, %56, %c0_i32_32 : i32
    scf.if %57 {
      %c0_33 = arith.constant 0 : index
      %c0_34 = arith.constant 0 : index
      %58 = vector.load %arg16[%c0_33, %c0_34] : memref<8x128xf32, #tpu.memory_space<vmem>>, vector<8x128xf32>
      %c0_35 = arith.constant 0 : index
      %c0_36 = arith.constant 0 : index
      %59 = vector.load %arg14[%c0_35, %c0_36] : memref<8x1xf32, #tpu.memory_space<vmem>>, vector<8x1xf32>
      %60 = vector.broadcast %59 : vector<8x1xf32> to vector<8x128xf32>
      %61 = arith.subf %58, %60 : vector<8x128xf32>
      %62 = math.exp %61 : vector<8x128xf32>
      %cst_37 = arith.constant dense<0.000000e+00> : vector<8xf32>
      %63 = vector.multi_reduction <add>, %62, %cst_37 [1] : vector<8x128xf32> to vector<8xf32>
      %64 = vector.shape_cast %63 : vector<8xf32> to vector<8x1xf32>
      %65 = tpu.reciprocal %64 {approx = true} : vector<8x1xf32> -> vector<8x1xf32>
      %66 = vector.broadcast %65 : vector<8x1xf32> to vector<8x128xf32>
      %67 = arith.mulf %62, %66 : vector<8x128xf32>
      %c0_38 = arith.constant 0 : index
      %c0_39 = arith.constant 0 : index
      %68 = vector.load %arg12[%c0_38, %c0_39] : memref<8x128xf32, #tpu.memory_space<vmem>>, vector<8x128xf32>
      tpu.vector_store %arg12[%c0_38, %c0_39], %67 {strides = array<i32>} : memref<8x128xf32, #tpu.memory_space<vmem>>, vector<8x128xf32>,
      %c0_40 = arith.constant 0 : index
      %c0_41 = arith.constant 0 : index
      %69 = vector.load %arg15[%c0_40, %c0_41] : memref<8x32xf32, #tpu.memory_space<vmem>>, vector<8x32xf32>
      %70 = vector.broadcast %65 : vector<8x1xf32> to vector<8x32xf32>
      %71 = arith.mulf %69, %70 : vector<8x32xf32>
      %c0_42 = arith.constant 0 : index
      %c0_43 = arith.constant 0 : index
      %72 = vector.load %arg11[%c0_42, %c0_43] : memref<8x32xf32, #tpu.memory_space<vmem>>, vector<8x32xf32>
      tpu.vector_store %arg11[%c0_42, %c0_43], %71 {strides = array<i32>} : memref<8x32xf32, #tpu.memory_space<vmem>>, vector<8x32xf32>,
    } else {
    }
    return
  }
  func.func @transform_0(%arg0: i32, %arg1: i32) -> (i32, i32, i32) {
    %c0_i32 = arith.constant 0 : i32
    %c0_i32_0 = arith.constant 0 : i32
    return %arg0, %arg1, %c0_i32 : i32, i32, i32
  }
  func.func @transform_1(%arg0: i32, %arg1: i32) -> (i32, i32) {
    %c0_i32 = arith.constant 0 : i32
    %c0_i32_0 = arith.constant 0 : i32
    return %arg0, %c0_i32 : i32, i32
  }
  func.func @transform_2(%arg0: i32, %arg1: i32) -> (i32, i32, i32) {
    %c0_i32 = arith.constant 0 : i32
    %c0_i32_0 = arith.constant 0 : i32
    return %arg0, %arg1, %c0_i32 : i32, i32, i32
  }
  func.func @transform_3(%arg0: i32, %arg1: i32) -> (i32, i32) {
    %c0_i32 = arith.constant 0 : i32
    %c0_i32_0 = arith.constant 0 : i32
    return %arg0, %c0_i32 : i32, i32
  }
  func.func @transform_4(%arg0: i32, %arg1: i32) -> (i32, i32) {
    %c0_i32 = arith.constant 0 : i32
    %c0_i32_0 = arith.constant 0 : i32
    %c0_i32_1 = arith.constant 0 : i32
    return %c0_i32, %c0_i32_0 : i32, i32
  }
  func.func @transform_5(%arg0: i32, %arg1: i32) -> (i32, i32) {
    %c0_i32 = arith.constant 0 : i32
    %c0_i32_0 = arith.constant 0 : i32
    %c0_i32_1 = arith.constant 0 : i32
    return %c0_i32, %c0_i32_0 : i32, i32
  }
  func.func @transform_6(%arg0: i32, %arg1: i32) -> (i32, i32) {
    %c0_i32 = arith.constant 0 : i32
    %c0_i32_0 = arith.constant 0 : i32
    %c0_i32_1 = arith.constant 0 : i32
    return %c0_i32, %c0_i32_0 : i32, i32
  }
  func.func @transform_7(%arg0: i32, %arg1: i32) -> (i32, i32) {
    %c0_i32 = arith.constant 0 : i32
    %c0_i32_0 = arith.constant 0 : i32
    %c0_i32_1 = arith.constant 0 : i32
    return %c0_i32, %c0_i32_0 : i32, i32
  }
  func.func @transform_8(%arg0: i32, %arg1: i32) -> (i32, i32) {
    %c0_i32 = arith.constant 0 : i32
    %c0_i32_0 = arith.constant 0 : i32
    %c0_i32_1 = arith.constant 0 : i32
    return %c0_i32, %c0_i32_0 : i32, i32
  }
  func.func @transform_9(%arg0: i32, %arg1: i32) -> (i32, i32) {
    %c0_i32 = arith.constant 0 : i32
    %c0_i32_0 = arith.constant 0 : i32
    return %arg0, %c0_i32 : i32, i32
  }
  func.func @transform_10(%arg0: i32, %arg1: i32) -> (i32, i32) {
    %c0_i32 = arith.constant 0 : i32
    %c0_i32_0 = arith.constant 0 : i32
    return %arg0, %c0_i32 : i32, i32
  }
}

</mosaic_0001>

<bundles_post_ra>
// kernel: tpu_custom_call.1
= control target key start
LH: loop header
LB: loop body
LE: loop exit
PB: predicated region body
PF: predicated region fallthrough
CT: control target
= control target key end

     0   :  { %16 = vsyncpa [#allocation7], 0  ;;  %vm391_vm0 = vcmask 64512   ;;  %v6836_v3 = vmov 0.0|0.0   ;;  %vm9931_vm1 = vcmask 261120   ;;  %v6837_v11 = vmov 0.0   ;;  %s9910_s0 = inlined_call_operand.vmem [shape: f32[8,128,32], index: 0, kind: input, shape index: {}]   ;;  %s9911_s1 = inlined_call_operand.vmem [shape: f32[8,32], index: 1, kind: input, shape index: {}]   ;;  %s9912_s2 = inlined_call_operand.vmem [shape: f32[8,128,8], index: 2, kind: input, shape index: {}]   ;;  %s9913_s3 = inlined_call_operand.vmem [shape: s32[8,1], index: 3, kind: input, shape index: {}]   ;;  %s9914_s4 = inlined_call_operand.vmem [shape: f32[32,32], index: 4, kind: input, shape index: {}]   ;;  %s9915_s5 = inlined_call_operand.vmem [shape: f32[1,32], index: 5, kind: input, shape index: {}]   ;;  %s9916_s6 = inlined_call_operand.vmem [shape: f32[32,32], index: 6, kind: input, shape index: {}]   ;;  %s9917_s7 = inlined_call_operand.vmem [shape: f32[8,32], index: 7, kind: input, shape index: {}]   ;;  %s9918_s8 = inlined_call_operand.vmem [shape: f32[1,32], index: 8, kind: input, shape index: {}]   ;;  %s9919_s9 = inlined_call_operand.hbm [shape: f32[8,32], index: 9, kind: output, shape index: {0}]   ;;  %s9920_s10 = inlined_call_operand.hbm [shape: f32[8,128], index: 10, kind: output, shape index: {1}]  }
   0x1   :  { %v390_v0 = vld [vmem:[%s9917_s7] sm:$0xff]  ;;  %6239 = vmatprep.subr.bf16.mxu0 %v6836_v3  ;;  %v42_v4 = vld [vmem:[%s9916_s6 + $0x8] sm:$0xff]  ;;  %v388_v9 = vld [vmem:[%s9912_s2 + $0x3f0] sm:$0xff]  ;;  %129 = vst.msk [vmem:[#allocation4] sm:$0xff] %vm9931_vm1, %v6837_v11  ;;  %vm6838_vm2 = vmmov 0  }
   0x2   :  { %v386_v1 = vld [vmem:[%s9912_s2 + $0x3e0] sm:$0xff]  ;;  %6253 = vmatprep.subr.mxu1 %v390_v0  ;;  %v387_v5 = vld [vmem:[%s9912_s2 + $0x3e8] sm:$0xff]  ;;  %v43_v10 = vld [vmem:[%s9916_s6 + $0x10] sm:$0xff]  ;;  %5842 = vmatprep.mubr.msk.f32.mxu0 %vm6838_vm2, %v6837_v11 }
   0x3   :  { %v41_v2 = vld [vmem:[%s9916_s6] sm:$0xff]  ;;  %6254 = vmatpush3.msra.mxu1 %v390_v0  ;;  %6033 = vmatprep.mubr.msk.f32.mxu1 %vm391_vm0, %v386_v1  ;;  %v259_v8 = vld [vmem:[%s9914_s4 + $0x8] sm:$0xff]  ;;  %v44_v13 = vld [vmem:[%s9916_s6 + $0x18] sm:$0xff] }
   0x4   :  { %v258_v6 = vld [vmem:[%s9914_s4] sm:$0xff]  ;;  %v6240_v7 = vpack.c.bf16 %v42_v4, %v41_v2  ;;  %6034 = vmatmul.mubr.msk.f32.vlgmr.msra.gmra.mrb[0].mxu1 %vm391_vm0, %v387_v5  ;;  %v260_v14 = vld [vmem:[%s9914_s4 + $0x10] sm:$0xff]  ;;  %v6243_v15 = vpack.c.bf16 %v44_v13, %v43_v10  ;;  %v389_v16 = vld [vmem:[%s9912_s2 + $0x3f8] sm:$0xff] }
   0x5   :  { %v6245_v12 = vpack.c.bf16 %v259_v8, %v258_v6  ;;  %6036 = vmatprep.mubr.msk.f32.mxu1 %vm391_vm0, %v388_v9  ;;  %v261_v17 = vld [vmem:[%s9914_s4 + $0x18] sm:$0xff]  ;;  %v130_v19 = vld [vmem:[%s9910_s0] sm:$0xff]  ;;  %v131_v22 = vld [vmem:[%s9910_s0 + $0x8] sm:$0xff] }
   0x6   :  { %6241 = vmatpush3.bf16.msra.mxu0 %v6240_v7  ;;  %v6249_v18 = vpack.c.bf16 %v261_v17, %v260_v14  ;;  %v40_v20 = vld [vmem:[%s9911_s1] sm:$0xff]  ;;  %v132_v23 = vld [vmem:[%s9910_s0 + $0x10] sm:$0xff]  ;;  %v263_v24 = vld [vmem:[%s9912_s2 + $0x8] sm:$0xff] }
   0x7   :  { %6246 = vmatprep.subr.bf16.mxu1 %v6245_v12  ;;  %6242 = vmatprep.subr.bf16.mxu0 %v6836_v3  ;;  %v262_v21 = vld [vmem:[%s9912_s2] sm:$0xff]  ;;  %v264_v25 = vld [vmem:[%s9912_s2 + $0x10] sm:$0xff]  ;;  %v133_v26 = vld [vmem:[%s9910_s0 + $0x18] sm:$0xff] }
   0x8   :  { %6248 = vmatpush3.bf16.msra.mxu1 %v6245_v12  ;;  %v134_v27 = vld [vmem:[%s9910_s0 + $0x20] sm:$0xff]  ;;  %v265_v28 = vld [vmem:[%s9912_s2 + $0x18] sm:$0xff]  ;;  %v135_v30 = vld [vmem:[%s9910_s0 + $0x28] sm:$0xff] }
   0x9   :  { %6037 = vmatmul.mubr.msk.f32.gmra.mrb[2].mxu1 %vm391_vm0, %v389_v16  ;;  %6250 = vmatprep.subr.bf16.mxu1 %v6249_v18  ;;  %v266_v29 = vld [vmem:[%s9912_s2 + $0x20] sm:$0xff]  ;;  %v136_v31 = vld [vmem:[%s9910_s0 + $0x30] sm:$0xff]  ;;  %v267_v32 = vld [vmem:[%s9912_s2 + $0x28] sm:$0xff] }
   0xa   :  { %6244 = vmatpush3.bf16.msra.mxu0 %v6243_v15  ;;  %6047 = vmatprep.mubr.msk.f32.mxu1 %vm9931_vm1, %v130_v19  ;;  %v268_v33 = vld [vmem:[%s9912_s2 + $0x30] sm:$0xff]  ;;  %v137_v34 = vld [vmem:[%s9910_s0 + $0x38] sm:$0xff]  ;;  %v138_v35 = vld [vmem:[%s9910_s0 + $0x40] sm:$0xff] }
   0xb   :  { %5845 = vmatprep.subr.mxu0 %v390_v0  ;;  %v269_v36 = vld [vmem:[%s9912_s2 + $0x38] sm:$0xff]  ;;  %v270_v37 = vld [vmem:[%s9912_s2 + $0x40] sm:$0xff]  ;;  %v139_v38 = vld [vmem:[%s9910_s0 + $0x48] sm:$0xff] }
   0xc   :  { %6252 = vmatpush3.bf16.msra.mxu1 %v6249_v18  ;;  %v140_v39 = vld [vmem:[%s9910_s0 + $0x50] sm:$0xff]  ;;  %v271_v40 = vld [vmem:[%s9912_s2 + $0x48] sm:$0xff]  ;;  %v141_v42 = vld [vmem:[%s9910_s0 + $0x58] sm:$0xff] }
   0xd   :  { %5843 = vmatmul.mubr.msk.f32.vlgmr.msra.gmra.mrb[0].mxu0 %vm9931_vm1, %v40_v20  ;;  %v272_v41 = vld [vmem:[%s9912_s2 + $0x50] sm:$0xff]  ;;  %v142_v43 = vld [vmem:[%s9910_s0 + $0x60] sm:$0xff]  ;;  %v273_v44 = vld [vmem:[%s9912_s2 + $0x58] sm:$0xff] }
   0xe   :  { %5846 = vmatpush3.msra.mxu0 %v390_v0  ;;  %5847 = vmatprep.mubr.msk.f32.mxu0 %vm391_vm0, %v262_v21  ;;  %v274_v45 = vld [vmem:[%s9912_s2 + $0x60] sm:$0xff]  ;;  %v143_v46 = vld [vmem:[%s9910_s0 + $0x68] sm:$0xff]  ;;  %v144_v47 = vld [vmem:[%s9910_s0 + $0x70] sm:$0xff] }
   0xf   :  { %6048 = vmatmul.mubr.msk.f32.vlgmr.msra.gmra.mrb[4].mxu1 %vm9931_vm1, %v131_v22  ;;  %v275_v48 = vld [vmem:[%s9912_s2 + $0x68] sm:$0xff]  ;;  %v276_v49 = vld [vmem:[%s9912_s2 + $0x70] sm:$0xff]  ;;  %v145_v50 = vld [vmem:[%s9910_s0 + $0x78] sm:$0xff] }
  0x10   :  { %6050 = vmatprep.mubr.msk.f32.mxu1 %vm9931_vm1, %v132_v23  ;;  %v146_v51 = vld [vmem:[%s9910_s0 + $0x80] sm:$0xff]  ;;  %v277_v52 = vld [vmem:[%s9912_s2 + $0x78] sm:$0xff]  ;;  %v147_v54 = vld [vmem:[%s9910_s0 + $0x88] sm:$0xff] }
  0x11   :  { %5848 = vmatmul.mubr.msk.f32.vlgmr.msra.gmra.mrb[2].mxu0 %vm391_vm0, %v263_v24  ;;  %v278_v53 = vld [vmem:[%s9912_s2 + $0x80] sm:$0xff]  ;;  %v148_v55 = vld [vmem:[%s9910_s0 + $0x90] sm:$0xff]  ;;  %v279_v56 = vld [vmem:[%s9912_s2 + $0x88] sm:$0xff] }
  0x12   :  { %5850 = vmatprep.mubr.msk.f32.mxu0 %vm391_vm0, %v264_v25  ;;  %v280_v57 = vld [vmem:[%s9912_s2 + $0x90] sm:$0xff]  ;;  %v149_v58 = vld [vmem:[%s9910_s0 + $0x98] sm:$0xff]  ;;  %v150_v59 = vld [vmem:[%s9910_s0 + $0xa0] sm:$0xff] }
  0x13   :  { %6051 = vmatmul.mubr.msk.f32.gmra.mrb[6].mxu1 %vm9931_vm1, %v133_v26  ;;  %v281_v60 = vld [vmem:[%s9912_s2 + $0x98] sm:$0xff]  ;;  %v282_v61 = vld [vmem:[%s9912_s2 + $0xa0] sm:$0xff]  ;;  %v151_v62 = vld [vmem:[%s9910_s0 + $0xa8] sm:$0xff] }
  0x14   :  { %6053 = vmatprep.mubr.msk.f32.mxu1 %vm9931_vm1, %v134_v27  ;;  %v152_v63 = vld [vmem:[%s9910_s0 + $0xb0] sm:$0xff]  ;;  %v283_v0 = vld [vmem:[%s9912_s2 + $0xa8] sm:$0xff]  ;;  %v153_v2 = vld [vmem:[%s9910_s0 + $0xb8] sm:$0xff] }
  0x15   :  { %5851 = vmatmul.mubr.msk.f32.gmra.mrb[4].mxu0 %vm391_vm0, %v265_v28  ;;  %v284_v1 = vld [vmem:[%s9912_s2 + $0xb0] sm:$0xff]  ;;  %v154_v3 = vld [vmem:[%s9910_s0 + $0xc0] sm:$0xff]  ;;  %v285_v4 = vld [vmem:[%s9912_s2 + $0xb8] sm:$0xff] }
  0x16   :  { %5853 = vmatprep.mubr.msk.f32.mxu0 %vm391_vm0, %v266_v29  ;;  %v286_v5 = vld [vmem:[%s9912_s2 + $0xc0] sm:$0xff]  ;;  %v155_v6 = vld [vmem:[%s9910_s0 + $0xc8] sm:$0xff]  ;;  %v156_v7 = vld [vmem:[%s9910_s0 + $0xd0] sm:$0xff] }
  0x17   :  { %6054 = vmatmul.mubr.msk.f32.gmra.mrb[8].mxu1 %vm9931_vm1, %v135_v30  ;;  %v287_v8 = vld [vmem:[%s9912_s2 + $0xc8] sm:$0xff]  ;;  %v288_v9 = vld [vmem:[%s9912_s2 + $0xd0] sm:$0xff]  ;;  %v157_v10 = vld [vmem:[%s9910_s0 + $0xd8] sm:$0xff] }
  0x18   :  { %6056 = vmatprep.mubr.msk.f32.mxu1 %vm9931_vm1, %v136_v31  ;;  %v158_v11 = vld [vmem:[%s9910_s0 + $0xe0] sm:$0xff]  ;;  %v289_v12 = vld [vmem:[%s9912_s2 + $0xd8] sm:$0xff]  ;;  %v159_v14 = vld [vmem:[%s9910_s0 + $0xe8] sm:$0xff] }
  0x19   :  { %5854 = vmatmul.mubr.msk.f32.gmra.mrb[6].mxu0 %vm391_vm0, %v267_v32  ;;  %v290_v13 = vld [vmem:[%s9912_s2 + $0xe0] sm:$0xff] }
  0x1a   :  { %5856 = vmatprep.mubr.msk.f32.mxu0 %vm391_vm0, %v268_v33 }
  0x1b   :  { %6057 = vmatmul.mubr.msk.f32.gmra.mrb[10].mxu1 %vm9931_vm1, %v137_v34 }
  0x1c   :  { %6059 = vmatprep.mubr.msk.f32.mxu1 %vm9931_vm1, %v138_v35 }
  0x1d   :  { %5857 = vmatmul.mubr.msk.f32.gmra.mrb[8].mxu0 %vm391_vm0, %v269_v36 }
  0x1e   :  { %5859 = vmatprep.mubr.msk.f32.mxu0 %vm391_vm0, %v270_v37 }
  0x1f   :  { %6060 = vmatmul.mubr.msk.f32.gmra.mrb[12].mxu1 %vm9931_vm1, %v139_v38 }
  0x20   :  { %6062 = vmatprep.mubr.msk.f32.mxu1 %vm9931_vm1, %v140_v39 }
  0x21   :  { %5860 = vmatmul.mubr.msk.f32.gmra.mrb[10].mxu0 %vm391_vm0, %v271_v40 }
  0x22   :  { %5862 = vmatprep.mubr.msk.f32.mxu0 %vm391_vm0, %v272_v41 }
  0x23   :  { %6063 = vmatmul.mubr.msk.f32.gmra.mrb[14].mxu1 %vm9931_vm1, %v141_v42 }
  0x24   :  { %6065 = vmatprep.mubr.msk.f32.mxu1 %vm9931_vm1, %v142_v43 }
  0x25   :  { %5863 = vmatmul.mubr.msk.f32.gmra.mrb[12].mxu0 %vm391_vm0, %v273_v44 }
  0x26   :  { %5865 = vmatprep.mubr.msk.f32.mxu0 %vm391_vm0, %v274_v45 }
  0x27   :  { %6066 = vmatmul.mubr.msk.f32.gmra.mrb[16].mxu1 %vm9931_vm1, %v143_v46 }
  0x28   :  { %6068 = vmatprep.mubr.msk.f32.mxu1 %vm9931_vm1, %v144_v47 }
  0x29   :  { %5866 = vmatmul.mubr.msk.f32.gmra.mrb[14].mxu0 %vm391_vm0, %v275_v48 }
  0x2a   :  { %5868 = vmatprep.mubr.msk.f32.mxu0 %vm391_vm0, %v276_v49 }
  0x2b   :  { %6069 = vmatmul.mubr.msk.f32.gmra.mrb[18].mxu1 %vm9931_vm1, %v145_v50 }
  0x2c   :  { %6071 = vmatprep.mubr.msk.f32.mxu1 %vm9931_vm1, %v146_v51 }
  0x2d   :  { %5869 = vmatmul.mubr.msk.f32.gmra.mrb[16].mxu0 %vm391_vm0, %v277_v52 }
  0x2e   :  { %5871 = vmatprep.mubr.msk.f32.mxu0 %vm391_vm0, %v278_v53 }
  0x2f   :  { %6072 = vmatmul.mubr.msk.f32.gmra.mrb[20].mxu1 %vm9931_vm1, %v147_v54 }
  0x30   :  { %6074 = vmatprep.mubr.msk.f32.mxu1 %vm9931_vm1, %v148_v55 }
  0x31   :  { %5872 = vmatmul.mubr.msk.f32.gmra.mrb[18].mxu0 %vm391_vm0, %v279_v56 }
  0x32   :  { %5874 = vmatprep.mubr.msk.f32.mxu0 %vm391_vm0, %v280_v57 }
  0x33   :  { %6075 = vmatmul.mubr.msk.f32.gmra.mrb[22].mxu1 %vm9931_vm1, %v149_v58 }
  0x34   :  { %6077 = vmatprep.mubr.msk.f32.mxu1 %vm9931_vm1, %v150_v59 }
  0x35   :  { %5875 = vmatmul.mubr.msk.f32.gmra.mrb[20].mxu0 %vm391_vm0, %v281_v60 }
  0x36   :  { %5877 = vmatprep.mubr.msk.f32.mxu0 %vm391_vm0, %v282_v61 }
  0x37   :  { %6078 = vmatmul.mubr.msk.f32.gmra.mrb[24].mxu1 %vm9931_vm1, %v151_v62 }
  0x38   :  { %6080 = vmatprep.mubr.msk.f32.mxu1 %vm9931_vm1, %v152_v63 }
  0x39   :  { %5878 = vmatmul.mubr.msk.f32.gmra.mrb[22].mxu0 %vm391_vm0, %v283_v0 }
  0x3a   :  { %5880 = vmatprep.mubr.msk.f32.mxu0 %vm391_vm0, %v284_v1 }
  0x3b   :  { %6081 = vmatmul.mubr.msk.f32.gmra.mrb[26].mxu1 %vm9931_vm1, %v153_v2 }
  0x3c   :  { %6083 = vmatprep.mubr.msk.f32.mxu1 %vm9931_vm1, %v154_v3 }
  0x3d   :  { %5881 = vmatmul.mubr.msk.f32.gmra.mrb[24].mxu0 %vm391_vm0, %v285_v4 }
  0x3e   :  { %5883 = vmatprep.mubr.msk.f32.mxu0 %vm391_vm0, %v286_v5 }
  0x3f   :  { %6084 = vmatmul.mubr.msk.f32.gmra.mrb[28].mxu1 %vm9931_vm1, %v155_v6 }
  0x40   :  { %6086 = vmatprep.mubr.msk.f32.mxu1 %vm9931_vm1, %v156_v7 }
  0x41   :  { %5884 = vmatmul.mubr.msk.f32.gmra.mrb[26].mxu0 %vm391_vm0, %v287_v8 }
  0x42   :  { %5886 = vmatprep.mubr.msk.f32.mxu0 %vm391_vm0, %v288_v9 }
  0x43   :  { %6087 = vmatmul.mubr.msk.f32.gmra.mrb[30].mxu1 %vm9931_vm1, %v157_v10 }
  0x44   :  { %6089 = vmatprep.mubr.msk.f32.mxu1 %vm9931_vm1, %v158_v11 }
  0x45   :  { %17 = vsyncpa [#allocation9], 0  ;;  %5887 = vmatmul.mubr.msk.f32.gmra.mrb[28].mxu0 %vm391_vm0, %v289_v12  ;;  %v160_v15 = vld [vmem:[%s9910_s0 + $0xf0] sm:$0xff]  ;;  %v291_v16 = vld [vmem:[%s9912_s2 + $0xe8] sm:$0xff]  ;;  %v6839_v45 = vmov 0   ;;  %vm3584_vm3 = vcmask 130112  }
  0x46   :  { %5889 = vmatprep.mubr.msk.f32.mxu0 %vm391_vm0, %v290_v13  ;;  %v292_v17 = vld [vmem:[%s9912_s2 + $0xf0] sm:$0xff]  ;;  %v161_v18 = vld [vmem:[%s9910_s0 + $0xf8] sm:$0xff]  ;;  %v162_v19 = vld [vmem:[%s9910_s0 + $0x100] sm:$0xff]  ;;  %6391 = vset.pattern.permute.xlu0 %v6839_v45  ;;  %vm3591_vm4 = vcmask 195712   ;;  %vm3598_vm5 = vcmask 261312   ;;  %vm3605_vm6 = vcmask 326912  }
  0x47   :  { %6090 = vmatmul.mubr.msk.f32.gmra.mrb[32].mxu1 %vm9931_vm1, %v159_v14  ;;  %v293_v20 = vld [vmem:[%s9912_s2 + $0xf8] sm:$0xff]  ;;  %v294_v21 = vld [vmem:[%s9912_s2 + $0x100] sm:$0xff]  ;;  %v163_v22 = vld [vmem:[%s9910_s0 + $0x108] sm:$0xff]  ;;  %6392 = vset.pattern.permute.xlu1 %v6839_v45  ;;  %vm3612_vm7 = vcmask 392512   ;;  %vm3619_vm8 = vcmask 458112   ;;  %vm3626_vm9 = vcmask 523712  }
  0x48   :  { %6092 = vmatprep.mubr.msk.f32.mxu1 %vm9931_vm1, %v160_v15  ;;  %v164_v23 = vld [vmem:[%s9910_s0 + $0x110] sm:$0xff]  ;;  %v295_v24 = vld [vmem:[%s9912_s2 + $0x108] sm:$0xff]  ;;  %v165_v26 = vld [vmem:[%s9910_s0 + $0x118] sm:$0xff]  ;;  %vm3633_vm10 = vcmask 589312   ;;  %vm3640_vm11 = vcmask 654912   ;;  %vm3647_vm12 = vcmask 720512  }
  0x49   :  { %5890 = vmatmul.mubr.msk.f32.gmra.mrb[30].mxu0 %vm391_vm0, %v291_v16  ;;  %v296_v25 = vld [vmem:[%s9912_s2 + $0x110] sm:$0xff]  ;;  %v166_v27 = vld [vmem:[%s9910_s0 + $0x120] sm:$0xff]  ;;  %v297_v28 = vld [vmem:[%s9912_s2 + $0x118] sm:$0xff]  ;;  %vm3654_vm13 = vcmask 786112   ;;  %vm9921_vm14 = vcmask 851712   ;;  %vm3668_vm15 = vcmask 917312  }
  0x4a   :  { %5892 = vmatprep.mubr.msk.f32.mxu0 %vm391_vm0, %v292_v17  ;;  %v298_v29 = vld [vmem:[%s9912_s2 + $0x120] sm:$0xff]  ;;  %v167_v30 = vld [vmem:[%s9910_s0 + $0x128] sm:$0xff]  ;;  %v168_v31 = vld [vmem:[%s9910_s0 + $0x130] sm:$0xff]  ;;  %vm3682_vm2 = vcmask 1048512   ;;  %s6843_s15 = smov [#allocation8]  }
  0x4b   :  { %6093 = vmatmul.mubr.msk.f32.gmra.mrb[34].mxu1 %vm9931_vm1, %v161_v18  ;;  %v299_v32 = vld [vmem:[%s9912_s2 + $0x128] sm:$0xff]  ;;  %v300_v33 = vld [vmem:[%s9912_s2 + $0x130] sm:$0xff]  ;;  %v169_v34 = vld [vmem:[%s9910_s0 + $0x138] sm:$0xff]  ;;  %s5296_s16 = sshll.u32 %s6843_s15, 4  ;;  %s5297_s16 = int_to_ptr.vmem [resolvable:$true] %s5296_s16 }
  0x4c   :  { %6095 = vmatprep.mubr.msk.f32.mxu1 %vm9931_vm1, %v162_v19  ;;  %v170_v35 = vld [vmem:[%s9910_s0 + $0x140] sm:$0xff]  ;;  %v301_v36 = vld [vmem:[%s9912_s2 + $0x138] sm:$0xff]  ;;  %v171_v38 = vld [vmem:[%s9910_s0 + $0x148] sm:$0xff] }
  0x4d   :  { %5893 = vmatmul.mubr.msk.f32.gmra.mrb[32].mxu0 %vm391_vm0, %v293_v20  ;;  %v302_v37 = vld [vmem:[%s9912_s2 + $0x140] sm:$0xff]  ;;  %v172_v39 = vld [vmem:[%s9910_s0 + $0x150] sm:$0xff]  ;;  %v303_v40 = vld [vmem:[%s9912_s2 + $0x148] sm:$0xff] }
  0x4e   :  { %5895 = vmatprep.mubr.msk.f32.mxu0 %vm391_vm0, %v294_v21  ;;  %v304_v41 = vld [vmem:[%s9912_s2 + $0x150] sm:$0xff]  ;;  %v173_v42 = vld [vmem:[%s9910_s0 + $0x158] sm:$0xff]  ;;  %v174_v43 = vld [vmem:[%s9910_s0 + $0x160] sm:$0xff] }
  0x4f   :  { %6096 = vmatmul.mubr.msk.f32.gmra.mrb[36].mxu1 %vm9931_vm1, %v163_v22  ;;  %v305_v44 = vld [vmem:[%s9912_s2 + $0x158] sm:$0xff]  ;;  %v3442_v46 = vld [vmem:[%s9913_s3] sm:$0xff]  ;;  %v175_v48 = vld [vmem:[%s9910_s0 + $0x168] sm:$0xff] }
  0x50   :  { %6098 = vmatprep.mubr.msk.f32.mxu1 %vm9931_vm1, %v164_v23  ;;  %v306_v47 = vld [vmem:[%s9912_s2 + $0x160] sm:$0xff]  ;;  %3444 = vperm.xlu0 %6391, %v3442_v46   ;;  %v176_v49 = vld [vmem:[%s9910_s0 + $0x170] sm:$0xff]  ;;  %v307_v50 = vld [vmem:[%s9912_s2 + $0x168] sm:$0xff] }
  0x51   :  { %5896 = vmatmul.mubr.msk.f32.gmra.mrb[34].mxu0 %vm391_vm0, %v295_v24  ;;  %v308_v51 = vld [vmem:[%s9912_s2 + $0x170] sm:$0xff]  ;;  %v177_v52 = vld [vmem:[%s9910_s0 + $0x178] sm:$0xff]  ;;  %v178_v53 = vld [vmem:[%s9910_s0 + $0x180] sm:$0xff] }
  0x52   :  { %5898 = vmatprep.mubr.msk.f32.mxu0 %vm391_vm0, %v296_v25  ;;  %v309_v54 = vld [vmem:[%s9912_s2 + $0x178] sm:$0xff]  ;;  %v310_v55 = vld [vmem:[%s9912_s2 + $0x180] sm:$0xff]  ;;  %v179_v56 = vld [vmem:[%s9910_s0 + $0x188] sm:$0xff] }
  0x53   :  { %6099 = vmatmul.mubr.msk.f32.gmra.mrb[38].mxu1 %vm9931_vm1, %v165_v26  ;;  %v180_v57 = vld [vmem:[%s9910_s0 + $0x190] sm:$0xff]  ;;  %v311_v58 = vld [vmem:[%s9912_s2 + $0x188] sm:$0xff]  ;;  %v181_v60 = vld [vmem:[%s9910_s0 + $0x198] sm:$0xff] }
  0x54   :  { %6101 = vmatprep.mubr.msk.f32.mxu1 %vm9931_vm1, %v166_v27  ;;  %v312_v59 = vld [vmem:[%s9912_s2 + $0x190] sm:$0xff]  ;;  %v182_v61 = vld [vmem:[%s9910_s0 + $0x1a0] sm:$0xff]  ;;  %v313_v62 = vld [vmem:[%s9912_s2 + $0x198] sm:$0xff] }
  0x55   :  { %5899 = vmatmul.mubr.msk.f32.gmra.mrb[36].mxu0 %vm391_vm0, %v297_v28  ;;  %v314_v63 = vld [vmem:[%s9912_s2 + $0x1a0] sm:$0xff]  ;;  %v183_v0 = vld [vmem:[%s9910_s0 + $0x1a8] sm:$0xff]  ;;  %v184_v1 = vld [vmem:[%s9910_s0 + $0x1b0] sm:$0xff] }
  0x56   :  { %5901 = vmatprep.mubr.msk.f32.mxu0 %vm391_vm0, %v298_v29  ;;  %v315_v2 = vld [vmem:[%s9912_s2 + $0x1a8] sm:$0xff]  ;;  %v316_v3 = vld [vmem:[%s9912_s2 + $0x1b0] sm:$0xff]  ;;  %v185_v4 = vld [vmem:[%s9910_s0 + $0x1b8] sm:$0xff] }
  0x57   :  { %6102 = vmatmul.mubr.msk.f32.gmra.mrb[40].mxu1 %vm9931_vm1, %v167_v30  ;;  %v186_v5 = vld [vmem:[%s9910_s0 + $0x1c0] sm:$0xff]  ;;  %v317_v6 = vld [vmem:[%s9912_s2 + $0x1b8] sm:$0xff]  ;;  %v187_v8 = vld [vmem:[%s9910_s0 + $0x1c8] sm:$0xff] }
  0x58   :  { %6104 = vmatprep.mubr.msk.f32.mxu1 %vm9931_vm1, %v168_v31  ;;  %v318_v7 = vld [vmem:[%s9912_s2 + $0x1c0] sm:$0xff]  ;;  %v188_v9 = vld [vmem:[%s9910_s0 + $0x1d0] sm:$0xff]  ;;  %v319_v10 = vld [vmem:[%s9912_s2 + $0x1c8] sm:$0xff] }
  0x59   :  { %5902 = vmatmul.mubr.msk.f32.gmra.mrb[38].mxu0 %vm391_vm0, %v299_v32  ;;  %v320_v11 = vld [vmem:[%s9912_s2 + $0x1d0] sm:$0xff]  ;;  %v189_v12 = vld [vmem:[%s9910_s0 + $0x1d8] sm:$0xff]  ;;  %v190_v13 = vld [vmem:[%s9910_s0 + $0x1e0] sm:$0xff] }
  0x5a   :  { %5904 = vmatprep.mubr.msk.f32.mxu0 %vm391_vm0, %v300_v33  ;;  %v321_v14 = vld [vmem:[%s9912_s2 + $0x1d8] sm:$0xff]  ;;  %v322_v15 = vld [vmem:[%s9912_s2 + $0x1e0] sm:$0xff]  ;;  %v191_v16 = vld [vmem:[%s9910_s0 + $0x1e8] sm:$0xff] }
  0x5b   :  { %6105 = vmatmul.mubr.msk.f32.gmra.mrb[42].mxu1 %vm9931_vm1, %v169_v34  ;;  %v192_v17 = vld [vmem:[%s9910_s0 + $0x1f0] sm:$0xff]  ;;  %v323_v18 = vld [vmem:[%s9912_s2 + $0x1e8] sm:$0xff]  ;;  %v193_v20 = vld [vmem:[%s9910_s0 + $0x1f8] sm:$0xff] }
  0x5c   :  { %6107 = vmatprep.mubr.msk.f32.mxu1 %vm9931_vm1, %v170_v35  ;;  %v324_v19 = vld [vmem:[%s9912_s2 + $0x1f0] sm:$0xff]  ;;  %v194_v21 = vld [vmem:[%s9910_s0 + $0x200] sm:$0xff]  ;;  %v325_v22 = vld [vmem:[%s9912_s2 + $0x1f8] sm:$0xff] }
  0x5d   :  { %5905 = vmatmul.mubr.msk.f32.gmra.mrb[40].mxu0 %vm391_vm0, %v301_v36  ;;  %v326_v23 = vld [vmem:[%s9912_s2 + $0x200] sm:$0xff]  ;;  %v195_v24 = vld [vmem:[%s9910_s0 + $0x208] sm:$0xff]  ;;  %v196_v25 = vld [vmem:[%s9910_s0 + $0x210] sm:$0xff] }
  0x5e   :  { %5907 = vmatprep.mubr.msk.f32.mxu0 %vm391_vm0, %v302_v37  ;;  %v327_v26 = vld [vmem:[%s9912_s2 + $0x208] sm:$0xff]  ;;  %v328_v27 = vld [vmem:[%s9912_s2 + $0x210] sm:$0xff]  ;;  %v197_v28 = vld [vmem:[%s9910_s0 + $0x218] sm:$0xff] }
  0x5f   :  { %6108 = vmatmul.mubr.msk.f32.gmra.mrb[44].mxu1 %vm9931_vm1, %v171_v38  ;;  %v198_v29 = vld [vmem:[%s9910_s0 + $0x220] sm:$0xff]  ;;  %v329_v30 = vld [vmem:[%s9912_s2 + $0x218] sm:$0xff]  ;;  %v199_v32 = vld [vmem:[%s9910_s0 + $0x228] sm:$0xff] }
  0x60   :  { %6110 = vmatprep.mubr.msk.f32.mxu1 %vm9931_vm1, %v172_v39  ;;  %v330_v31 = vld [vmem:[%s9912_s2 + $0x220] sm:$0xff]  ;;  %v200_v33 = vld [vmem:[%s9910_s0 + $0x230] sm:$0xff]  ;;  %v331_v34 = vld [vmem:[%s9912_s2 + $0x228] sm:$0xff] }
  0x61   :  { %5908 = vmatmul.mubr.msk.f32.gmra.mrb[42].mxu0 %vm391_vm0, %v303_v40  ;;  %v332_v35 = vld [vmem:[%s9912_s2 + $0x230] sm:$0xff]  ;;  %v201_v36 = vld [vmem:[%s9910_s0 + $0x238] sm:$0xff]  ;;  %v202_v37 = vld [vmem:[%s9910_s0 + $0x240] sm:$0xff] }
  0x62   :  { %5910 = vmatprep.mubr.msk.f32.mxu0 %vm391_vm0, %v304_v41  ;;  %v333_v38 = vld [vmem:[%s9912_s2 + $0x238] sm:$0xff]  ;;  %v334_v39 = vld [vmem:[%s9912_s2 + $0x240] sm:$0xff]  ;;  %v203_v40 = vld [vmem:[%s9910_s0 + $0x248] sm:$0xff] }
  0x63   :  { %6111 = vmatmul.mubr.msk.f32.gmra.mrb[46].mxu1 %vm9931_vm1, %v173_v42  ;;  %v204_v41 = vld [vmem:[%s9910_s0 + $0x250] sm:$0xff]  ;;  %v335_v42 = vld [vmem:[%s9912_s2 + $0x248] sm:$0xff]  ;;  %v206_v45 = vld [vmem:[%s9910_s0 + $0x260] sm:$0xff] }
  0x64   :  { %6113 = vmatprep.mubr.msk.f32.mxu1 %vm9931_vm1, %v174_v43  ;;  %v336_v43 = vld [vmem:[%s9912_s2 + $0x250] sm:$0xff]  ;;  %v337_v46 = vld [vmem:[%s9912_s2 + $0x258] sm:$0xff] }
  0x65   :  { %5911 = vmatmul.mubr.msk.f32.gmra.mrb[44].mxu0 %vm391_vm0, %v305_v44  ;;  %v205_v44 = vld [vmem:[%s9910_s0 + $0x258] sm:$0xff] }
  0x66   :  { %5913 = vmatprep.mubr.msk.f32.mxu0 %vm391_vm0, %v306_v47  ;;  %v338_v47 = vld [vmem:[%s9912_s2 + $0x260] sm:$0xff] }
  0x67   :  { %6114 = vmatmul.mubr.msk.f32.gmra.mrb[48].mxu1 %vm9931_vm1, %v175_v48  ;;  %v207_v48 = vld [vmem:[%s9910_s0 + $0x268] sm:$0xff] }
  0x68   :  { %6116 = vmatprep.mubr.msk.f32.mxu1 %vm9931_vm1, %v176_v49  ;;  %v208_v49 = vld [vmem:[%s9910_s0 + $0x270] sm:$0xff] }
  0x69   :  { %5914 = vmatmul.mubr.msk.f32.gmra.mrb[46].mxu0 %vm391_vm0, %v307_v50  ;;  %v339_v50 = vld [vmem:[%s9912_s2 + $0x268] sm:$0xff] }
  0x6a   :  { %5916 = vmatprep.mubr.msk.f32.mxu0 %vm391_vm0, %v308_v51  ;;  %v340_v51 = vld [vmem:[%s9912_s2 + $0x270] sm:$0xff] }
  0x6b   :  { %6117 = vmatmul.mubr.msk.f32.gmra.mrb[50].mxu1 %vm9931_vm1, %v177_v52  ;;  %v209_v52 = vld [vmem:[%s9910_s0 + $0x278] sm:$0xff] }
  0x6c   :  { %6119 = vmatprep.mubr.msk.f32.mxu1 %vm9931_vm1, %v178_v53  ;;  %v210_v53 = vld [vmem:[%s9910_s0 + $0x280] sm:$0xff] }
  0x6d   :  { %5917 = vmatmul.mubr.msk.f32.gmra.mrb[48].mxu0 %vm391_vm0, %v309_v54  ;;  %v341_v54 = vld [vmem:[%s9912_s2 + $0x278] sm:$0xff] }
  0x6e   :  { %5919 = vmatprep.mubr.msk.f32.mxu0 %vm391_vm0, %v310_v55  ;;  %v342_v55 = vld [vmem:[%s9912_s2 + $0x280] sm:$0xff] }
  0x6f   :  { %6120 = vmatmul.mubr.msk.f32.gmra.mrb[52].mxu1 %vm9931_vm1, %v179_v56  ;;  %v211_v56 = vld [vmem:[%s9910_s0 + $0x288] sm:$0xff] }
  0x70   :  { %6122 = vmatprep.mubr.msk.f32.mxu1 %vm9931_vm1, %v180_v57  ;;  %v212_v57 = vld [vmem:[%s9910_s0 + $0x290] sm:$0xff] }
  0x71   :  { %5920 = vmatmul.mubr.msk.f32.gmra.mrb[50].mxu0 %vm391_vm0, %v311_v58  ;;  %v343_v58 = vld [vmem:[%s9912_s2 + $0x288] sm:$0xff] }
  0x72   :  { %5922 = vmatprep.mubr.msk.f32.mxu0 %vm391_vm0, %v312_v59  ;;  %v344_v59 = vld [vmem:[%s9912_s2 + $0x290] sm:$0xff] }
  0x73   :  { %6123 = vmatmul.mubr.msk.f32.gmra.mrb[54].mxu1 %vm9931_vm1, %v181_v60  ;;  %v213_v60 = vld [vmem:[%s9910_s0 + $0x298] sm:$0xff] }
  0x74   :  { %6125 = vmatprep.mubr.msk.f32.mxu1 %vm9931_vm1, %v182_v61  ;;  %v214_v61 = vld [vmem:[%s9910_s0 + $0x2a0] sm:$0xff] }
  0x75   :  { %5923 = vmatmul.mubr.msk.f32.gmra.mrb[52].mxu0 %vm391_vm0, %v313_v62  ;;  %v345_v62 = vld [vmem:[%s9912_s2 + $0x298] sm:$0xff] }
  0x76   :  { %5925 = vmatprep.mubr.msk.f32.mxu0 %vm391_vm0, %v314_v63  ;;  %v346_v63 = vld [vmem:[%s9912_s2 + $0x2a0] sm:$0xff] }
  0x77   :  { %6126 = vmatmul.mubr.msk.f32.gmra.mrb[56].mxu1 %vm9931_vm1, %v183_v0  ;;  %v215_v0 = vld [vmem:[%s9910_s0 + $0x2a8] sm:$0xff] }
  0x78   :  { %6128 = vmatprep.mubr.msk.f32.mxu1 %vm9931_vm1, %v184_v1  ;;  %v216_v1 = vld [vmem:[%s9910_s0 + $0x2b0] sm:$0xff] }
  0x79   :  { %5926 = vmatmul.mubr.msk.f32.gmra.mrb[54].mxu0 %vm391_vm0, %v315_v2  ;;  %v347_v2 = vld [vmem:[%s9912_s2 + $0x2a8] sm:$0xff] }
  0x7a   :  { %5928 = vmatprep.mubr.msk.f32.mxu0 %vm391_vm0, %v316_v3  ;;  %v348_v3 = vld [vmem:[%s9912_s2 + $0x2b0] sm:$0xff] }
  0x7b   :  { %6129 = vmatmul.mubr.msk.f32.gmra.mrb[58].mxu1 %vm9931_vm1, %v185_v4  ;;  %v217_v4 = vld [vmem:[%s9910_s0 + $0x2b8] sm:$0xff] }
  0x7c   :  { %6131 = vmatprep.mubr.msk.f32.mxu1 %vm9931_vm1, %v186_v5  ;;  %v218_v5 = vld [vmem:[%s9910_s0 + $0x2c0] sm:$0xff] }
  0x7d   :  { %5929 = vmatmul.mubr.msk.f32.gmra.mrb[56].mxu0 %vm391_vm0, %v317_v6  ;;  %v349_v6 = vld [vmem:[%s9912_s2 + $0x2b8] sm:$0xff] }
  0x7e   :  { %5931 = vmatprep.mubr.msk.f32.mxu0 %vm391_vm0, %v318_v7  ;;  %v350_v7 = vld [vmem:[%s9912_s2 + $0x2c0] sm:$0xff] }
  0x7f   :  { %6132 = vmatmul.mubr.msk.f32.gmra.mrb[60].mxu1 %vm9931_vm1, %v187_v8  ;;  %v219_v8 = vld [vmem:[%s9910_s0 + $0x2c8] sm:$0xff] }
  0x80   :  { %6134 = vmatprep.mubr.msk.f32.mxu1 %vm9931_vm1, %v188_v9  ;;  %v220_v9 = vld [vmem:[%s9910_s0 + $0x2d0] sm:$0xff] }
  0x81   :  { %5932 = vmatmul.mubr.msk.f32.gmra.mrb[58].mxu0 %vm391_vm0, %v319_v10  ;;  %v351_v10 = vld [vmem:[%s9912_s2 + $0x2c8] sm:$0xff] }
  0x82   :  { %5934 = vmatprep.mubr.msk.f32.mxu0 %vm391_vm0, %v320_v11  ;;  %v352_v11 = vld [vmem:[%s9912_s2 + $0x2d0] sm:$0xff] }
  0x83   :  { %6135 = vmatmul.mubr.msk.f32.gmra.mrb[62].mxu1 %vm9931_vm1, %v189_v12  ;;  %v221_v12 = vld [vmem:[%s9910_s0 + $0x2d8] sm:$0xff] }
  0x84   :  { %6137 = vmatprep.mubr.msk.f32.mxu1 %vm9931_vm1, %v190_v13  ;;  %v222_v13 = vld [vmem:[%s9910_s0 + $0x2e0] sm:$0xff] }
  0x85   :  { %5935 = vmatmul.mubr.msk.f32.gmra.mrb[60].mxu0 %vm391_vm0, %v321_v14  ;;  %v353_v14 = vld [vmem:[%s9912_s2 + $0x2d8] sm:$0xff] }
  0x86   :  { %5937 = vmatprep.mubr.msk.f32.mxu0 %vm391_vm0, %v322_v15  ;;  %v354_v15 = vld [vmem:[%s9912_s2 + $0x2e0] sm:$0xff] }
  0x87   :  { %6138 = vmatmul.mubr.msk.f32.gmra.mrb[64].mxu1 %vm9931_vm1, %v191_v16  ;;  %v223_v16 = vld [vmem:[%s9910_s0 + $0x2e8] sm:$0xff] }
  0x88   :  { %6140 = vmatprep.mubr.msk.f32.mxu1 %vm9931_vm1, %v192_v17  ;;  %v224_v17 = vld [vmem:[%s9910_s0 + $0x2f0] sm:$0xff] }
  0x89   :  { %5938 = vmatmul.mubr.msk.f32.gmra.mrb[62].mxu0 %vm391_vm0, %v323_v18  ;;  %v355_v18 = vld [vmem:[%s9912_s2 + $0x2e8] sm:$0xff] }
  0x8a   :  { %5940 = vmatprep.mubr.msk.f32.mxu0 %vm391_vm0, %v324_v19  ;;  %v356_v19 = vld [vmem:[%s9912_s2 + $0x2f0] sm:$0xff] }
  0x8b   :  { %6141 = vmatmul.mubr.msk.f32.gmra.mrb[66].mxu1 %vm9931_vm1, %v193_v20  ;;  %v225_v20 = vld [vmem:[%s9910_s0 + $0x2f8] sm:$0xff] }
  0x8c   :  { %6143 = vmatprep.mubr.msk.f32.mxu1 %vm9931_vm1, %v194_v21  ;;  %v226_v21 = vld [vmem:[%s9910_s0 + $0x300] sm:$0xff] }
  0x8d   :  { %5941 = vmatmul.mubr.msk.f32.gmra.mrb[64].mxu0 %vm391_vm0, %v325_v22  ;;  %v357_v22 = vld [vmem:[%s9912_s2 + $0x2f8] sm:$0xff] }
  0x8e   :  { %5943 = vmatprep.mubr.msk.f32.mxu0 %vm391_vm0, %v326_v23  ;;  %v358_v23 = vld [vmem:[%s9912_s2 + $0x300] sm:$0xff] }
  0x8f   :  { %6144 = vmatmul.mubr.msk.f32.gmra.mrb[68].mxu1 %vm9931_vm1, %v195_v24  ;;  %v227_v24 = vld [vmem:[%s9910_s0 + $0x308] sm:$0xff] }
  0x90   :  { %6146 = vmatprep.mubr.msk.f32.mxu1 %vm9931_vm1, %v196_v25  ;;  %v228_v25 = vld [vmem:[%s9910_s0 + $0x310] sm:$0xff] }
  0x91   :  { %5944 = vmatmul.mubr.msk.f32.gmra.mrb[66].mxu0 %vm391_vm0, %v327_v26  ;;  %v359_v26 = vld [vmem:[%s9912_s2 + $0x308] sm:$0xff] }
  0x92   :  { %5946 = vmatprep.mubr.msk.f32.mxu0 %vm391_vm0, %v328_v27  ;;  %v360_v27 = vld [vmem:[%s9912_s2 + $0x310] sm:$0xff] }
  0x93   :  { %6147 = vmatmul.mubr.msk.f32.gmra.mrb[70].mxu1 %vm9931_vm1, %v197_v28  ;;  %v229_v28 = vld [vmem:[%s9910_s0 + $0x318] sm:$0xff] }
  0x94   :  { %6149 = vmatprep.mubr.msk.f32.mxu1 %vm9931_vm1, %v198_v29  ;;  %v230_v29 = vld [vmem:[%s9910_s0 + $0x320] sm:$0xff] }
  0x95   :  { %5947 = vmatmul.mubr.msk.f32.gmra.mrb[68].mxu0 %vm391_vm0, %v329_v30  ;;  %v361_v30 = vld [vmem:[%s9912_s2 + $0x318] sm:$0xff] }
  0x96   :  { %5949 = vmatprep.mubr.msk.f32.mxu0 %vm391_vm0, %v330_v31  ;;  %v362_v31 = vld [vmem:[%s9912_s2 + $0x320] sm:$0xff] }
  0x97   :  { %6150 = vmatmul.mubr.msk.f32.gmra.mrb[72].mxu1 %vm9931_vm1, %v199_v32  ;;  %v231_v32 = vld [vmem:[%s9910_s0 + $0x328] sm:$0xff] }
  0x98   :  { %6152 = vmatprep.mubr.msk.f32.mxu1 %vm9931_vm1, %v200_v33  ;;  %v232_v33 = vld [vmem:[%s9910_s0 + $0x330] sm:$0xff] }
  0x99   :  { %5950 = vmatmul.mubr.msk.f32.gmra.mrb[70].mxu0 %vm391_vm0, %v331_v34  ;;  %v363_v34 = vld [vmem:[%s9912_s2 + $0x328] sm:$0xff] }
  0x9a   :  { %5952 = vmatprep.mubr.msk.f32.mxu0 %vm391_vm0, %v332_v35  ;;  %v364_v35 = vld [vmem:[%s9912_s2 + $0x330] sm:$0xff] }
  0x9b   :  { %6153 = vmatmul.mubr.msk.f32.gmra.mrb[74].mxu1 %vm9931_vm1, %v201_v36  ;;  %v233_v36 = vld [vmem:[%s9910_s0 + $0x338] sm:$0xff] }
  0x9c   :  { %6155 = vmatprep.mubr.msk.f32.mxu1 %vm9931_vm1, %v202_v37  ;;  %v234_v37 = vld [vmem:[%s9910_s0 + $0x340] sm:$0xff] }
  0x9d   :  { %5953 = vmatmul.mubr.msk.f32.gmra.mrb[72].mxu0 %vm391_vm0, %v333_v38  ;;  %v365_v38 = vld [vmem:[%s9912_s2 + $0x338] sm:$0xff] }
  0x9e   :  { %5955 = vmatprep.mubr.msk.f32.mxu0 %vm391_vm0, %v334_v39  ;;  %v366_v39 = vld [vmem:[%s9912_s2 + $0x340] sm:$0xff] }
  0x9f   :  { %6156 = vmatmul.mubr.msk.f32.gmra.mrb[76].mxu1 %vm9931_vm1, %v203_v40  ;;  %v235_v40 = vld [vmem:[%s9910_s0 + $0x348] sm:$0xff] }
  0xa0   :  { %6158 = vmatprep.mubr.msk.f32.mxu1 %vm9931_vm1, %v204_v41  ;;  %v236_v41 = vld [vmem:[%s9910_s0 + $0x350] sm:$0xff] }
  0xa1   :  { %5956 = vmatmul.mubr.msk.f32.gmra.mrb[74].mxu0 %vm391_vm0, %v335_v42  ;;  %v5309_v42 = vld [vmem:[%s9915_s5] ss:$0 sm:$0xff] }
  0xa2   :  { %5958 = vmatprep.mubr.msk.f32.mxu0 %vm391_vm0, %v336_v43  ;;  %v367_v43 = vld [vmem:[%s9912_s2 + $0x348] sm:$0xff] }
  0xa3   :  { %6159 = vmatmul.mubr.msk.f32.gmra.mrb[78].mxu1 %vm9931_vm1, %v205_v44  ;;  %v6840_v44 = vmov 1966171168  }
  0xa4   :  { %6161 = vmatprep.mubr.msk.f32.mxu1 %vm9931_vm1, %v206_v45  ;;  %v2575_v45 = vunpack.c.l.s4 %v6840_v44 }
  0xa5   :  { %5959 = vmatmul.mubr.msk.f32.gmra.mrb[76].mxu0 %vm391_vm0, %v337_v46  ;;  %v2577_v46 = vlaneseq }
  0xa6   :  { %5961 = vmatprep.mubr.msk.f32.mxu0 %vm391_vm0, %v338_v47  ;;  %v368_v47 = vld [vmem:[%s9912_s2 + $0x350] sm:$0xff] }
  0xa7   :  { %6162 = vmatmul.mubr.msk.f32.gmra.mrb[80].mxu1 %vm9931_vm1, %v207_v48 }
  0xa8   :  { %6164 = vmatprep.mubr.msk.f32.mxu1 %vm9931_vm1, %v208_v49  ;;  %v237_v49 = vld [vmem:[%s9910_s0 + $0x358] sm:$0xff] }
  0xa9   :  { %5962 = vmatmul.mubr.msk.f32.gmra.mrb[78].mxu0 %vm391_vm0, %v339_v50 }
  0xaa   :  { %5964 = vmatprep.mubr.msk.f32.mxu0 %vm391_vm0, %v340_v51 }
  0xab   :  { %6165 = vmatmul.mubr.msk.f32.gmra.mrb[82].mxu1 %vm9931_vm1, %v209_v52  ;;  %v238_v52 = vld [vmem:[%s9910_s0 + $0x360] sm:$0xff] }
  0xac   :  { %6167 = vmatprep.mubr.msk.f32.mxu1 %vm9931_vm1, %v210_v53  ;;  %v369_v53 = vld [vmem:[%s9912_s2 + $0x358] sm:$0xff] }
  0xad   :  { %5965 = vmatmul.mubr.msk.f32.gmra.mrb[80].mxu0 %vm391_vm0, %v341_v54 }
  0xae   :  { %5967 = vmatprep.mubr.msk.f32.mxu0 %vm391_vm0, %v342_v55  ;;  %v2576_v55 = vunpack.c.0.s8 %v2575_v45  ;;  %v378_v45 = vld [vmem:[%s9912_s2 + $0x3a0] sm:$0xff] }
  0xaf   :  { %6168 = vmatmul.mubr.msk.f32.gmra.mrb[84].mxu1 %vm9931_vm1, %v211_v56  ;;  %v7820_v56 = vshrl.u32 %v2577_v46, 7 }
  0xb0   :  { %6170 = vmatprep.mubr.msk.f32.mxu1 %vm9931_vm1, %v212_v57  ;;  %v370_v57 = vld [vmem:[%s9912_s2 + $0x360] sm:$0xff] }
  0xb1   :  { %5968 = vmatmul.mubr.msk.f32.gmra.mrb[82].mxu0 %vm391_vm0, %v343_v58  ;;  %9932 = vst [vmem:[#allocation12_spill] sm:$0xff] %v7820_v56 }
  0xb2   :  { %5970 = vmatprep.mubr.msk.f32.mxu0 %vm391_vm0, %v344_v59  ;;  %v239_v59 = vld [vmem:[%s9910_s0 + $0x368] sm:$0xff] }
  0xb3   :  { %6171 = vmatmul.mubr.msk.f32.gmra.mrb[86].mxu1 %vm9931_vm1, %v213_v60 }
  0xb4   :  { %6173 = vmatprep.mubr.msk.f32.mxu1 %vm9931_vm1, %v214_v61 }
  0xb5   :  { %5971 = vmatmul.mubr.msk.f32.gmra.mrb[84].mxu0 %vm391_vm0, %v345_v62  ;;  %v240_v62 = vld [vmem:[%s9910_s0 + $0x370] sm:$0xff] }
  0xb6   :  { %5973 = vmatprep.mubr.msk.f32.mxu0 %vm391_vm0, %v346_v63 }
  0xb7   :  { %6174 = vmatmul.mubr.msk.f32.gmra.mrb[88].mxu1 %vm9931_vm1, %v215_v0  ;;  %v371_v0 = vld [vmem:[%s9912_s2 + $0x368] sm:$0xff] }
  0xb8   :  { %6176 = vmatprep.mubr.msk.f32.mxu1 %vm9931_vm1, %v216_v1 }
  0xb9   :  { %5974 = vmatmul.mubr.msk.f32.gmra.mrb[86].mxu0 %vm391_vm0, %v347_v2 }
  0xba   :  { %5976 = vmatprep.mubr.msk.f32.mxu0 %vm391_vm0, %v348_v3  ;;  %v7839_v3 = vsub.s32 %v2576_v55, %v7820_v56 }
  0xbb   :  { %6177 = vmatmul.mubr.msk.f32.gmra.mrb[90].mxu1 %vm9931_vm1, %v217_v4  ;;  %v372_v4 = vld [vmem:[%s9912_s2 + $0x370] sm:$0xff] }
  0xbc   :  { %6179 = vmatprep.mubr.msk.f32.mxu1 %vm9931_vm1, %v218_v5 }
  0xbd   :  { %5977 = vmatmul.mubr.msk.f32.gmra.mrb[88].mxu0 %vm391_vm0, %v349_v6  ;;  %v241_v6 = vld [vmem:[%s9910_s0 + $0x378] sm:$0xff] }
  0xbe   :  { %5979 = vmatprep.mubr.msk.f32.mxu0 %vm391_vm0, %v350_v7 }
  0xbf   :  { %6180 = vmatmul.mubr.msk.f32.gmra.mrb[92].mxu1 %vm9931_vm1, %v219_v8 }
  0xc0   :  { %6182 = vmatprep.mubr.msk.f32.mxu1 %vm9931_vm1, %v220_v9 }
  0xc1   :  { %5980 = vmatmul.mubr.msk.f32.gmra.mrb[90].mxu0 %vm391_vm0, %v351_v10  ;;  %v242_v10 = vld [vmem:[%s9910_s0 + $0x380] sm:$0xff] }
  0xc2   :  { %5982 = vmatprep.mubr.msk.f32.mxu0 %vm391_vm0, %v352_v11 }
  0xc3   :  { %6183 = vmatmul.mubr.msk.f32.gmra.mrb[94].mxu1 %vm9931_vm1, %v221_v12 }
  0xc4   :  { %6185 = vmatprep.mubr.msk.f32.mxu1 %vm9931_vm1, %v222_v13  ;;  %v373_v13 = vld [vmem:[%s9912_s2 + $0x378] sm:$0xff] }
  0xc5   :  { %5983 = vmatmul.mubr.msk.f32.gmra.mrb[92].mxu0 %vm391_vm0, %v353_v14 }
  0xc6   :  { %5985 = vmatprep.mubr.msk.f32.mxu0 %vm391_vm0, %v354_v15 }
  0xc7   :  { %6186 = vmatmul.mubr.msk.f32.gmra.mrb[96].mxu1 %vm9931_vm1, %v223_v16 }
  0xc8   :  { %6188 = vmatprep.mubr.msk.f32.mxu1 %vm9931_vm1, %v224_v17 }
  0xc9   :  { %5986 = vmatmul.mubr.msk.f32.gmra.mrb[94].mxu0 %vm391_vm0, %v355_v18  ;;  %v374_v18 = vld [vmem:[%s9912_s2 + $0x380] sm:$0xff] }
  0xca   :  { %5988 = vmatprep.mubr.msk.f32.mxu0 %vm391_vm0, %v356_v19  ;;  %v7865_v19 = vsub.s32 0, %v7820_v56 }
  0xcb   :  { %6189 = vmatmul.mubr.msk.f32.gmra.mrb[98].mxu1 %vm9931_vm1, %v225_v20 }
  0xcc   :  { %6191 = vmatprep.mubr.msk.f32.mxu1 %vm9931_vm1, %v226_v21  ;;  %9933 = vst [vmem:[#allocation13_spill] sm:$0xff] %v7865_v19  ;;  %v243_v21 = vld [vmem:[%s9910_s0 + $0x388] sm:$0xff] }
  0xcd   :  { %5989 = vmatmul.mubr.msk.f32.gmra.mrb[96].mxu0 %vm391_vm0, %v357_v22 }
  0xce   :  { %5991 = vmatprep.mubr.msk.f32.mxu0 %vm391_vm0, %v358_v23 }
  0xcf   :  { %6192 = vmatmul.mubr.msk.f32.gmra.mrb[100].mxu1 %vm9931_vm1, %v227_v24 }
  0xd0   :  { %6194 = vmatprep.mubr.msk.f32.mxu1 %vm9931_vm1, %v228_v25 }
  0xd1   :  { %5992 = vmatmul.mubr.msk.f32.gmra.mrb[98].mxu0 %vm391_vm0, %v359_v26  ;;  %v244_v26 = vld [vmem:[%s9910_s0 + $0x390] sm:$0xff] }
  0xd2   :  { %5994 = vmatprep.mubr.msk.f32.mxu0 %vm391_vm0, %v360_v27 }
  0xd3   :  { %6195 = vmatmul.mubr.msk.f32.gmra.mrb[102].mxu1 %vm9931_vm1, %v229_v28 }
  0xd4   :  { %6197 = vmatprep.mubr.msk.f32.mxu1 %vm9931_vm1, %v230_v29  ;;  %v375_v29 = vld [vmem:[%s9912_s2 + $0x388] sm:$0xff] }
  0xd5   :  { %5995 = vmatmul.mubr.msk.f32.gmra.mrb[100].mxu0 %vm391_vm0, %v361_v30 }
  0xd6   :  { %5997 = vmatprep.mubr.msk.f32.mxu0 %vm391_vm0, %v362_v31 }
  0xd7   :  { %6198 = vmatmul.mubr.msk.f32.gmra.mrb[104].mxu1 %vm9931_vm1, %v231_v32 }
  0xd8   :  { %6200 = vmatprep.mubr.msk.f32.mxu1 %vm9931_vm1, %v232_v33  ;;  %v376_v33 = vld [vmem:[%s9912_s2 + $0x390] sm:$0xff] }
  0xd9   :  { %5998 = vmatmul.mubr.msk.f32.gmra.mrb[102].mxu0 %vm391_vm0, %v363_v34 }
  0xda   :  { %6000 = vmatprep.mubr.msk.f32.mxu0 %vm391_vm0, %v364_v35 }
  0xdb   :  { %6201 = vmatmul.mubr.msk.f32.gmra.mrb[106].mxu1 %vm9931_vm1, %v233_v36  ;;  %v245_v36 = vld [vmem:[%s9910_s0 + $0x398] sm:$0xff] }
  0xdc   :  { %6203 = vmatprep.mubr.msk.f32.mxu1 %vm9931_vm1, %v234_v37 }
  0xdd   :  { %6001 = vmatmul.mubr.msk.f32.gmra.mrb[104].mxu0 %vm391_vm0, %v365_v38 }
  0xde   :  { %6003 = vmatprep.mubr.msk.f32.mxu0 %vm391_vm0, %v366_v39  ;;  %v246_v39 = vld [vmem:[%s9910_s0 + $0x3a0] sm:$0xff] }
  0xdf   :  { %6204 = vmatmul.mubr.msk.f32.gmra.mrb[108].mxu1 %vm9931_vm1, %v235_v40 }
  0xe0   :  { %v122_v48 = vpop.f32.mrb[0].mxu0  ;;  %6206 = vmatprep.mubr.msk.f32.mxu1 %vm9931_vm1, %v236_v41 }
  0xe1   :  { %v123_v50 = vadd.f32 %v5309_v42, %v122_v48  ;;  %v5844_v51 = vpop.f32.mrb[1].mxu0  ;;  %6004 = vmatmul.mubr.msk.f32.gmra.mrb[106].mxu0 %vm391_vm0, %v367_v43  ;;  %v377_v43 = vld [vmem:[%s9912_s2 + $0x398] sm:$0xff] }
  0xe2   :  { %6006 = vmatprep.mubr.msk.f32.mxu0 %vm391_vm0, %v368_v47  ;;  %v6049_v54 = vpop.f32.mrb[4].mxu1 }
  0xe3   :  { %126 = vst.msk [vmem:[#allocation2] sm:$0xff] %vm9931_vm1, %v123_v50  ;;  %6207 = vmatmul.mubr.msk.f32.gmra.mrb[110].mxu1 %vm9931_vm1, %v237_v49  ;;  %v1932_v58 = vpop.f32.mrb[5].mxu1  ;;  %v247_v50 = vld [vmem:[%s9910_s0 + $0x3a8] sm:$0xff] }
  0xe4   :  { %6209 = vmatprep.mubr.msk.f32.mxu1 %vm9931_vm1, %v238_v52  ;;  %v5849_v60 = vpop.f32.mrb[2].mxu0 }
  0xe5   :  { %6007 = vmatmul.mubr.msk.f32.gmra.mrb[108].mxu0 %vm391_vm0, %v369_v53  ;;  %v1938_v61 = vadd.f32 %v6049_v54, %v5849_v60  ;;  %v842_v63 = vpop.f32.mrb[3].mxu0  ;;  %v248_v54 = vld [vmem:[%s9910_s0 + $0x3b0] sm:$0xff]  ;;  %v379_v60 = vld [vmem:[%s9912_s2 + $0x3a8] sm:$0xff] }
  0xe6   :  { %6009 = vmatprep.mubr.msk.f32.mxu0 %vm391_vm0, %v370_v57  ;;  %v1933_v1 = vadd.f32 %v1932_v58, %v842_v63  ;;  %v6052_v2 = vpop.f32.mrb[6].mxu1  ;;  %v380_v63 = vld [vmem:[%s9912_s2 + $0x3b0] sm:$0xff] }
  0xe7   :  { %6210 = vmatmul.mubr.msk.f32.gmra.mrb[112].mxu1 %vm9931_vm1, %v239_v59  ;;  %v1942_v5 = vpop.f32.mrb[7].mxu1 }
  0xe8   :  { %6212 = vmatprep.mubr.msk.f32.mxu1 %vm9931_vm1, %v240_v62  ;;  %v5852_v7 = vpop.f32.mrb[4].mxu0 }
  0xe9   :  { %6010 = vmatmul.mubr.msk.f32.gmra.mrb[110].mxu0 %vm391_vm0, %v371_v0  ;;  %v1948_v8 = vadd.f32 %v6052_v2, %v5852_v7  ;;  %v852_v9 = vpop.f32.mrb[5].mxu0 }
  0xea   :  { %v2571_v11 = vld [vmem:[#allocation2] sm:$0xff]  ;;  %6012 = vmatprep.mubr.msk.f32.mxu0 %vm391_vm0, %v372_v4  ;;  %v1943_v12 = vadd.f32 %v1942_v5, %v852_v9  ;;  %v6055_v14 = vpop.f32.mrb[8].mxu1  ;;  %v381_v9 = vld [vmem:[%s9912_s2 + $0x3b8] sm:$0xff] }
  0xeb   :  { %v2573_v15 = vcombine.high %v2571_v11, %v2571_v11  ;;  %v7858_v16 = vrot.slane %v2571_v11, %v7839_v3  ;;  %6213 = vmatmul.mubr.msk.f32.gmra.mrb[114].mxu1 %vm9931_vm1, %v241_v6  ;;  %v1952_v17 = vpop.f32.mrb[9].mxu1  ;;  %v250_v6 = vld [vmem:[%s9910_s0 + $0x3c0] sm:$0xff] }
  0xec   :  { %v5855_v20 = vpop.f32.mrb[6].mxu0  ;;  %6215 = vmatprep.mubr.msk.f32.mxu1 %vm9931_vm1, %v242_v10 }
  0xed   :  { %v2587_v22 = vrot.slane %v2573_v15, %v7839_v3  ;;  %v7874_v23 = vrot.slane %v7858_v16, %v7839_v3  ;;  %6013 = vmatmul.mubr.msk.f32.gmra.mrb[112].mxu0 %vm391_vm0, %v373_v13  ;;  %v1958_v24 = vadd.f32 %v6055_v14, %v5855_v20  ;;  %v862_v25 = vpop.f32.mrb[7].mxu0  ;;  %v251_v14 = vld [vmem:[%s9910_s0 + $0x3c8] sm:$0xff]  ;;  %v252_v20 = vld [vmem:[%s9910_s0 + $0x3d0] sm:$0xff] }
  0xee   :  { %v1953_v27 = vadd.f32 %v1952_v17, %v862_v25  ;;  %6015 = vmatprep.mubr.msk.f32.mxu0 %vm391_vm0, %v374_v18  ;;  %v6058_v28 = vpop.f32.mrb[10].mxu1 }
  0xef   :  { %v2589_v30 = vcombine.high %v2587_v22, %v2587_v22  ;;  %v7885_v31 = vrot.slane %v2587_v22, %v7839_v3  ;;  %6216 = vmatmul.mubr.msk.f32.gmra.mrb[116].mxu1 %vm9931_vm1, %v243_v21  ;;  %v1962_v32 = vpop.f32.mrb[11].mxu1  ;;  %v7893_v34 = vrot.slane %v7874_v23, %v7865_v19  ;;  %v7966_v21 = vld [vmem:[%s9918_s8] ss:$0 sm:$0xff] }
  0xf0   :  { %v5858_v35 = vpop.f32.mrb[8].mxu0  ;;  %6218 = vmatprep.mubr.msk.f32.mxu1 %vm9931_vm1, %v244_v26  ;;  %v383_v26 = vld [vmem:[%s9912_s2 + $0x3c8] sm:$0xff] }
  0xf1   :  { %v7900_v37 = vrot.slane %v2589_v30, %v7839_v3  ;;  %v872_v38 = vpop.f32.mrb[9].mxu0  ;;  %6016 = vmatmul.mubr.msk.f32.gmra.mrb[114].mxu0 %vm391_vm0, %v375_v29  ;;  %v2663_v40 = vadd.f32 %v7893_v34, %v1938_v61  ;;  %v2662_v41 = vadd.f32 %v7893_v34, %v1933_v1  ;;  %v2665_v47 = vadd.f32 %v7893_v34, %v1948_v8  ;;  %v249_v1 = vld [vmem:[%s9910_s0 + $0x3b8] sm:$0xff]  ;;  %v384_v30 = vld [vmem:[%s9912_s2 + $0x3d0] sm:$0xff] }
  0xf2   :  { %6018 = vmatprep.mubr.msk.f32.mxu0 %vm391_vm0, %v376_v33  ;;  %v6061_v42 = vpop.f32.mrb[12].mxu1  ;;  %v2664_v48 = vadd.f32 %v7893_v34, %v1943_v12  ;;  %v2666_v51 = vadd.f32 %v7893_v34, %v1953_v27  ;;  %v1968_v52 = vadd.f32 %v6058_v28, %v5858_v35  ;;  %v1963_v55 = vadd.f32 %v1962_v32, %v872_v38  ;;  %v382_v12 = vld [vmem:[%s9912_s2 + $0x3c0] sm:$0xff] }
  0xf3   :  { %6219 = vmatmul.mubr.msk.f32.gmra.mrb[118].mxu1 %vm9931_vm1, %v245_v36  ;;  %v1972_v44 = vpop.f32.mrb[13].mxu1  ;;  %6394 = vtanh.f32 %v2663_v40  ;;  %v2667_v61 = vadd.f32 %v7893_v34, %v1958_v24  ;;  %v253_v36 = vld [vmem:[%s9910_s0 + $0x3d8] sm:$0xff] }
  0xf4   :  { %v5861_v49 = vpop.f32.mrb[10].mxu0  ;;  %6221 = vmatprep.mubr.msk.f32.mxu1 %vm9931_vm1, %v246_v39  ;;  %6396 = vtanh.f32 %v2662_v41  ;;  %v2668_v2 = vadd.f32 %v7893_v34, %v1963_v55  ;;  %v2669_v10 = vadd.f32 %v7893_v34, %v1968_v52 }
  0xf5   :  { %v882_v53 = vpop.f32.mrb[11].mxu0  ;;  %6019 = vmatmul.mubr.msk.f32.gmra.mrb[116].mxu0 %vm391_vm0, %v377_v43  ;;  %6398 = vtanh.f32 %v2665_v47  ;;  %v1978_v57 = vadd.f32 %v6061_v42, %v5861_v49  ;;  %v254_v42 = vld [vmem:[%s9910_s0 + $0x3e0] sm:$0xff] }
  0xf6   :  { %v1973_v58 = vadd.f32 %v1972_v44, %v882_v53  ;;  %6021 = vmatprep.mubr.msk.f32.mxu0 %vm391_vm0, %v378_v45  ;;  %v6064_v59 = vpop.f32.mrb[14].mxu1  ;;  %6400 = vtanh.f32 %v2664_v48  ;;  %v385_v48 = vld [vmem:[%s9912_s2 + $0x3d8] sm:$0xff] }
  0xf7   :  { %6222 = vmatmul.mubr.msk.f32.gmra.mrb[120].mxu1 %vm9931_vm1, %v247_v50  ;;  %v1982_v62 = vpop.f32.mrb[15].mxu1  ;;  %6402 = vtanh.f32 %v2666_v51  ;;  %v2671_v28 = vadd.f32 %v7893_v34, %v1978_v57  ;;  %v2588_v51 = vcombine.high %v7858_v16, %v7858_v16 }
  0xf8   :  { %v5864_v0 = vpop.f32.mrb[12].mxu0  ;;  %6224 = vmatprep.mubr.msk.f32.mxu1 %vm9931_vm1, %v248_v54  ;;  %6404 = vtanh.f32 %v2667_v61  ;;  %v2670_v15 = vadd.f32 %v7893_v34, %v1973_v58  ;;  %v255_v58 = vld [vmem:[%s9910_s0 + $0x3e8] sm:$0xff] }
  0xf9   :  { %v1988_v4 = vadd.f32 %v6064_v59, %v5864_v0  ;;  %v892_v5 = vpop.f32.mrb[13].mxu0  ;;  %6022 = vmatmul.mubr.msk.f32.gmra.mrb[118].mxu0 %vm391_vm0, %v379_v60  ;;  %6406 = vtanh.f32 %v2668_v2 }
  0xfa   :  { %v1983_v7 = vadd.f32 %v1982_v62, %v892_v5  ;;  %6024 = vmatprep.mubr.msk.f32.mxu0 %vm391_vm0, %v380_v63  ;;  %v6067_v8 = vpop.f32.mrb[16].mxu1  ;;  %6408 = vtanh.f32 %v2669_v10  ;;  %v256_v62 = vld [vmem:[%s9910_s0 + $0x3f0] sm:$0xff]  ;;  %v8012_v5 = vrot.slane %v2588_v51, %v7839_v3 }
  0xfb   :  { %6225 = vmatmul.mubr.msk.f32.gmra.mrb[122].mxu1 %vm9931_vm1, %v249_v1  ;;  %v1992_v11 = vpop.f32.mrb[17].mxu1  ;;  %6410 = vtanh.f32 %v2670_v15  ;;  %v2673_v52 = vadd.f32 %v7893_v34, %v1988_v4 }
  0xfc   :  { %v5867_v13 = vpop.f32.mrb[14].mxu0  ;;  %6227 = vmatprep.mubr.msk.f32.mxu1 %vm9931_vm1, %v250_v6  ;;  %v2672_v39 = vadd.f32 %v7893_v34, %v1983_v7  ;;  %6412 = vtanh.f32 %v2671_v28 }
  0xfd   :  { %v1998_v17 = vadd.f32 %v6067_v8, %v5867_v13  ;;  %v902_v18 = vpop.f32.mrb[15].mxu0  ;;  %6025 = vmatmul.mubr.msk.f32.gmra.mrb[120].mxu0 %vm391_vm0, %v381_v9  ;;  %v6395_v22 = vpop.eup %6394 }
  0xfe   :  { %v1993_v24 = vadd.f32 %v1992_v11, %v902_v18  ;;  %6027 = vmatprep.mubr.msk.f32.mxu0 %vm391_vm0, %v382_v12  ;;  %v6070_v25 = vpop.f32.mrb[18].mxu1  ;;  %v6397_v27 = vpop.eup %6396  ;;  %v2926_v49 = vmul.f32 %v6395_v22, %v7966_v21  ;;  %6414 = vtanh.f32 %v2672_v39  ;;  %v257_v11 = vld [vmem:[%s9910_s0 + $0x3f8] sm:$0xff] }
  0xff   :  { %6228 = vmatmul.mubr.msk.f32.gmra.mrb[124].mxu1 %vm9931_vm1, %v251_v14  ;;  %v2002_v29 = vpop.f32.mrb[19].mxu1  ;;  %v6399_v32 = vpop.eup %6398  ;;  %v2925_v35 = vmul.f32 %v6397_v27, %v7966_v21  ;;  %6416 = vtanh.f32 %v2673_v52  ;;  %v2675_v6 = vadd.f32 %v7893_v34, %v1998_v17 }
 0x100   :  { %v5870_v33 = vpop.f32.mrb[16].mxu0  ;;  %6230 = vmatprep.mubr.msk.f32.mxu1 %vm9931_vm1, %v252_v20  ;;  %v6401_v38 = vpop.eup %6400  ;;  %v2928_v57 = vmul.f32 %v6399_v32, %v7966_v21  ;;  %v2674_v16 = vadd.f32 %v7893_v34, %v1993_v24  ;;  %v3056_v63 = vsel %vm9931_vm1, %v2926_v49, 0.0  ;;  %v8027_v24 = vrot.slane %v8012_v5, %v7865_v19 }
 0x101   :  { %v2008_v40 = vadd.f32 %v6070_v25, %v5870_v33  ;;  %6028 = vmatmul.mubr.msk.f32.gmra.mrb[122].mxu0 %vm391_vm0, %v383_v26  ;;  %v912_v41 = vpop.f32.mrb[17].mxu0  ;;  %v3053_v43 = vsel %vm9931_vm1, %v2925_v35, 0.0  ;;  %v2927_v44 = vmul.f32 %v6401_v38, %v7966_v21  ;;  %v6403_v50 = vpop.eup %6402 }
 0x102   :  { %v2003_v45 = vadd.f32 %v2002_v29, %v912_v41  ;;  %6030 = vmatprep.mubr.msk.f32.mxu0 %vm391_vm0, %v384_v30  ;;  %v6073_v47 = vpop.f32.mrb[20].mxu1  ;;  %3054 = vadd.xlane.f32.xlu0 %v3053_v43  ;;  %v6405_v59 = vpop.eup %6404  ;;  %v2929_v2 = vmul.f32 %v6403_v50, %v7966_v21  ;;  %v3062_v8 = vsel %vm9931_vm1, %v2928_v57, 0.0  ;;  %6418 = vtanh.f32 %v2674_v16 }
 0x103   :  { %6231 = vmatmul.mubr.msk.f32.gmra.mrb[126].mxu1 %vm9931_vm1, %v253_v36  ;;  %v2012_v53 = vpop.f32.mrb[21].mxu1  ;;  %v3059_v54 = vsel %vm9931_vm1, %v2927_v44, 0.0  ;;  %v6407_v4 = vpop.eup %6406  ;;  %v2930_v10 = vmul.f32 %v6405_v59, %v7966_v21  ;;  %6420 = vtanh.f32 %v2675_v6  ;;  %v2677_v25 = vadd.f32 %v7893_v34, %v2008_v40 }
 0x104   :  { %v5873_v55 = vpop.f32.mrb[18].mxu0  ;;  %6233 = vmatprep.mubr.msk.f32.mxu1 %vm9931_vm1, %v254_v42  ;;  %3060 = vadd.xlane.f32.xlu1 %v3059_v54  ;;  %v6409_v3 = vpop.eup %6408  ;;  %v2676_v12 = vadd.f32 %v7893_v34, %v2003_v45  ;;  %v3065_v15 = vsel %vm9931_vm1, %v2929_v2, 0.0  ;;  %v2931_v20 = vmul.f32 %v6407_v4, %v7966_v21 }
 0x105   :  { %v2018_v60 = vadd.f32 %v6073_v47, %v5873_v55  ;;  %6031 = vmatmul.mubr.msk.f32.gmra.mrb[124].mxu0 %vm391_vm0, %v385_v48  ;;  %v922_v61 = vpop.f32.mrb[19].mxu0  ;;  %v6411_v22 = vpop.eup %6410  ;;  %v3068_v27 = vsel %vm9931_vm1, %v2930_v10, 0.0  ;;  %v2932_v29 = vmul.f32 %v6409_v3, %v7966_v21  ;;  %vm3675_vm0 = vcmask 982912  }
 0x106   :  { %v2013_v0 = vadd.f32 %v2012_v53, %v922_v61  ;;  %v6076_v1 = vpop.f32.mrb[22].mxu1  ;;  %3057 = vadd.xlane.f32.xlu0 %v3056_v63  ;;  %v6413_v30 = vpop.eup %6412  ;;  %6422 = vtanh.f32 %v2676_v12  ;;  %v3071_v36 = vsel %vm9931_vm1, %v2931_v20, 0.0  ;;  %v2933_v39 = vmul.f32 %v6411_v22, %v7966_v21 }
 0x107   :  { %6234 = vmatmul.mubr.msk.f32.gmra.mrb[0].mxu1 %vm9931_vm1, %v255_v58  ;;  %v2022_v7 = vpop.f32.mrb[23].mxu1  ;;  %6424 = vtanh.f32 %v2677_v25  ;;  %v2679_v41 = vadd.f32 %v8027_v24, %v2018_v60  ;;  %v3074_v43 = vsel %vm9931_vm1, %v2932_v29, 0.0  ;;  %v2934_v45 = vmul.f32 %v6413_v30, %v7966_v21 }
 0x108   :  { %v5876_v9 = vpop.f32.mrb[20].mxu0  ;;  %6236 = vmatprep.mubr.msk.f32.mxu1 %vm9931_vm1, %v256_v62  ;;  %3063 = vadd.xlane.f32.xlu1 %v3062_v8  ;;  %v2678_v32 = vadd.f32 %v8027_v24, %v2013_v0  ;;  %v6415_v40 = vpop.eup %6414  ;;  %v3077_v51 = vsel %vm9931_vm1, %v2933_v39, 0.0 }
 0x109   :  { %v2028_v13 = vadd.f32 %v6076_v1, %v5876_v9  ;;  %v932_v14 = vpop.f32.mrb[21].mxu0  ;;  %v6417_v47 = vpop.eup %6416  ;;  %v2935_v54 = vmul.f32 %v6415_v40, %v7966_v21  ;;  %v3080_v59 = vsel %vm9931_vm1, %v2934_v45, 0.0 }
 0x10a   :  { %v2023_v17 = vadd.f32 %v2022_v7, %v932_v14  ;;  %v6079_v18 = vpop.f32.mrb[24].mxu1  ;;  %3066 = vadd.xlane.f32.xlu0 %v3065_v15  ;;  %6426 = vtanh.f32 %v2678_v32  ;;  %v2936_v60 = vmul.f32 %v6417_v47, %v7966_v21 }
 0x10b   :  { %6237 = vmatmul.mubr.msk.f32.gmra.mrb[2].mxu1 %vm9931_vm1, %v257_v11  ;;  %v2032_v26 = vpop.f32.mrb[25].mxu1  ;;  %6428 = vtanh.f32 %v2679_v41  ;;  %v2681_v57 = vadd.f32 %v8027_v24, %v2028_v13  ;;  %v3083_v1 = vsel %vm9931_vm1, %v2935_v54, 0.0 }
 0x10c   :  { %v5879_v28 = vpop.f32.mrb[22].mxu0  ;;  %3069 = vadd.xlane.f32.xlu1 %v3068_v27  ;;  %v2680_v48 = vadd.f32 %v8027_v24, %v2023_v17  ;;  %v6419_v55 = vpop.eup %6418  ;;  %v3086_v10 = vsel %vm9931_vm1, %v2936_v60, 0.0 }
 0x10d   :  { %v2038_v33 = vadd.f32 %v6079_v18, %v5879_v28  ;;  %v942_v35 = vpop.f32.mrb[23].mxu0  ;;  %v6421_v61 = vpop.eup %6420  ;;  %v2937_v6 = vmul.f32 %v6419_v55, %v7966_v21 }
 0x10e   :  { %v2033_v38 = vadd.f32 %v2032_v26, %v942_v35  ;;  %v6082_v34 = vpop.f32.mrb[26].mxu1  ;;  %3072 = vadd.xlane.f32.xlu0 %v3071_v36  ;;  %6430 = vtanh.f32 %v2680_v48  ;;  %v2938_v3 = vmul.f32 %v6421_v61, %v7966_v21 }
 0x10f   :  { %v2042_v42 = vpop.f32.mrb[27].mxu1  ;;  %6432 = vtanh.f32 %v2681_v57  ;;  %v2683_v8 = vadd.f32 %v8027_v24, %v2038_v33  ;;  %v3089_v17 = vsel %vm9931_vm1, %v2937_v6, 0.0 }
 0x110   :  { %v5882_v44 = vpop.f32.mrb[24].mxu0  ;;  %3075 = vadd.xlane.f32.xlu1 %v3074_v43  ;;  %v2682_v62 = vadd.f32 %v8027_v24, %v2033_v38  ;;  %v6423_v7 = vpop.eup %6422  ;;  %v3092_v28 = vsel %vm9931_vm1, %v2938_v3, 0.0 }
 0x111   :  { %v2048_v49 = vadd.f32 %v6082_v34, %v5882_v44  ;;  %v952_v50 = vpop.f32.mrb[25].mxu0  ;;  %v6425_v12 = vpop.eup %6424  ;;  %v2939_v22 = vmul.f32 %v6423_v7, %v7966_v21 }
 0x112   :  { %v2043_v52 = vadd.f32 %v2042_v42, %v952_v50  ;;  %v6085_v53 = vpop.f32.mrb[28].mxu1  ;;  %3078 = vadd.xlane.f32.xlu0 %v3077_v51  ;;  %6434 = vtanh.f32 %v2682_v62  ;;  %v2940_v30 = vmul.f32 %v6425_v12, %v7966_v21 }
 0x113   :  { %v2052_v58 = vpop.f32.mrb[29].mxu1  ;;  %6436 = vtanh.f32 %v2683_v8  ;;  %v2685_v26 = vadd.f32 %v8027_v24, %v2048_v49  ;;  %v3095_v38 = vsel %vm9931_vm1, %v2939_v22, 0.0 }
 0x114   :  { %v5885_v16 = vpop.f32.mrb[26].mxu0  ;;  %3081 = vadd.xlane.f32.xlu1 %v3080_v59  ;;  %v2684_v13 = vadd.f32 %v8027_v24, %v2043_v52  ;;  %v6427_v25 = vpop.eup %6426  ;;  %v3098_v44 = vsel %vm9931_vm1, %v2940_v30, 0.0 }
 0x115   :  { %v2058_v63 = vadd.f32 %v6085_v53, %v5885_v16  ;;  %v962_v0 = vpop.f32.mrb[27].mxu0  ;;  %v6429_v32 = vpop.eup %6428  ;;  %v2941_v40 = vmul.f32 %v6427_v25, %v7966_v21 }
 0x116   :  { %v2053_v2 = vadd.f32 %v2052_v58, %v962_v0  ;;  %v6088_v4 = vpop.f32.mrb[30].mxu1  ;;  %3084 = vadd.xlane.f32.xlu0 %v3083_v1  ;;  %6438 = vtanh.f32 %v2684_v13  ;;  %v2942_v47 = vmul.f32 %v6429_v32, %v7966_v21 }
 0x117   :  { %v2062_v9 = vpop.f32.mrb[31].mxu1  ;;  %6440 = vtanh.f32 %v2685_v26  ;;  %v2687_v42 = vadd.f32 %v8027_v24, %v2058_v63  ;;  %v3101_v52 = vsel %vm9931_vm1, %v2941_v40, 0.0 }
 0x118   :  { %v5888_v11 = vpop.f32.mrb[28].mxu0  ;;  %3087 = vadd.xlane.f32.xlu1 %v3086_v10  ;;  %v2686_v33 = vadd.f32 %v8027_v24, %v2053_v2  ;;  %v6431_v41 = vpop.eup %6430  ;;  %v3104_v16 = vsel %vm9931_vm1, %v2942_v47, 0.0 }
 0x119   :  { %v2068_v14 = vadd.f32 %v6088_v4, %v5888_v11  ;;  %v972_v15 = vpop.f32.mrb[29].mxu0  ;;  %v6433_v48 = vpop.eup %6432  ;;  %v2943_v55 = vmul.f32 %v6431_v41, %v7966_v21 }
 0x11a   :  { %v2063_v18 = vadd.f32 %v2062_v9, %v972_v15  ;;  %v6091_v20 = vpop.f32.mrb[32].mxu1  ;;  %3090 = vadd.xlane.f32.xlu0 %v3089_v17  ;;  %6442 = vtanh.f32 %v2686_v33  ;;  %v2944_v61 = vmul.f32 %v6433_v48, %v7966_v21  ;;  %v2618_v9 = vcombine.high %v7874_v23, %v7874_v23 }
 0x11b   :  { %v2072_v27 = vpop.f32.mrb[33].mxu1  ;;  %6444 = vtanh.f32 %v2687_v42  ;;  %v2689_v58 = vadd.f32 %v8027_v24, %v2068_v14  ;;  %v3107_v2 = vsel %vm9931_vm1, %v2943_v55, 0.0 }
 0x11c   :  { %v5891_v29 = vpop.f32.mrb[30].mxu0  ;;  %3093 = vadd.xlane.f32.xlu1 %v3092_v28  ;;  %v2688_v49 = vadd.f32 %v8027_v24, %v2063_v18  ;;  %v6435_v57 = vpop.eup %6434  ;;  %v3110_v3 = vsel %vm9931_vm1, %v2944_v61, 0.0 }
 0x11d   :  { %v2078_v35 = vadd.f32 %v6091_v20, %v5891_v29  ;;  %v982_v36 = vpop.f32.mrb[31].mxu0  ;;  %v6437_v62 = vpop.eup %6436  ;;  %v2945_v7 = vmul.f32 %v6435_v57, %v7966_v21 }
 0x11e   :  { %v2073_v34 = vadd.f32 %v2072_v27, %v982_v36  ;;  %v6094_v39 = vpop.f32.mrb[34].mxu1  ;;  %3096 = vadd.xlane.f32.xlu0 %v3095_v38  ;;  %6446 = vtanh.f32 %v2688_v49  ;;  %v2946_v13 = vmul.f32 %v6437_v62, %v7966_v21  ;;  %v8081_v27 = vrot.slane %v2618_v9, %v7865_v19 }
 0x11f   :  { %v2082_v43 = vpop.f32.mrb[35].mxu1  ;;  %6448 = vtanh.f32 %v2689_v58  ;;  %v2691_v10 = vadd.f32 %v8027_v24, %v2078_v35  ;;  %v3113_v20 = vsel %vm9931_vm1, %v2945_v7, 0.0 }
 0x120   :  { %v5894_v45 = vpop.f32.mrb[32].mxu0  ;;  %3099 = vadd.xlane.f32.xlu1 %v3098_v44  ;;  %v2690_v63 = vadd.f32 %v8027_v24, %v2073_v34  ;;  %v6439_v8 = vpop.eup %6438  ;;  %v3116_v30 = vsel %vm9931_vm1, %v2946_v13, 0.0 }
 0x121   :  { %v2088_v50 = vadd.f32 %v6094_v39, %v5894_v45  ;;  %v992_v51 = vpop.f32.mrb[33].mxu0  ;;  %v6441_v14 = vpop.eup %6440  ;;  %v2947_v25 = vmul.f32 %v6439_v8, %v7966_v21 }
 0x122   :  { %v2083_v53 = vadd.f32 %v2082_v43, %v992_v51  ;;  %v6097_v54 = vpop.f32.mrb[36].mxu1  ;;  %3102 = vadd.xlane.f32.xlu0 %v3101_v52  ;;  %6450 = vtanh.f32 %v2690_v63  ;;  %v2948_v33 = vmul.f32 %v6441_v14, %v7966_v21 }
 0x123   :  { %v2092_v59 = vpop.f32.mrb[37].mxu1  ;;  %6452 = vtanh.f32 %v2691_v10  ;;  %v2693_v28 = vadd.f32 %v8027_v24, %v2088_v50  ;;  %v3119_v39 = vsel %vm9931_vm1, %v2947_v25, 0.0 }
 0x124   :  { %v5897_v60 = vpop.f32.mrb[34].mxu0  ;;  %3105 = vadd.xlane.f32.xlu1 %v3104_v16  ;;  %v2692_v15 = vadd.f32 %v8027_v24, %v2083_v53  ;;  %v6443_v26 = vpop.eup %6442  ;;  %v3122_v45 = vsel %vm9931_vm1, %v2948_v33, 0.0 }
 0x125   :  { %v2098_v0 = vadd.f32 %v6097_v54, %v5897_v60  ;;  %v1002_v1 = vpop.f32.mrb[35].mxu0  ;;  %v6445_v35 = vpop.eup %6444  ;;  %v2949_v24 = vmul.f32 %v6443_v26, %v7966_v21 }
 0x126   :  { %v2093_v4 = vadd.f32 %v2092_v59, %v1002_v1  ;;  %v6100_v6 = vpop.f32.mrb[38].mxu1  ;;  %3108 = vadd.xlane.f32.xlu0 %v3107_v2  ;;  %6454 = vtanh.f32 %v2692_v15  ;;  %v2950_v48 = vmul.f32 %v6445_v35, %v7966_v21 }
 0x127   :  { %v2102_v11 = vpop.f32.mrb[39].mxu1  ;;  %6456 = vtanh.f32 %v2693_v28  ;;  %v2695_v43 = vadd.f32 %v8081_v27, %v2098_v0  ;;  %v3125_v53 = vsel %vm9931_vm1, %v2949_v24, 0.0 }
 0x128   :  { %v5900_v12 = vpop.f32.mrb[36].mxu0  ;;  %3111 = vadd.xlane.f32.xlu1 %v3110_v3  ;;  %v2694_v36 = vadd.f32 %v8081_v27, %v2093_v4  ;;  %v6447_v42 = vpop.eup %6446  ;;  %v3128_v60 = vsel %vm9931_vm1, %v2950_v48, 0.0 }
 0x129   :  { %v2108_v17 = vadd.f32 %v6100_v6, %v5900_v12  ;;  %v1012_v18 = vpop.f32.mrb[37].mxu0  ;;  %v6449_v49 = vpop.eup %6448  ;;  %v2951_v57 = vmul.f32 %v6447_v42, %v7966_v21 }
 0x12a   :  { %v2103_v23 = vadd.f32 %v2102_v11, %v1012_v18  ;;  %v6103_v22 = vpop.f32.mrb[40].mxu1  ;;  %3114 = vadd.xlane.f32.xlu0 %v3113_v20  ;;  %6458 = vtanh.f32 %v2694_v36  ;;  %v2952_v62 = vmul.f32 %v6449_v49, %v7966_v21 }
 0x12b   :  { %v2112_v29 = vpop.f32.mrb[41].mxu1  ;;  %6460 = vtanh.f32 %v2695_v43  ;;  %v2697_v59 = vadd.f32 %v8081_v27, %v2108_v17  ;;  %v3131_v4 = vsel %vm9931_vm1, %v2951_v57, 0.0 }
 0x12c   :  { %v5903_v32 = vpop.f32.mrb[38].mxu0  ;;  %3117 = vadd.xlane.f32.xlu1 %v3116_v30  ;;  %v2696_v50 = vadd.f32 %v8081_v27, %v2103_v23  ;;  %v6451_v58 = vpop.eup %6450  ;;  %v3134_v3 = vsel %vm9931_vm1, %v2952_v62, 0.0 }
 0x12d   :  { %v2118_v38 = vadd.f32 %v6103_v22, %v5903_v32  ;;  %v1022_v34 = vpop.f32.mrb[39].mxu0  ;;  %v6453_v63 = vpop.eup %6452  ;;  %v2953_v8 = vmul.f32 %v6451_v58, %v7966_v21 }
 0x12e   :  { %v2113_v40 = vadd.f32 %v2112_v29, %v1022_v34  ;;  %v6106_v41 = vpop.f32.mrb[42].mxu1  ;;  %3120 = vadd.xlane.f32.xlu0 %v3119_v39  ;;  %6462 = vtanh.f32 %v2696_v50  ;;  %v2954_v13 = vmul.f32 %v6453_v63, %v7966_v21 }
 0x12f   :  { %v2122_v44 = vpop.f32.mrb[43].mxu1  ;;  %6464 = vtanh.f32 %v2697_v59  ;;  %v2699_v10 = vadd.f32 %v8081_v27, %v2118_v38  ;;  %v3137_v20 = vsel %vm9931_vm1, %v2953_v8, 0.0 }
 0x130   :  { %v5906_v47 = vpop.f32.mrb[40].mxu0  ;;  %3123 = vadd.xlane.f32.xlu1 %v3122_v45  ;;  %v2698_v0 = vadd.f32 %v8081_v27, %v2113_v40  ;;  %v6455_v9 = vpop.eup %6454  ;;  %v3140_v30 = vsel %vm9931_vm1, %v2954_v13, 0.0 }
 0x131   :  { %v2128_v51 = vadd.f32 %v6106_v41, %v5906_v47  ;;  %v1032_v52 = vpop.f32.mrb[41].mxu0  ;;  %v6457_v14 = vpop.eup %6456  ;;  %v2955_v25 = vmul.f32 %v6455_v9, %v7966_v21 }
 0x132   :  { %v2123_v54 = vadd.f32 %v2122_v44, %v1032_v52  ;;  %v6109_v55 = vpop.f32.mrb[44].mxu1  ;;  %3126 = vadd.xlane.f32.xlu0 %v3125_v53  ;;  %6466 = vtanh.f32 %v2698_v0  ;;  %v2956_v33 = vmul.f32 %v6457_v14, %v7966_v21 }
 0x133   :  { %v2132_v16 = vpop.f32.mrb[45].mxu1  ;;  %6468 = vtanh.f32 %v2699_v10  ;;  %v2701_v28 = vadd.f32 %v8081_v27, %v2128_v51  ;;  %v3143_v39 = vsel %vm9931_vm1, %v2955_v25, 0.0  ;;  %v2620_v10 = vcombine.high %v8012_v5, %v8012_v5 }
 0x134   :  { %v5909_v61 = vpop.f32.mrb[42].mxu0  ;;  %3129 = vadd.xlane.f32.xlu1 %v3128_v60  ;;  %v2700_v15 = vadd.f32 %v8081_v27, %v2123_v54  ;;  %v6459_v26 = vpop.eup %6458  ;;  %v3146_v45 = vsel %vm9931_vm1, %v2956_v33, 0.0 }
 0x135   :  { %v2138_v1 = vadd.f32 %v6109_v55, %v5909_v61  ;;  %v1042_v2 = vpop.f32.mrb[43].mxu0  ;;  %v6461_v35 = vpop.eup %6460  ;;  %v2957_v24 = vmul.f32 %v6459_v26, %v7966_v21 }
 0x136   :  { %v2133_v6 = vadd.f32 %v2132_v16, %v1042_v2  ;;  %v6112_v7 = vpop.f32.mrb[46].mxu1  ;;  %3132 = vadd.xlane.f32.xlu0 %v3131_v4  ;;  %6470 = vtanh.f32 %v2700_v15  ;;  %v2958_v48 = vmul.f32 %v6461_v35, %v7966_v21 }
 0x137   :  { %v2142_v11 = vpop.f32.mrb[47].mxu1  ;;  %6472 = vtanh.f32 %v2701_v28  ;;  %v2703_v43 = vadd.f32 %v8081_v27, %v2138_v1  ;;  %v3149_v53 = vsel %vm9931_vm1, %v2957_v24, 0.0  ;;  %v8134_v28 = vrot.slane %v2620_v10, %v7865_v19 }
 0x138   :  { %v5912_v12 = vpop.f32.mrb[44].mxu0  ;;  %3135 = vadd.xlane.f32.xlu1 %v3134_v3  ;;  %v2702_v36 = vadd.f32 %v8081_v27, %v2133_v6  ;;  %v6463_v42 = vpop.eup %6462  ;;  %v3152_v60 = vsel %vm9931_vm1, %v2958_v48, 0.0 }
 0x139   :  { %v2148_v17 = vadd.f32 %v6112_v7, %v5912_v12  ;;  %v1052_v18 = vpop.f32.mrb[45].mxu0  ;;  %v6465_v49 = vpop.eup %6464  ;;  %v2959_v57 = vmul.f32 %v6463_v42, %v7966_v21 }
 0x13a   :  { %v2143_v23 = vadd.f32 %v2142_v11, %v1052_v18  ;;  %v6115_v22 = vpop.f32.mrb[48].mxu1  ;;  %3138 = vadd.xlane.f32.xlu0 %v3137_v20  ;;  %6474 = vtanh.f32 %v2702_v36  ;;  %v2960_v62 = vmul.f32 %v6465_v49, %v7966_v21 }
 0x13b   :  { %v2152_v29 = vpop.f32.mrb[49].mxu1  ;;  %6476 = vtanh.f32 %v2703_v43  ;;  %v2705_v59 = vadd.f32 %v8081_v27, %v2148_v17  ;;  %v3155_v4 = vsel %vm9931_vm1, %v2959_v57, 0.0 }
 0x13c   :  { %v5915_v32 = vpop.f32.mrb[46].mxu0  ;;  %3141 = vadd.xlane.f32.xlu1 %v3140_v30  ;;  %v2704_v50 = vadd.f32 %v8081_v27, %v2143_v23  ;;  %v6467_v58 = vpop.eup %6466  ;;  %v3158_v12 = vsel %vm9931_vm1, %v2960_v62, 0.0 }
 0x13d   :  { %v2158_v38 = vadd.f32 %v6115_v22, %v5915_v32  ;;  %v1062_v34 = vpop.f32.mrb[47].mxu0  ;;  %v6469_v63 = vpop.eup %6468  ;;  %v2961_v8 = vmul.f32 %v6467_v58, %v7966_v21 }
 0x13e   :  { %v2153_v40 = vadd.f32 %v2152_v29, %v1062_v34  ;;  %v6118_v41 = vpop.f32.mrb[50].mxu1  ;;  %3144 = vadd.xlane.f32.xlu0 %v3143_v39  ;;  %6478 = vtanh.f32 %v2704_v50  ;;  %v2962_v14 = vmul.f32 %v6469_v63, %v7966_v21 }
 0x13f   :  { %v2162_v44 = vpop.f32.mrb[51].mxu1  ;;  %6480 = vtanh.f32 %v2705_v59  ;;  %v2707_v11 = vadd.f32 %v8081_v27, %v2158_v38  ;;  %v3161_v23 = vsel %vm9931_vm1, %v2961_v8, 0.0 }
 0x140   :  { %v5918_v47 = vpop.f32.mrb[48].mxu0  ;;  %3147 = vadd.xlane.f32.xlu1 %v3146_v45  ;;  %v2706_v0 = vadd.f32 %v8081_v27, %v2153_v40  ;;  %v6471_v9 = vpop.eup %6470  ;;  %v3164_v32 = vsel %vm9931_vm1, %v2962_v14, 0.0 }
 0x141   :  { %v2168_v51 = vadd.f32 %v6118_v41, %v5918_v47  ;;  %v1072_v52 = vpop.f32.mrb[49].mxu0  ;;  %v6473_v15 = vpop.eup %6472  ;;  %v2963_v25 = vmul.f32 %v6471_v9, %v7966_v21 }
 0x142   :  { %v2163_v54 = vadd.f32 %v2162_v44, %v1072_v52  ;;  %v6121_v55 = vpop.f32.mrb[52].mxu1  ;;  %3150 = vadd.xlane.f32.xlu0 %v3149_v53  ;;  %6482 = vtanh.f32 %v2706_v0  ;;  %v2964_v35 = vmul.f32 %v6473_v15, %v7966_v21 }
 0x143   :  { %v2172_v16 = vpop.f32.mrb[53].mxu1  ;;  %6484 = vtanh.f32 %v2707_v11  ;;  %v2709_v29 = vadd.f32 %v8081_v27, %v2168_v51  ;;  %v3167_v40 = vsel %vm9931_vm1, %v2963_v25, 0.0 }
 0x144   :  { %v5921_v61 = vpop.f32.mrb[50].mxu0  ;;  %3153 = vadd.xlane.f32.xlu1 %v3152_v60  ;;  %v2708_v17 = vadd.f32 %v8081_v27, %v2163_v54  ;;  %v6475_v26 = vpop.eup %6474  ;;  %v3170_v45 = vsel %vm9931_vm1, %v2964_v35, 0.0 }
 0x145   :  { %v2178_v1 = vadd.f32 %v6121_v55, %v5921_v61  ;;  %v1082_v2 = vpop.f32.mrb[51].mxu0  ;;  %v6477_v36 = vpop.eup %6476  ;;  %v2965_v27 = vmul.f32 %v6475_v26, %v7966_v21 }
 0x146   :  { %v2173_v6 = vadd.f32 %v2172_v16, %v1082_v2  ;;  %v6124_v7 = vpop.f32.mrb[54].mxu1  ;;  %3156 = vadd.xlane.f32.xlu0 %v3155_v4  ;;  %6486 = vtanh.f32 %v2708_v17  ;;  %v2966_v48 = vmul.f32 %v6477_v36, %v7966_v21 }
 0x147   :  { %v2182_v3 = vpop.f32.mrb[55].mxu1  ;;  %6488 = vtanh.f32 %v2709_v29  ;;  %v2711_v43 = vadd.f32 %v8134_v28, %v2178_v1  ;;  %v3173_v53 = vsel %vm9931_vm1, %v2965_v27, 0.0 }
 0x148   :  { %v5924_v13 = vpop.f32.mrb[52].mxu0  ;;  %3159 = vadd.xlane.f32.xlu1 %v3158_v12  ;;  %v2710_v38 = vadd.f32 %v8134_v28, %v2173_v6  ;;  %v6479_v42 = vpop.eup %6478  ;;  %v3176_v60 = vsel %vm9931_vm1, %v2966_v48, 0.0 }
 0x149   :  { %v2188_v18 = vadd.f32 %v6124_v7, %v5924_v13  ;;  %v1092_v20 = vpop.f32.mrb[53].mxu0  ;;  %v6481_v49 = vpop.eup %6480  ;;  %v2967_v57 = vmul.f32 %v6479_v42, %v7966_v21 }
 0x14a   :  { %v2183_v5 = vadd.f32 %v2182_v3, %v1092_v20  ;;  %v6127_v22 = vpop.f32.mrb[56].mxu1  ;;  %3162 = vadd.xlane.f32.xlu0 %v3161_v23  ;;  %6490 = vtanh.f32 %v2710_v38  ;;  %v2968_v62 = vmul.f32 %v6481_v49, %v7966_v21 }
 0x14b   :  { %v2192_v30 = vpop.f32.mrb[57].mxu1  ;;  %6492 = vtanh.f32 %v2711_v43  ;;  %v2713_v59 = vadd.f32 %v8134_v28, %v2188_v18  ;;  %v3179_v4 = vsel %vm9931_vm1, %v2967_v57, 0.0 }
 0x14c   :  { %v5927_v33 = vpop.f32.mrb[54].mxu0  ;;  %3165 = vadd.xlane.f32.xlu1 %v3164_v32  ;;  %v2712_v50 = vadd.f32 %v8134_v28, %v2183_v5  ;;  %v6483_v58 = vpop.eup %6482  ;;  %v3182_v3 = vsel %vm9931_vm1, %v2968_v62, 0.0 }
 0x14d   :  { %v2198_v34 = vadd.f32 %v6127_v22, %v5927_v33  ;;  %v1102_v39 = vpop.f32.mrb[55].mxu0  ;;  %v6485_v63 = vpop.eup %6484  ;;  %v2969_v8 = vmul.f32 %v6483_v58, %v7966_v21 }
 0x14e   :  { %v2193_v41 = vadd.f32 %v2192_v30, %v1102_v39  ;;  %v6130_v24 = vpop.f32.mrb[58].mxu1  ;;  %3168 = vadd.xlane.f32.xlu0 %v3167_v40  ;;  %6494 = vtanh.f32 %v2712_v50  ;;  %v2970_v13 = vmul.f32 %v6485_v63, %v7966_v21  ;;  %v8177_v63 = vrot.slane %v7885_v31, %v7865_v19 }
 0x14f   :  { %v2202_v44 = vpop.f32.mrb[59].mxu1  ;;  %6496 = vtanh.f32 %v2713_v59  ;;  %v2715_v10 = vadd.f32 %v8134_v28, %v2198_v34  ;;  %v3185_v20 = vsel %vm9931_vm1, %v2969_v8, 0.0 }
 0x150   :  { %v5930_v47 = vpop.f32.mrb[56].mxu0  ;;  %3171 = vadd.xlane.f32.xlu1 %v3170_v45  ;;  %v2714_v0 = vadd.f32 %v8134_v28, %v2193_v41  ;;  %v6487_v9 = vpop.eup %6486  ;;  %v3188_v30 = vsel %vm9931_vm1, %v2970_v13, 0.0 }
 0x151   :  { %v2208_v51 = vadd.f32 %v6130_v24, %v5930_v47  ;;  %v1112_v52 = vpop.f32.mrb[57].mxu0  ;;  %v6489_v14 = vpop.eup %6488  ;;  %v2971_v22 = vmul.f32 %v6487_v9, %v7966_v21 }
 0x152   :  { %v2203_v54 = vadd.f32 %v2202_v44, %v1112_v52  ;;  %v6133_v55 = vpop.f32.mrb[60].mxu1  ;;  %3174 = vadd.xlane.f32.xlu0 %v3173_v53  ;;  %6498 = vtanh.f32 %v2714_v0  ;;  %v2972_v33 = vmul.f32 %v6489_v14, %v7966_v21 }
 0x153   :  { %v2212_v16 = vpop.f32.mrb[61].mxu1  ;;  %6500 = vtanh.f32 %v2715_v10  ;;  %v2717_v26 = vadd.f32 %v8134_v28, %v2208_v51  ;;  %v3191_v39 = vsel %vm9931_vm1, %v2971_v22, 0.0 }
 0x154   :  { %v5933_v61 = vpop.f32.mrb[58].mxu0  ;;  %3177 = vadd.xlane.f32.xlu1 %v3176_v60  ;;  %v2716_v15 = vadd.f32 %v8134_v28, %v2203_v54  ;;  %v6491_v25 = vpop.eup %6490  ;;  %v3194_v44 = vsel %vm9931_vm1, %v2972_v33, 0.0 }
 0x155   :  { %v2218_v1 = vadd.f32 %v6133_v55, %v5933_v61  ;;  %v1122_v2 = vpop.f32.mrb[59].mxu0  ;;  %v6493_v35 = vpop.eup %6492  ;;  %v2973_v24 = vmul.f32 %v6491_v25, %v7966_v21 }
 0x156   :  { %v2213_v6 = vadd.f32 %v2212_v16, %v1122_v2  ;;  %v6136_v7 = vpop.f32.mrb[62].mxu1  ;;  %3180 = vadd.xlane.f32.xlu0 %v3179_v4  ;;  %6502 = vtanh.f32 %v2716_v15  ;;  %v2974_v47 = vmul.f32 %v6493_v35, %v7966_v21 }
 0x157   :  { %v2222_v11 = vpop.f32.mrb[63].mxu1  ;;  %6504 = vtanh.f32 %v2717_v26  ;;  %v2719_v42 = vadd.f32 %v8134_v28, %v2218_v1  ;;  %v3197_v52 = vsel %vm9931_vm1, %v2973_v24, 0.0  ;;  %v8192_v26 = vld [vmem:[%s9918_s8] ss:$0 sm:$0xff] }
 0x158   :  { %v5936_v12 = vpop.f32.mrb[60].mxu0  ;;  %3183 = vadd.xlane.f32.xlu1 %v3182_v3  ;;  %v2718_v36 = vadd.f32 %v8134_v28, %v2213_v6  ;;  %v6495_v27 = vpop.eup %6494  ;;  %v3200_v16 = vsel %vm9931_vm1, %v2974_v47, 0.0 }
 0x159   :  { %v2228_v17 = vadd.f32 %v6136_v7, %v5936_v12  ;;  %v1132_v18 = vpop.f32.mrb[61].mxu0  ;;  %v6497_v48 = vpop.eup %6496  ;;  %v2975_v55 = vmul.f32 %v6495_v27, %v7966_v21 }
 0x15a   :  { %v2223_v23 = vadd.f32 %v2222_v11, %v1132_v18  ;;  %v6139_v5 = vpop.f32.mrb[64].mxu1  ;;  %3186 = vadd.xlane.f32.xlu0 %v3185_v20  ;;  %6506 = vtanh.f32 %v2718_v36  ;;  %v2976_v61 = vmul.f32 %v6497_v48, %v7966_v21 }
 0x15b   :  { %v2232_v29 = vpop.f32.mrb[65].mxu1  ;;  %6508 = vtanh.f32 %v2719_v42  ;;  %v2721_v58 = vadd.f32 %v8134_v28, %v2228_v17  ;;  %v3203_v4 = vsel %vm9931_vm1, %v2975_v55, 0.0 }
 0x15c   :  { %v5939_v32 = vpop.f32.mrb[62].mxu0  ;;  %3189 = vadd.xlane.f32.xlu1 %v3188_v30  ;;  %v2720_v49 = vadd.f32 %v8134_v28, %v2223_v23  ;;  %v6499_v57 = vpop.eup %6498  ;;  %v3206_v12 = vsel %vm9931_vm1, %v2976_v61, 0.0 }
 0x15d   :  { %v2238_v38 = vadd.f32 %v6139_v5, %v5939_v32  ;;  %v1142_v34 = vpop.f32.mrb[63].mxu0  ;;  %v6501_v62 = vpop.eup %6500  ;;  %v2977_v8 = vmul.f32 %v6499_v57, %v7966_v21 }
 0x15e   :  { %v2233_v40 = vadd.f32 %v2232_v29, %v1142_v34  ;;  %v6142_v41 = vpop.f32.mrb[66].mxu1  ;;  %3192 = vadd.xlane.f32.xlu0 %v3191_v39  ;;  %6510 = vtanh.f32 %v2720_v49  ;;  %v2978_v15 = vmul.f32 %v6501_v62, %v7966_v21 }
 0x15f   :  { %v2242_v43 = vpop.f32.mrb[67].mxu1  ;;  %6512 = vtanh.f32 %v2721_v58  ;;  %v2723_v10 = vadd.f32 %v8134_v28, %v2238_v38  ;;  %v3209_v5 = vsel %vm9931_vm1, %v2977_v8, 0.0 }
 0x160   :  { %v5942_v45 = vpop.f32.mrb[64].mxu0  ;;  %3195 = vadd.xlane.f32.xlu1 %v3194_v44  ;;  %v2722_v0 = vadd.f32 %v8134_v28, %v2233_v40  ;;  %v6503_v9 = vpop.eup %6502  ;;  %v3212_v35 = vsel %vm9931_vm1, %v2978_v15, 0.0 }
 0x161   :  { %v2248_v50 = vadd.f32 %v6142_v41, %v5942_v45  ;;  %v1152_v51 = vpop.f32.mrb[65].mxu0  ;;  %v6505_v17 = vpop.eup %6504  ;;  %v2979_v29 = vmul.f32 %v8192_v26, %v6503_v9 }
 0x162   :  { %v2243_v53 = vadd.f32 %v2242_v43, %v1152_v51  ;;  %v6145_v54 = vpop.f32.mrb[68].mxu1  ;;  %3198 = vadd.xlane.f32.xlu0 %v3197_v52  ;;  %6514 = vtanh.f32 %v2722_v0  ;;  %v2980_v34 = vmul.f32 %v8192_v26, %v6505_v17 }
 0x163   :  { %v2252_v59 = vpop.f32.mrb[69].mxu1  ;;  %6516 = vtanh.f32 %v2723_v10  ;;  %v2725_v21 = vadd.f32 %v8134_v28, %v2248_v50  ;;  %v3215_v24 = vsel %vm9931_vm1, %v2979_v29, 0.0 }
 0x164   :  { %v5945_v60 = vpop.f32.mrb[66].mxu0  ;;  %3201 = vadd.xlane.f32.xlu1 %v3200_v16  ;;  %v2724_v18 = vadd.f32 %v8134_v28, %v2243_v53  ;;  %v6507_v30 = vpop.eup %6506  ;;  %v3218_v47 = vsel %vm9931_vm1, %v2980_v34, 0.0 }
 0x165   :  { %v2258_v1 = vadd.f32 %v6145_v54, %v5945_v60  ;;  %v1162_v2 = vpop.f32.mrb[67].mxu0  ;;  %v6509_v39 = vpop.eup %6508  ;;  %v2981_v42 = vmul.f32 %v8192_v26, %v6507_v30 }
 0x166   :  { %v2253_v6 = vadd.f32 %v2252_v59, %v1162_v2  ;;  %v6148_v7 = vpop.f32.mrb[70].mxu1  ;;  %3204 = vadd.xlane.f32.xlu0 %v3203_v4  ;;  %6518 = vtanh.f32 %v2724_v18  ;;  %v2982_v50 = vmul.f32 %v8192_v26, %v6509_v39 }
 0x167   :  { %v2727_v11 = vadd.f32 %v8177_v63, %v2258_v1  ;;  %v2262_v3 = vpop.f32.mrb[71].mxu1  ;;  %6520 = vtanh.f32 %v2725_v21  ;;  %v3221_v54 = vsel %vm9931_vm1, %v2981_v42, 0.0 }
 0x168   :  { %v2726_v13 = vadd.f32 %v8177_v63, %v2253_v6  ;;  %v5948_v14 = vpop.f32.mrb[68].mxu0  ;;  %3207 = vadd.xlane.f32.xlu1 %v3206_v12  ;;  %v6511_v43 = vpop.eup %6510  ;;  %v3224_v61 = vsel %vm9931_vm1, %v2982_v50, 0.0 }
 0x169   :  { %v2268_v20 = vadd.f32 %v6148_v7, %v5948_v14  ;;  %v1172_v23 = vpop.f32.mrb[69].mxu0  ;;  %v6513_v51 = vpop.eup %6512  ;;  %v2983_v58 = vmul.f32 %v8192_v26, %v6511_v43 }
 0x16a   :  { %v2263_v22 = vadd.f32 %v2262_v3, %v1172_v23  ;;  %v6151_v25 = vpop.f32.mrb[72].mxu1  ;;  %3210 = vadd.xlane.f32.xlu0 %v3209_v5  ;;  %6522 = vtanh.f32 %v2726_v13  ;;  %v2984_v1 = vmul.f32 %v8192_v26, %v6513_v51  ;;  %v2619_v51 = vcombine.high %v7885_v31, %v7885_v31 }
 0x16b   :  { %v2729_v32 = vadd.f32 %v8177_v63, %v2268_v20  ;;  %v2272_v33 = vpop.f32.mrb[73].mxu1  ;;  %6524 = vtanh.f32 %v2727_v11  ;;  %v3227_v7 = vsel %vm9931_vm1, %v2983_v58, 0.0 }
 0x16c   :  { %v2728_v36 = vadd.f32 %v8177_v63, %v2263_v22  ;;  %v5951_v38 = vpop.f32.mrb[70].mxu0  ;;  %3213 = vadd.xlane.f32.xlu1 %v3212_v35  ;;  %v6515_v59 = vpop.eup %6514  ;;  %v3230_v13 = vsel %vm9931_vm1, %v2984_v1, 0.0 }
 0x16d   :  { %v2278_v40 = vadd.f32 %v6151_v25, %v5951_v38  ;;  %v1182_v41 = vpop.f32.mrb[71].mxu0  ;;  %v6517_v2 = vpop.eup %6516  ;;  %v2985_v10 = vmul.f32 %v8192_v26, %v6515_v59 }
 0x16e   :  { %v2273_v27 = vadd.f32 %v2272_v33, %v1182_v41  ;;  %v6154_v28 = vpop.f32.mrb[74].mxu1  ;;  %3216 = vadd.xlane.f32.xlu0 %v3215_v24  ;;  %6526 = vtanh.f32 %v2728_v36  ;;  %v2986_v17 = vmul.f32 %v8192_v26, %v6517_v2 }
 0x16f   :  { %v2731_v44 = vadd.f32 %v8177_v63, %v2278_v40  ;;  %v2282_v45 = vpop.f32.mrb[75].mxu1  ;;  %6528 = vtanh.f32 %v2729_v32  ;;  %v3233_v5 = vsel %vm9931_vm1, %v2985_v10, 0.0 }
 0x170   :  { %v2730_v48 = vadd.f32 %v8177_v63, %v2273_v27  ;;  %v5954_v49 = vpop.f32.mrb[72].mxu0  ;;  %3219 = vadd.xlane.f32.xlu1 %v3218_v47  ;;  %v6519_v11 = vpop.eup %6518  ;;  %v3236_v33 = vsel %vm9931_vm1, %v2986_v17, 0.0 }
 0x171   :  { %v2288_v52 = vadd.f32 %v6154_v28, %v5954_v49  ;;  %v1192_v53 = vpop.f32.mrb[73].mxu0  ;;  %v6521_v18 = vpop.eup %6520  ;;  %v2987_v29 = vmul.f32 %v8192_v26, %v6519_v11 }
 0x172   :  { %v2283_v55 = vadd.f32 %v2282_v45, %v1192_v53  ;;  %v6157_v57 = vpop.f32.mrb[76].mxu1  ;;  %3222 = vadd.xlane.f32.xlu0 %v3221_v54  ;;  %6530 = vtanh.f32 %v2730_v48  ;;  %v2988_v38 = vmul.f32 %v8192_v26, %v6521_v18 }
 0x173   :  { %v2733_v16 = vadd.f32 %v8177_v63, %v2288_v52  ;;  %v2292_v60 = vpop.f32.mrb[77].mxu1  ;;  %6532 = vtanh.f32 %v2731_v44  ;;  %v3239_v41 = vsel %vm9931_vm1, %v2987_v29, 0.0 }
 0x174   :  { %v2732_v62 = vadd.f32 %v8177_v63, %v2283_v55  ;;  %v5957_v0 = vpop.f32.mrb[74].mxu0  ;;  %3225 = vadd.xlane.f32.xlu1 %v3224_v61  ;;  %v6523_v30 = vpop.eup %6522  ;;  %v3242_v45 = vsel %vm9931_vm1, %v2988_v38, 0.0  ;;  %v8244_v61 = vrot.slane %v7900_v37, %v7865_v19 }
 0x175   :  { %v2298_v4 = vadd.f32 %v6157_v57, %v5957_v0  ;;  %v1202_v6 = vpop.f32.mrb[75].mxu0  ;;  %v6525_v34 = vpop.eup %6524  ;;  %v2989_v28 = vmul.f32 %v8192_v26, %v6523_v30 }
 0x176   :  { %v2293_v8 = vadd.f32 %v2292_v60, %v1202_v6  ;;  %v6160_v9 = vpop.f32.mrb[78].mxu1  ;;  %3228 = vadd.xlane.f32.xlu0 %v3227_v7  ;;  %6534 = vtanh.f32 %v2732_v62  ;;  %v2990_v49 = vmul.f32 %v8192_v26, %v6525_v34 }
 0x177   :  { %v2735_v3 = vadd.f32 %v8177_v63, %v2298_v4  ;;  %v2302_v12 = vpop.f32.mrb[79].mxu1  ;;  %6536 = vtanh.f32 %v2733_v16  ;;  %v3245_v54 = vsel %vm9931_vm1, %v2989_v28, 0.0  ;;  %v8237_v16 = vand.u32 127, %v2577_v46  ;;  %v8287_v28 = vpop.permute.xlu0 %3444 }
 0x178   :  { %v2734_v14 = vadd.f32 %v8177_v63, %v2293_v8  ;;  %v5960_v15 = vpop.f32.mrb[76].mxu0  ;;  %3231 = vadd.xlane.f32.xlu1 %v3230_v13  ;;  %v6527_v42 = vpop.eup %6526  ;;  %v3248_v62 = vsel %vm9931_vm1, %v2990_v49, 0.0  ;;  %v8250_v46 = vrot.slane %v2619_v51, %v7865_v19  ;;  %9935 = vst [vmem:[#allocation15_spill] sm:$0xff] %v8287_v28 }
 0x179   :  { %v2308_v20 = vadd.f32 %v6160_v9, %v5960_v15  ;;  %v1212_v23 = vpop.f32.mrb[77].mxu0  ;;  %v6529_v50 = vpop.eup %6528  ;;  %v2991_v58 = vmul.f32 %v8192_v26, %v6527_v42  ;;  %9934 = vst [vmem:[#allocation14_spill] sm:$0xff] %v8237_v16  ;;  %v3586_v8 = vadd.s32 4294967280, %v8237_v16  ;;  %v3593_v15 = vadd.s32 4294967272, %v8237_v16 }
 0x17a   :  { %v2303_v22 = vadd.f32 %v2302_v12, %v1212_v23  ;;  %v6163_v25 = vpop.f32.mrb[80].mxu1  ;;  %3234 = vadd.xlane.f32.xlu0 %v3233_v5  ;;  %6538 = vtanh.f32 %v2734_v14  ;;  %v2992_v2 = vmul.f32 %v8192_v26, %v6529_v50  ;;  %v3607_v17 = vadd.s32 4294967256, %v8237_v16 }
 0x17b   :  { %v2737_v21 = vadd.f32 %v8177_v63, %v2308_v20  ;;  %v2312_v32 = vpop.f32.mrb[81].mxu1  ;;  %6540 = vtanh.f32 %v2735_v3  ;;  %v3251_v9 = vsel %vm9931_vm1, %v2991_v58, 0.0  ;;  %v3621_v51 = vadd.s32 4294967240, %v8237_v16 }
 0x17c   :  { %v2736_v35 = vadd.f32 %v8177_v63, %v2303_v22  ;;  %v5963_v36 = vpop.f32.mrb[78].mxu0  ;;  %3237 = vadd.xlane.f32.xlu1 %v3236_v33  ;;  %v6531_v59 = vpop.eup %6530  ;;  %v3254_v18 = vsel %vm9931_vm1, %v2992_v2, 0.0  ;;  %v3600_v22 = vadd.s32 4294967264, %v8237_v16  ;;  %v3635_v58 = vadd.s32 4294967224, %v8237_v16 }
 0x17d   :  { %v2318_v39 = vadd.f32 %v6163_v25, %v5963_v36  ;;  %v1222_v40 = vpop.f32.mrb[79].mxu0  ;;  %v6533_v4 = vpop.eup %6532  ;;  %v2993_v3 = vmul.f32 %v8192_v26, %v6531_v59 }
 0x17e   :  { %v2313_v24 = vadd.f32 %v2312_v32, %v1222_v40  ;;  %v6166_v27 = vpop.f32.mrb[82].mxu1  ;;  %3240 = vadd.xlane.f32.xlu0 %v3239_v41  ;;  %6542 = vtanh.f32 %v2736_v35  ;;  %v2994_v5 = vmul.f32 %v8192_v26, %v6533_v4  ;;  %v8270_v32 = vsub.s32 %v3586_v8, %v7820_v56 }
 0x17f   :  { %v8227_v43 = vadd.f32 %v8177_v63, %v2318_v39  ;;  %v2322_v44 = vpop.f32.mrb[83].mxu1  ;;  %6544 = vtanh.f32 %v2737_v21  ;;  %v8267_v21 = vsub.s32 %v8237_v16, %v7820_v56  ;;  %v3257_v33 = vsel %vm9931_vm1, %v2993_v3, 0.0 }
 0x180   :  { %v2738_v47 = vadd.f32 %v8177_v63, %v2313_v24  ;;  %v5966_v48 = vpop.f32.mrb[80].mxu0  ;;  %3243 = vadd.xlane.f32.xlu1 %v3242_v45  ;;  %v6535_v12 = vpop.eup %6534  ;;  %v8282_v24 = vsub.s32 %v3593_v15, %v7820_v56  ;;  %v3260_v42 = vsel %vm9931_vm1, %v2994_v5, 0.0  ;;  %v8311_v3 = vsub.s32 %v3621_v51, %v7820_v56 }
 0x181   :  { %v2328_v52 = vadd.f32 %v6166_v27, %v5966_v48  ;;  %v1232_v53 = vpop.f32.mrb[81].mxu0  ;;  %v6537_v25 = vpop.eup %6536  ;;  %v2995_v38 = vmul.f32 %v8192_v26, %v6535_v12  ;;  %v8285_v27 = vsub.s32 %v3607_v17, %v7820_v56 }
 0x182   :  { %v2323_v55 = vadd.f32 %v2322_v44, %v1232_v53  ;;  %v6169_v57 = vpop.f32.mrb[84].mxu1  ;;  %3246 = vadd.xlane.f32.xlu0 %v3245_v54  ;;  %6546 = vtanh.f32 %v2738_v47  ;;  %v8293_v47 = vsub.s32 %v3600_v22, %v7820_v56 }
 0x183   :  { %v8240_v60 = vadd.f32 %v8177_v63, %v2328_v52  ;;  %v2332_v31 = vpop.f32.mrb[85].mxu1  ;;  %6548 = vtanh.f32 %v8227_v43  ;;  %v2996_v43 = vmul.f32 %v8192_v26, %v6537_v25  ;;  %v3614_v52 = vadd.s32 4294967248, %v8237_v16 }
 0x184   :  { %v2740_v0 = vadd.f32 %v8177_v63, %v2323_v55  ;;  %v5969_v1 = vpop.f32.mrb[82].mxu0  ;;  %3249 = vadd.xlane.f32.xlu1 %v3248_v62  ;;  %v3579_v63 = vadd.s32 4294967288, %v8237_v16  ;;  %v6539_v39 = vpop.eup %6538  ;;  %v3263_v53 = vsel %vm9931_vm1, %v2995_v38, 0.0 }
 0x185   :  { %v2338_v6 = vadd.f32 %v6169_v57, %v5969_v1  ;;  %v1242_v7 = vpop.f32.mrb[83].mxu0  ;;  %v6541_v48 = vpop.eup %6540  ;;  %v2997_v57 = vmul.f32 %v8192_v26, %v6539_v39  ;;  %v3649_v1 = vadd.s32 4294967208, %v8237_v16  ;;  %v3266_v2 = vsel %vm9931_vm1, %v2996_v43, 0.0 }
 0x186   :  { %v2333_v10 = vadd.f32 %v2332_v31, %v1242_v7  ;;  %v6172_v11 = vpop.f32.mrb[86].mxu1  ;;  %3252 = vadd.xlane.f32.xlu0 %v3251_v9  ;;  %v8275_v34 = vsub.s32 %v3579_v63, %v7820_v56  ;;  %6550 = vtanh.f32 %v2740_v0  ;;  %v3628_v0 = vadd.s32 4294967232, %v8237_v16 }
 0x187   :  { %v8257_v13 = vadd.f32 %v8244_v61, %v2338_v6  ;;  %v2342_v14 = vpop.f32.mrb[87].mxu1  ;;  %6552 = vtanh.f32 %v8240_v60  ;;  %v2998_v8 = vmul.f32 %v8192_v26, %v6541_v48  ;;  %v3642_v60 = vadd.s32 4294967216, %v8237_v16 }
 0x188   :  { %v2742_v20 = vadd.f32 %v8244_v61, %v2333_v10  ;;  %v5972_v23 = vpop.f32.mrb[84].mxu0  ;;  %3255 = vadd.xlane.f32.xlu1 %v3254_v18  ;;  %v6543_v59 = vpop.eup %6542  ;;  %v8314_v63 = vsub.s32 %v3614_v52, %v7820_v56  ;;  %v8326_v25 = vsub.s32 %v3628_v0, %v7820_v56 }
 0x189   :  { %v2348_v29 = vadd.f32 %v6172_v11, %v5972_v23  ;;  %v1252_v30 = vpop.f32.mrb[85].mxu0  ;;  %v6545_v9 = vpop.eup %6544  ;;  %v2999_v18 = vmul.f32 %v8192_v26, %v6543_v59  ;;  %v8319_v23 = vsub.s32 %v3635_v58, %v7820_v56 }
 0x18a   :  { %v2343_v35 = vadd.f32 %v2342_v14, %v1252_v30  ;;  %v6175_v36 = vpop.f32.mrb[88].mxu1  ;;  %3258 = vadd.xlane.f32.xlu0 %v3257_v33  ;;  %6554 = vtanh.f32 %v2742_v20  ;;  %v3269_v14 = vsel %vm9931_vm1, %v2997_v57, 0.0  ;;  %v3272_v30 = vsel %vm9931_vm1, %v2998_v8, 0.0 }
 0x18b   :  { %v8279_v40 = vadd.f32 %v8244_v61, %v2348_v29  ;;  %v2352_v41 = vpop.f32.mrb[89].mxu1  ;;  %6556 = vtanh.f32 %v8257_v13  ;;  %v8329_v29 = vsub.s32 %v3649_v1, %v7820_v56  ;;  %v3000_v38 = vmul.f32 %v8192_v26, %v6545_v9 }
 0x18c   :  { %v2744_v44 = vadd.f32 %v8244_v61, %v2343_v35  ;;  %v5975_v45 = vpop.f32.mrb[86].mxu0  ;;  %3261 = vadd.xlane.f32.xlu1 %v3260_v42  ;;  %v6547_v20 = vpop.eup %6546  ;;  %v8335_v13 = vsub.s32 %v3642_v60, %v7820_v56 }
 0x18d   :  { %v2358_v49 = vadd.f32 %v6175_v36, %v5975_v45  ;;  %v1262_v50 = vpop.f32.mrb[87].mxu0  ;;  %v6549_v39 = vpop.eup %6548 }
 0x18e   :  { %v2353_v54 = vadd.f32 %v2352_v41, %v1262_v50  ;;  %v6178_v55 = vpop.f32.mrb[90].mxu1  ;;  %3264 = vadd.xlane.f32.xlu0 %v3263_v53  ;;  %6558 = vtanh.f32 %v2744_v44  ;;  %v3275_v50 = vsel %vm9931_vm1, %v2999_v18, 0.0  ;;  %v3001_v53 = vmul.f32 %v8192_v26, %v6547_v20 }
 0x18f   :  { %v8302_v31 = vadd.f32 %v8244_v61, %v2358_v49  ;;  %v2362_v62 = vpop.f32.mrb[91].mxu1  ;;  %v3055_v6 = vpop.xlane.xlu0 %3054  ;;  %6560 = vtanh.f32 %v8279_v40 }
 0x190   :  { %v2746_v4 = vadd.f32 %v8244_v61, %v2353_v54  ;;  %v5978_v7 = vpop.f32.mrb[88].mxu0  ;;  %3267 = vadd.xlane.f32.xlu1 %v3266_v2  ;;  %v3578_v41 = vrot.slane %v3055_v6, %v8267_v21  ;;  %v6551_v54 = vpop.eup %6550  ;;  %v3002_v6 = vmul.f32 %v8192_v26, %v6549_v39 }
 0x191   :  { %v2368_v10 = vadd.f32 %v6178_v55, %v5978_v7  ;;  %v1272_v11 = vpop.f32.mrb[89].mxu0  ;;  %v3061_v12 = vpop.xlane.xlu1 %3060 }
 0x192   :  { %v2363_v15 = vadd.f32 %v2362_v62, %v1272_v11  ;;  %v6181_v17 = vpop.f32.mrb[92].mxu1  ;;  %3270 = vadd.xlane.f32.xlu0 %v3269_v14  ;;  %v3590_v48 = vrot.slane %v3061_v12, %v8270_v32  ;;  %v3278_v62 = vsel %vm9931_vm1, %v3000_v38, 0.0  ;;  %v6553_v40 = vpop.eup %6552  ;;  %6562 = vtanh.f32 %v2746_v4 }
 0x193   :  { %v8323_v5 = vadd.f32 %v8244_v61, %v2368_v10  ;;  %v2372_v22 = vpop.f32.mrb[93].mxu1  ;;  %v3058_v35 = vpop.xlane.xlu0 %3057  ;;  %v3281_v11 = vsel %vm9931_vm1, %v3001_v53, 0.0  ;;  %6564 = vtanh.f32 %v8302_v31  ;;  %v3656_v31 = vadd.s32 4294967200, %v8237_v16 }
 0x194   :  { %v2748_v33 = vadd.f32 %v8244_v61, %v2363_v15  ;;  %v5981_v36 = vpop.f32.mrb[90].mxu0  ;;  %3273 = vadd.xlane.f32.xlu1 %v3272_v30  ;;  %v3583_v42 = vrot.slane %v3058_v35, %v8275_v34  ;;  %v3003_v15 = vmul.f32 %v8192_v26, %v6551_v54  ;;  %v6555_v18 = vpop.eup %6554  ;;  %v3284_v35 = vsel %vm9931_vm1, %v3002_v6, 0.0 }
 0x195   :  { %v2378_v45 = vadd.f32 %v6181_v17, %v5981_v36  ;;  %v1282_v43 = vpop.f32.mrb[91].mxu0  ;;  %v3064_v49 = vpop.xlane.xlu1 %3063  ;;  %v3663_v17 = vadd.s32 4294967192, %v8237_v16  ;;  %v3005_v54 = vmul.f32 %v8192_v26, %v6555_v18 }
 0x196   :  { %v2373_v51 = vadd.f32 %v2372_v22, %v1282_v43  ;;  %v6184_v52 = vpop.f32.mrb[94].mxu1  ;;  %v3585_v44 = vsel %vm3584_vm3, %v3583_v42, %v3578_v41  ;;  %v3597_v55 = vrot.slane %v3064_v49, %v8282_v24  ;;  %3276 = vadd.xlane.f32.xlu0 %v3275_v50  ;;  %v3004_v41 = vmul.f32 %v8192_v26, %v6553_v40  ;;  %v6557_v42 = vpop.eup %6556 }
 0x197   :  { %v8346_v57 = vadd.f32 %v8244_v61, %v2378_v45  ;;  %v2382_v58 = vpop.f32.mrb[95].mxu1  ;;  %v3592_v59 = vsel %vm3591_vm4, %v3590_v48, %v3585_v44  ;;  %v3067_v1 = vpop.xlane.xlu0 %3066  ;;  %6566 = vtanh.f32 %v2748_v33  ;;  %v8372_v44 = vsub.s32 %v3663_v17, %v7820_v56 }
 0x198   :  { %v2750_v0 = vadd.f32 %v8244_v61, %v2373_v51  ;;  %v5984_v2 = vpop.f32.mrb[92].mxu0  ;;  %v3599_v7 = vsel %vm3598_vm5, %v3597_v55, %v3592_v59  ;;  %3279 = vadd.xlane.f32.xlu1 %v3278_v62  ;;  %v3604_v8 = vrot.slane %v3067_v1, %v8293_v47  ;;  %v3287_v51 = vsel %vm9931_vm1, %v3003_v15, 0.0  ;;  %v6559_v55 = vpop.eup %6558 }
 0x199   :  { %v2388_v60 = vadd.f32 %v6184_v52, %v5984_v2  ;;  %v1292_v9 = vpop.f32.mrb[93].mxu0  ;;  %v3070_v10 = vpop.xlane.xlu1 %3069  ;;  %6568 = vtanh.f32 %v8323_v5  ;;  %v3290_v1 = vsel %vm9931_vm1, %v3004_v41, 0.0  ;;  %v3007_v18 = vmul.f32 %v8192_v26, %v6559_v55 }
 0x19a   :  { %v2383_v12 = vadd.f32 %v2382_v58, %v1292_v9  ;;  %v6187_v14 = vpop.f32.mrb[96].mxu1  ;;  %v3611_v4 = vrot.slane %v3070_v10, %v8285_v27  ;;  %v3606_v20 = vsel %vm3605_vm6, %v3604_v8, %v3599_v7  ;;  %3282 = vadd.xlane.f32.xlu0 %v3281_v11  ;;  %v3006_v7 = vmul.f32 %v8192_v26, %v6557_v42  ;;  %v6561_v5 = vpop.eup %6560 }
 0x19b   :  { %v8361_v22 = vadd.f32 %v8244_v61, %v2388_v60  ;;  %v2392_v30 = vpop.f32.mrb[97].mxu1  ;;  %v3073_v38 = vpop.xlane.xlu0 %3072  ;;  %v8384_v8 = vsub.s32 %v3656_v31, %v7820_v56  ;;  %6570 = vtanh.f32 %v2750_v0 }
 0x19c   :  { %v2752_v36 = vadd.f32 %v8244_v61, %v2383_v12  ;;  %v5987_v39 = vpop.f32.mrb[94].mxu0  ;;  %3285 = vadd.xlane.f32.xlu1 %v3284_v35  ;;  %v3613_v45 = vsel %vm3612_vm7, %v3611_v4, %v3606_v20  ;;  %v3618_v43 = vrot.slane %v3073_v38, %v8314_v63  ;;  %v3677_v4 = vadd.s32 4294967176, %v8237_v16  ;;  %v6563_v20 = vpop.eup %6562 }
 0x19d   :  { %v2398_v48 = vadd.f32 %v6187_v14, %v5987_v39  ;;  %v1302_v49 = vpop.f32.mrb[95].mxu0  ;;  %v3076_v50 = vpop.xlane.xlu1 %3075  ;;  %v3293_v14 = vsel %vm9931_vm1, %v3005_v54, 0.0  ;;  %6572 = vtanh.f32 %v8346_v57  ;;  %v3296_v39 = vsel %vm9931_vm1, %v3006_v7, 0.0 }
 0x19e   :  { %v2393_v52 = vadd.f32 %v2392_v30, %v1302_v49  ;;  %v6190_v53 = vpop.f32.mrb[98].mxu1  ;;  %v3625_v33 = vrot.slane %v3076_v50, %v8311_v3  ;;  %v3620_v58 = vsel %vm3619_vm8, %v3618_v43, %v3613_v45  ;;  %3288 = vadd.xlane.f32.xlu0 %v3287_v51  ;;  %v3008_v45 = vmul.f32 %v8192_v26, %v6561_v5  ;;  %v6565_v57 = vpop.eup %6564 }
 0x19f   :  { %v8378_v59 = vadd.f32 %v8244_v61, %v2398_v48  ;;  %v2402_v62 = vpop.f32.mrb[99].mxu1  ;;  %v3079_v6 = vpop.xlane.xlu0 %3078  ;;  %v3670_v43 = vadd.s32 4294967184, %v8237_v16  ;;  %6574 = vtanh.f32 %v2752_v36  ;;  %v3009_v55 = vmul.f32 %v8192_v26, %v6563_v20 }
 0x1a0   :  { %v2754_v2 = vadd.f32 %v8244_v61, %v2393_v52  ;;  %v5990_v40 = vpop.f32.mrb[96].mxu0  ;;  %3291 = vadd.xlane.f32.xlu1 %v3290_v1  ;;  %v3627_v60 = vsel %vm3626_vm9, %v3625_v33, %v3620_v58  ;;  %v3632_v9 = vrot.slane %v3079_v6, %v8326_v25  ;;  %6576 = vtanh.f32 %v8361_v22 }
 0x1a1   :  { %v2408_v10 = vadd.f32 %v6190_v53, %v5990_v40  ;;  %v1312_v11 = vpop.f32.mrb[97].mxu0  ;;  %v3082_v12 = vpop.xlane.xlu1 %3081  ;;  %v3299_v53 = vsel %vm9931_vm1, %v3007_v18, 0.0  ;;  %v3302_v6 = vsel %vm9931_vm1, %v3008_v45, 0.0  ;;  %v8421_v20 = vsub.s32 %v3677_v4, %v7820_v56 }
 0x1a2   :  { %v2403_v15 = vadd.f32 %v2402_v62, %v1312_v11  ;;  %v6193_v17 = vpop.f32.mrb[100].mxu1  ;;  %v3639_v0 = vrot.slane %v3082_v12, %v8319_v23  ;;  %v3634_v30 = vsel %vm3633_vm10, %v3632_v9, %v3627_v60  ;;  %3294 = vadd.xlane.f32.xlu0 %v3293_v14  ;;  %v6567_v33 = vpop.eup %6566  ;;  %v3010_v60 = vmul.f32 %v8192_v26, %v6565_v57 }
 0x1a3   :  { %v8395_v35 = vadd.f32 %v8244_v61, %v2408_v10  ;;  %v2412_v38 = vpop.f32.mrb[101].mxu1  ;;  %v3085_v31 = vpop.xlane.xlu0 %3084  ;;  %v8415_v9 = vsub.s32 %v3670_v43, %v7820_v56  ;;  %6578 = vtanh.f32 %v2754_v2 }
 0x1a4   :  { %v2756_v41 = vadd.f32 %v8244_v61, %v2403_v15  ;;  %v5993_v42 = vpop.f32.mrb[98].mxu0  ;;  %3297 = vadd.xlane.f32.xlu1 %v3296_v39  ;;  %v3641_v48 = vsel %vm3640_vm11, %v3639_v0, %v3634_v30  ;;  %v3646_v49 = vrot.slane %v3085_v31, %v8335_v13  ;;  %v6569_v22 = vpop.eup %6568  ;;  %v3011_v30 = vmul.f32 %v8192_v26, %v6567_v33 }
 0x1a5   :  { %v2418_v50 = vadd.f32 %v6193_v17, %v5993_v42  ;;  %v1322_v51 = vpop.f32.mrb[99].mxu0  ;;  %v3088_v52 = vpop.xlane.xlu1 %3087  ;;  %9936 = vst [vmem:[#allocation16_spill] sm:$0xff] %v8415_v9  ;;  %v3305_v17 = vsel %vm9931_vm1, %v3009_v55, 0.0  ;;  %6580 = vtanh.f32 %v8378_v59  ;;  %v3308_v45 = vsel %vm9931_vm1, %v3010_v60, 0.0 }
 0x1a6   :  { %v2413_v54 = vadd.f32 %v2412_v38, %v1322_v51  ;;  %v6196_v61 = vpop.f32.mrb[102].mxu1  ;;  %v3653_v36 = vrot.slane %v3088_v52, %v8329_v29  ;;  %v3648_v58 = vsel %vm3647_vm12, %v3646_v49, %v3641_v48  ;;  %3300 = vadd.xlane.f32.xlu0 %v3299_v53  ;;  %v6571_v38 = vpop.eup %6570  ;;  %v3012_v48 = vmul.f32 %v8192_v26, %v6569_v22 }
 0x1a7   :  { %v8409_v62 = vadd.f32 %v8250_v46, %v2418_v50  ;;  %v2422_v1 = vpop.f32.mrb[103].mxu1  ;;  %v3091_v7 = vpop.xlane.xlu0 %3090  ;;  %6582 = vtanh.f32 %v2756_v41  ;;  %v3013_v33 = vmul.f32 %v8192_v26, %v6571_v38 }
 0x1a8   :  { %v2758_v40 = vadd.f32 %v8250_v46, %v2413_v54  ;;  %v5996_v5 = vpop.f32.mrb[100].mxu0  ;;  %3303 = vadd.xlane.f32.xlu1 %v3302_v6  ;;  %v3655_v10 = vsel %vm3654_vm13, %v3653_v36, %v3648_v58  ;;  %v3660_v11 = vrot.slane %v3091_v7, %v8384_v8  ;;  %v6573_v49 = vpop.eup %6572  ;;  %v3311_v54 = vsel %vm9931_vm1, %v3011_v30, 0.0 }
 0x1a9   :  { %v2428_v12 = vadd.f32 %v6196_v61, %v5996_v5  ;;  %v1332_v14 = vpop.f32.mrb[101].mxu0  ;;  %v3094_v15 = vpop.xlane.xlu1 %3093  ;;  %6584 = vtanh.f32 %v8395_v35  ;;  %v3314_v7 = vsel %vm9931_vm1, %v3012_v48, 0.0 }
 0x1aa   :  { %v2423_v18 = vadd.f32 %v2422_v1, %v1332_v14  ;;  %v6199_v0 = vpop.f32.mrb[104].mxu1  ;;  %v3667_v2 = vrot.slane %v3094_v15, %v8372_v44  ;;  %v3662_v39 = vsel %vm9921_vm14, %v3660_v11, %v3655_v10  ;;  %3306 = vadd.xlane.f32.xlu0 %v3305_v17  ;;  %v6575_v36 = vpop.eup %6574  ;;  %v3014_v10 = vmul.f32 %v8192_v26, %v6573_v49 }
 0x1ab   :  { %v8428_v31 = vadd.f32 %v8250_v46, %v2428_v12  ;;  %v2432_v42 = vpop.f32.mrb[105].mxu1  ;;  %v3097_v43 = vpop.xlane.xlu0 %3096  ;;  %6586 = vtanh.f32 %v2758_v40  ;;  %v3015_v38 = vmul.f32 %v8192_v26, %v6575_v36 }
 0x1ac   :  { %v2760_v4 = vadd.f32 %v8250_v46, %v2423_v18  ;;  %v5999_v57 = vpop.f32.mrb[102].mxu0  ;;  %3309 = vadd.xlane.f32.xlu1 %v3308_v45  ;;  %v3669_v59 = vsel %vm3668_vm15, %v3667_v2, %v3662_v39  ;;  %v3674_v50 = vrot.slane %v3097_v43, %v8415_v9  ;;  %v6577_v11 = vpop.eup %6576  ;;  %v3317_v18 = vsel %vm9931_vm1, %v3013_v33, 0.0 }
 0x1ad   :  { %v2438_v51 = vadd.f32 %v6199_v0, %v5999_v57  ;;  %v1342_v52 = vpop.f32.mrb[103].mxu0  ;;  %v3100_v53 = vpop.xlane.xlu1 %3099  ;;  %6588 = vtanh.f32 %v8409_v62  ;;  %v3320_v45 = vsel %vm9931_vm1, %v3014_v10, 0.0  ;;  %v3016_v49 = vmul.f32 %v8192_v26, %v6577_v11 }
 0x1ae   :  { %v2433_v61 = vadd.f32 %v2432_v42, %v1342_v52  ;;  %v6202_v55 = vpop.f32.mrb[106].mxu1  ;;  %v3681_v41 = vrot.slane %v3100_v53, %v8421_v20  ;;  %v3676_v58 = vsel %vm3675_vm0, %v3674_v50, %v3669_v59  ;;  %3312 = vadd.xlane.f32.xlu0 %v3311_v54  ;;  %v6579_v2 = vpop.eup %6578  ;;  %6590 = vtanh.f32 %v2760_v4 }
 0x1af   :  { %v8441_v1 = vadd.f32 %v8250_v46, %v2438_v51  ;;  %v2442_v6 = vpop.f32.mrb[107].mxu1  ;;  %v3103_v60 = vpop.xlane.xlu0 %3102  ;;  %v3323_v54 = vsel %vm9931_vm1, %v3015_v38, 0.0  ;;  %v3017_v33 = vmul.f32 %v8192_v26, %v6579_v2  ;;  %6592 = vtanh.f32 %v8428_v31 }
 0x1b0   :  { %v2762_v5 = vadd.f32 %v8250_v46, %v2433_v61  ;;  %v6002_v22 = vpop.f32.mrb[104].mxu0  ;;  %v8447_v35 = vsel %vm3682_vm2, %v3681_v41, %v3676_v58  ;;  %3315 = vadd.xlane.f32.xlu1 %v3314_v7  ;;  %v3687_v12 = vrot.slane %v3103_v60, %v8267_v21  ;;  %v6581_v59 = vpop.eup %6580  ;;  %v3326_v7 = vsel %vm9931_vm1, %v3016_v49, 0.0 }
 0x1b1   :  { %v2448_v14 = vadd.f32 %v6202_v55, %v6002_v22  ;;  %v1352_v15 = vpop.f32.mrb[105].mxu0  ;;  %v3106_v17 = vpop.xlane.xlu1 %3105  ;;  %v3018_v11 = vmul.f32 %v8192_v26, %v6581_v59 }
 0x1b2   :  { %v2443_v0 = vadd.f32 %v2442_v6, %v1352_v15  ;;  %v6205_v30 = vpop.f32.mrb[108].mxu1  ;;  %v3691_v40 = vrot.slane %v3106_v17, %v8275_v34  ;;  %3318 = vadd.xlane.f32.xlu0 %v3317_v18  ;;  %v6583_v36 = vpop.eup %6582  ;;  %6594 = vtanh.f32 %v2762_v5 }
 0x1b3   :  { %v8455_v39 = vadd.f32 %v8250_v46, %v2448_v14  ;;  %v2452_v42 = vpop.f32.mrb[109].mxu1  ;;  %v3109_v57 = vpop.xlane.xlu0 %3108  ;;  %v3019_v2 = vmul.f32 %v8192_v26, %v6583_v36  ;;  %6596 = vtanh.f32 %v8441_v1 }
 0x1b4   :  { %v2764_v43 = vadd.f32 %v8250_v46, %v2443_v0  ;;  %v6005_v48 = vpop.f32.mrb[106].mxu0  ;;  %v3692_v50 = vsel %vm3584_vm3, %v3691_v40, %v3687_v12  ;;  %3321 = vadd.xlane.f32.xlu1 %v3320_v45  ;;  %v3696_v62 = vrot.slane %v3109_v57, %v8270_v32  ;;  %v6585_v12 = vpop.eup %6584  ;;  %v3329_v0 = vsel %vm9931_vm1, %v3017_v33, 0.0 }
 0x1b5   :  { %v2458_v51 = vadd.f32 %v6205_v30, %v6005_v48  ;;  %v1362_v52 = vpop.f32.mrb[107].mxu0  ;;  %v3112_v53 = vpop.xlane.xlu1 %3111  ;;  %v3332_v48 = vsel %vm9931_vm1, %v3018_v11, 0.0 }
 0x1b6   :  { %v2453_v61 = vadd.f32 %v2452_v42, %v1362_v52  ;;  %v6208_v55 = vpop.f32.mrb[110].mxu1  ;;  %v3701_v41 = vrot.slane %v3112_v53, %v8282_v24  ;;  %v3697_v4 = vsel %vm3591_vm4, %v3696_v62, %v3692_v50  ;;  %3324 = vadd.xlane.f32.xlu0 %v3323_v54  ;;  %v6587_v40 = vpop.eup %6586  ;;  %v3020_v62 = vmul.f32 %v8192_v26, %v6585_v12 }
 0x1b7   :  { %v8468_v58 = vadd.f32 %v8250_v46, %v2458_v51  ;;  %v2462_v6 = vpop.f32.mrb[111].mxu1  ;;  %v3115_v22 = vpop.xlane.xlu0 %3114  ;;  %6598 = vtanh.f32 %v2764_v43 }
 0x1b8   :  { %v2766_v60 = vadd.f32 %v8250_v46, %v2453_v61  ;;  %v6008_v10 = vpop.f32.mrb[108].mxu0  ;;  %3327 = vadd.xlane.f32.xlu1 %v3326_v7  ;;  %v3702_v31 = vsel %vm3598_vm5, %v3701_v41, %v3697_v4  ;;  %v3706_v14 = vrot.slane %v3115_v22, %v8293_v47  ;;  %v6589_v51 = vpop.eup %6588  ;;  %v3021_v41 = vmul.f32 %v8192_v26, %v6587_v40 }
 0x1b9   :  { %v2468_v15 = vadd.f32 %v6208_v55, %v6008_v10  ;;  %v1372_v17 = vpop.f32.mrb[109].mxu0  ;;  %v3118_v18 = vpop.xlane.xlu1 %3117  ;;  %v3335_v55 = vsel %vm9931_vm1, %v3019_v2, 0.0  ;;  %6600 = vtanh.f32 %v8455_v39  ;;  %v2621_v10 = vcombine.high %v7900_v37, %v7900_v37 }
 0x1ba   :  { %v2463_v30 = vadd.f32 %v2462_v6, %v1372_v17  ;;  %v6211_v38 = vpop.f32.mrb[112].mxu1  ;;  %v3711_v42 = vrot.slane %v3118_v18, %v8285_v27  ;;  %v3707_v5 = vsel %vm3605_vm6, %v3706_v14, %v3702_v31  ;;  %3330 = vadd.xlane.f32.xlu0 %v3329_v0  ;;  %v6591_v4 = vpop.eup %6590  ;;  %v3338_v11 = vsel %vm9931_vm1, %v3020_v62, 0.0 }
 0x1bb   :  { %v8481_v45 = vadd.f32 %v8250_v46, %v2468_v15  ;;  %v2472_v57 = vpop.f32.mrb[113].mxu1  ;;  %v3121_v59 = vpop.xlane.xlu0 %3120  ;;  %v3022_v39 = vmul.f32 %v8192_v26, %v6589_v51  ;;  %6602 = vtanh.f32 %v2766_v60  ;;  %v3341_v37 = vsel %vm9931_vm1, %v3021_v41, 0.0 }
 0x1bc   :  { %v2768_v49 = vadd.f32 %v8250_v46, %v2463_v30  ;;  %v6011_v50 = vpop.f32.mrb[110].mxu0  ;;  %3333 = vadd.xlane.f32.xlu1 %v3332_v48  ;;  %v3712_v1 = vsel %vm3612_vm7, %v3711_v42, %v3707_v5  ;;  %v3716_v52 = vrot.slane %v3121_v59, %v8314_v63  ;;  %v6593_v15 = vpop.eup %6592  ;;  %v8507_v42 = vld [vmem:[%s9918_s8] ss:$0 sm:$0xff]  ;;  %6604 = vtanh.f32 %v8468_v58 }
 0x1bd   :  { %v2478_v53 = vadd.f32 %v6211_v38, %v6011_v50  ;;  %v1382_v54 = vpop.f32.mrb[111].mxu0  ;;  %v3124_v61 = vpop.xlane.xlu1 %3123  ;;  %v3023_v26 = vmul.f32 %v8507_v42, %v6591_v4  ;;  %v8517_v50 = vrot.slane %v2621_v10, %v7865_v19  ;;  %v3344_v62 = vsel %vm9931_vm1, %v3022_v39, 0.0 }
 0x1be   :  { %v2473_v33 = vadd.f32 %v2472_v57, %v1382_v54  ;;  %v6214_v36 = vpop.f32.mrb[114].mxu1  ;;  %v3721_v6 = vrot.slane %v3124_v61, %v8311_v3  ;;  %v3717_v43 = vsel %vm3619_vm8, %v3716_v52, %v3712_v1  ;;  %3336 = vadd.xlane.f32.xlu0 %v3335_v55  ;;  %v6595_v60 = vpop.eup %6594  ;;  %v3024_v58 = vmul.f32 %v8507_v42, %v6593_v15 }
 0x1bf   :  { %v8494_v7 = vadd.f32 %v8250_v46, %v2478_v53  ;;  %v2482_v22 = vpop.f32.mrb[115].mxu1  ;;  %v3127_v31 = vpop.xlane.xlu0 %3126  ;;  %6606 = vtanh.f32 %v2768_v49  ;;  %v3347_v41 = vsel %vm9931_vm1, %v3023_v26, 0.0 }
 0x1c0   :  { %v2770_v12 = vadd.f32 %v8250_v46, %v2473_v33  ;;  %v6014_v14 = vpop.f32.mrb[112].mxu0  ;;  %3339 = vadd.xlane.f32.xlu1 %v3338_v11  ;;  %v3722_v17 = vsel %vm3626_vm9, %v3721_v6, %v3717_v43  ;;  %v3726_v18 = vrot.slane %v3127_v31, %v8326_v25  ;;  %v6597_v53 = vpop.eup %6596  ;;  %6608 = vtanh.f32 %v8481_v45 }
 0x1c1   :  { %v2488_v0 = vadd.f32 %v6214_v36, %v6014_v14  ;;  %v1392_v30 = vpop.f32.mrb[113].mxu0  ;;  %v3130_v38 = vpop.xlane.xlu1 %3129  ;;  %v3350_v31 = vsel %vm9931_vm1, %v3024_v58, 0.0 }
 0x1c2   :  { %v2483_v2 = vadd.f32 %v2482_v22, %v1392_v30  ;;  %v6217_v40 = vpop.f32.mrb[116].mxu1  ;;  %v3731_v5 = vrot.slane %v3130_v38, %v8319_v23  ;;  %v3727_v57 = vsel %vm3633_vm10, %v3726_v18, %v3722_v17  ;;  %3342 = vadd.xlane.f32.xlu0 %v3341_v37  ;;  %v6599_v43 = vpop.eup %6598  ;;  %v3026_v17 = vmul.f32 %v8507_v42, %v6597_v53 }
 0x1c3   :  { %v8514_v48 = vadd.f32 %v8250_v46, %v2488_v0  ;;  %v2492_v59 = vpop.f32.mrb[117].mxu1  ;;  %v3133_v1 = vpop.xlane.xlu0 %3132  ;;  %6610 = vtanh.f32 %v2770_v12 }
 0x1c4   :  { %v2772_v51 = vadd.f32 %v8250_v46, %v2483_v2  ;;  %v6017_v52 = vpop.f32.mrb[114].mxu0  ;;  %3345 = vadd.xlane.f32.xlu1 %v3344_v62  ;;  %v3732_v54 = vsel %vm3640_vm11, %v3731_v5, %v3727_v57  ;;  %v3736_v61 = vrot.slane %v3133_v1, %v8335_v13  ;;  %v3025_v46 = vmul.f32 %v8507_v42, %v6595_v60  ;;  %v6601_v18 = vpop.eup %6600 }
 0x1c5   :  { %v2498_v55 = vadd.f32 %v6217_v40, %v6017_v52  ;;  %v1402_v33 = vpop.f32.mrb[115].mxu0  ;;  %v3136_v36 = vpop.xlane.xlu1 %3135  ;;  %v3027_v60 = vmul.f32 %v8507_v42, %v6599_v43  ;;  %6612 = vtanh.f32 %v8494_v7  ;;  %v3356_v1 = vsel %vm9931_vm1, %v3026_v17, 0.0 }
 0x1c6   :  { %v2493_v4 = vadd.f32 %v2492_v59, %v1402_v33  ;;  %v6220_v6 = vpop.f32.mrb[118].mxu1  ;;  %v3741_v22 = vrot.slane %v3136_v36, %v8329_v29  ;;  %v3737_v49 = vsel %vm3647_vm12, %v3736_v61, %v3732_v54  ;;  %3348 = vadd.xlane.f32.xlu0 %v3347_v41  ;;  %v3353_v2 = vsel %vm9931_vm1, %v3025_v46, 0.0  ;;  %v6603_v5 = vpop.eup %6602 }
 0x1c7   :  { %v8530_v10 = vadd.f32 %v8517_v50, %v2498_v55  ;;  %v2502_v11 = vpop.f32.mrb[119].mxu1  ;;  %v3139_v39 = vpop.xlane.xlu0 %3138  ;;  %v3028_v54 = vmul.f32 %v8507_v42, %v6601_v18  ;;  %6614 = vtanh.f32 %v2772_v51  ;;  %v3029_v43 = vmul.f32 %v8507_v42, %v6603_v5 }
 0x1c8   :  { %v2774_v14 = vadd.f32 %v8517_v50, %v2493_v4  ;;  %v6020_v15 = vpop.f32.mrb[116].mxu0  ;;  %3351 = vadd.xlane.f32.xlu1 %v3350_v31  ;;  %v3742_v45 = vsel %vm3654_vm13, %v3741_v22, %v3737_v49  ;;  %v3746_v0 = vrot.slane %v3139_v39, %v8384_v8  ;;  %v6605_v61 = vpop.eup %6604  ;;  %v3359_v4 = vsel %vm9931_vm1, %v3027_v60, 0.0 }
 0x1c9   :  { %v2508_v30 = vadd.f32 %v6220_v6, %v6020_v15  ;;  %v1412_v38 = vpop.f32.mrb[117].mxu0  ;;  %v3142_v37 = vpop.xlane.xlu1 %3141  ;;  %6616 = vtanh.f32 %v8514_v48  ;;  %v3362_v39 = vsel %vm9931_vm1, %v3028_v54, 0.0 }
 0x1ca   :  { %v2503_v40 = vadd.f32 %v2502_v11, %v1412_v38  ;;  %v6223_v26 = vpop.f32.mrb[120].mxu1  ;;  %v3751_v57 = vrot.slane %v3142_v37, %v8372_v44  ;;  %v3747_v12 = vsel %vm9921_vm14, %v3746_v0, %v3742_v45  ;;  %3354 = vadd.xlane.f32.xlu0 %v3353_v2  ;;  %vm9922_vm14 = vcmask 1041409   ;;  %v6607_v22 = vpop.eup %6606 }
 0x1cb   :  { %v8543_v59 = vadd.f32 %v8517_v50, %v2508_v30  ;;  %v2512_v62 = vpop.f32.mrb[121].mxu1  ;;  %v3145_v58 = vpop.xlane.xlu0 %3144  ;;  %v3030_v45 = vmul.f32 %v8507_v42, %v6605_v61  ;;  %6618 = vtanh.f32 %v2774_v14  ;;  %v3031_v5 = vmul.f32 %v8507_v42, %v6607_v22 }
 0x1cc   :  { %v2776_v52 = vadd.f32 %v8517_v50, %v2503_v40  ;;  %v6023_v53 = vpop.f32.mrb[118].mxu0  ;;  %3357 = vadd.xlane.f32.xlu1 %v3356_v1  ;;  %v3752_v7 = vsel %vm3668_vm15, %v3751_v57, %v3747_v12  ;;  %v3756_v55 = vrot.slane %v3145_v58, %v8415_v9  ;;  %v6609_v0 = vpop.eup %6608  ;;  %v3365_v40 = vsel %vm9931_vm1, %v3029_v43, 0.0 }
 0x1cd   :  { %v2518_v33 = vadd.f32 %v6223_v26, %v6023_v53  ;;  %v1422_v36 = vpop.f32.mrb[119].mxu0  ;;  %v3148_v41 = vpop.xlane.xlu1 %3147  ;;  %6620 = vtanh.f32 %v8530_v10  ;;  %v3032_v53 = vmul.f32 %v8507_v42, %v6609_v0  ;;  %v3371_v10 = vsel %vm9931_vm1, %v3031_v5, 0.0 }
 0x1ce   :  { %v2513_v6 = vadd.f32 %v2512_v62, %v1422_v36  ;;  %v6226_v46 = vpop.f32.mrb[122].mxu1  ;;  %v3761_v51 = vrot.slane %v3148_v41, %v8421_v20  ;;  %v3757_v49 = vsel %vm3675_vm0, %v3756_v55, %v3752_v7  ;;  %3360 = vadd.xlane.f32.xlu0 %v3359_v4  ;;  %v6611_v57 = vpop.eup %6610  ;;  %v3368_v62 = vsel %vm9931_vm1, %v3030_v45, 0.0 }
 0x1cf   :  { %v2779_v11 = vadd.f32 %v8517_v50, %v2518_v33  ;;  %v2522_v31 = vpop.f32.mrb[123].mxu1  ;;  %v8558_v17 = vpop.xlane.xlu0 %3150  ;;  %6622 = vtanh.f32 %v2776_v52  ;;  %v3033_v41 = vmul.f32 %v8507_v42, %v6611_v57  ;;  %v3374_v52 = vsel %vm9931_vm1, %v3032_v53, 0.0 }
 0x1d0   :  { %v2778_v15 = vadd.f32 %v8517_v50, %v2513_v6  ;;  %v6026_v18 = vpop.f32.mrb[120].mxu0  ;;  %v3762_v48 = vsel %vm3682_vm2, %v3761_v51, %v3757_v49  ;;  %3363 = vadd.xlane.f32.xlu1 %v3362_v39  ;;  %v6613_v54 = vpop.eup %6612  ;;  %6624 = vtanh.f32 %v8543_v59 }
 0x1d1   :  { %v2528_v30 = vadd.f32 %v6226_v46, %v6026_v18  ;;  %v1432_v38 = vpop.f32.mrb[121].mxu0  ;;  %v8564_v37 = vsel %vm9922_vm14, %v3762_v48, %v8447_v35  ;;  %v8566_v2 = vpop.xlane.xlu1 %3153  ;;  %v3034_v49 = vmul.f32 %v8507_v42, %v6613_v54  ;;  %v3377_v0 = vsel %vm9931_vm1, %v3033_v41, 0.0 }
 0x1d2   :  { %9937 = vst [vmem:[#allocation17_spill] sm:$0xff] %v8564_v37  ;;  %v2523_v26 = vadd.f32 %v2522_v31, %v1432_v38  ;;  %v6229_v60 = vpop.f32.mrb[124].mxu1  ;;  %3366 = vadd.xlane.f32.xlu0 %v3365_v40  ;;  %v6615_v4 = vpop.eup %6614  ;;  %6626 = vtanh.f32 %v2778_v15  ;;  %vm127_vm14 = vcmask 7168  }
 0x1d3   :  { %v2781_v14 = vadd.f32 %v8517_v50, %v2528_v30  ;;  %v2532_v12 = vpop.f32.mrb[125].mxu1  ;;  %v8574_v1 = vpop.xlane.xlu0 %3156  ;;  %v3035_v30 = vmul.f32 %v8507_v42, %v6615_v4  ;;  %6628 = vtanh.f32 %v2779_v11  ;;  %v3380_v15 = vsel %vm9931_vm1, %v3034_v49, 0.0 }
 0x1d4   :  { %v2780_v35 = vadd.f32 %v8517_v50, %v2523_v26  ;;  %v6029_v58 = vpop.f32.mrb[122].mxu0  ;;  %3369 = vadd.xlane.f32.xlu1 %v3368_v62  ;;  %v6617_v31 = vpop.eup %6616 }
 0x1d5   :  { %v2538_v61 = vadd.f32 %v6229_v60, %v6029_v58  ;;  %v1442_v7 = vpop.f32.mrb[123].mxu0  ;;  %v8577_v55 = vpop.xlane.xlu1 %3159  ;;  %v3036_v62 = vmul.f32 %v8507_v42, %v6617_v31  ;;  %v3383_v54 = vsel %vm9931_vm1, %v3035_v30, 0.0 }
 0x1d6   :  { %v2533_v33 = vadd.f32 %v2532_v12, %v1442_v7  ;;  %v6232_v36 = vpop.f32.mrb[126].mxu1  ;;  %3372 = vadd.xlane.f32.xlu0 %v3371_v10  ;;  %v6619_v38 = vpop.eup %6618  ;;  %6630 = vtanh.f32 %v2780_v35 }
 0x1d7   :  { %v2783_v6 = vadd.f32 %v8517_v50, %v2538_v61  ;;  %v2542_v46 = vpop.f32.mrb[127].mxu1  ;;  %v8585_v22 = vpop.xlane.xlu0 %3162  ;;  %v3037_v61 = vmul.f32 %v8507_v42, %v6619_v38  ;;  %6632 = vtanh.f32 %v2781_v14 }
 0x1d8   :  { %v2782_v43 = vadd.f32 %v8517_v50, %v2533_v33  ;;  %v6032_v51 = vpop.f32.mrb[124].mxu0  ;;  %3375 = vadd.xlane.f32.xlu1 %v3374_v52  ;;  %v6621_v58 = vpop.eup %6620 }
 0x1d9   :  { %v2548_v39 = vadd.f32 %v6232_v36, %v6032_v51  ;;  %v1452_v18 = vpop.f32.mrb[125].mxu0  ;;  %v8588_v45 = vpop.xlane.xlu1 %3165  ;;  %v3386_v36 = vsel %vm9931_vm1, %v3036_v62, 0.0  ;;  %v3038_v35 = vmul.f32 %v8507_v42, %v6621_v58  ;;  %v3389_v51 = vsel %vm9931_vm1, %v3037_v61, 0.0 }
 0x1da   :  { %v6235_v59 = vpop.f32.mrb[0].mxu1  ;;  %v2543_v48 = vadd.f32 %v2542_v46, %v1452_v18  ;;  %3378 = vadd.xlane.f32.xlu0 %v3377_v0  ;;  %v6623_v7 = vpop.eup %6622  ;;  %6634 = vtanh.f32 %v2782_v43 }
 0x1db   :  { %v2785_v40 = vadd.f32 %v8517_v50, %v2548_v39  ;;  %v2787_v26 = vadd.f32 %v6235_v59, %v8517_v50  ;;  %v2552_v60 = vpop.f32.mrb[1].mxu1  ;;  %v8597_v12 = vpop.xlane.xlu0 %3168  ;;  %v3039_v14 = vmul.f32 %v8507_v42, %v6623_v7  ;;  %6636 = vtanh.f32 %v2783_v6 }
 0x1dc   :  { %v2784_v5 = vadd.f32 %v8517_v50, %v2543_v48  ;;  %v2786_v57 = vadd.f32 %v8517_v50, %v2552_v60  ;;  %3381 = vadd.xlane.f32.xlu1 %v3380_v15  ;;  %v6625_v46 = vpop.eup %6624  ;;  %v3392_v31 = vsel %vm9931_vm1, %v3038_v35, 0.0 }
 0x1dd   :  { %v8600_v11 = vpop.xlane.xlu1 %3171  ;;  %v6627_v49 = vpop.eup %6626  ;;  %v3395_v59 = vsel %vm9931_vm1, %v3039_v14, 0.0 }
 0x1de   :  { %v6238_v53 = vpop.f32.mrb[2].mxu1  ;;  %3384 = vadd.xlane.f32.xlu0 %v3383_v54  ;;  %v6629_v18 = vpop.eup %6628  ;;  %6638 = vtanh.f32 %v2786_v57  ;;  %v3041_v0 = vmul.f32 %v8507_v42, %v6627_v49 }
 0x1df   :  { %v2789_v10 = vadd.f32 %v6238_v53, %v8517_v50  ;;  %v2562_v33 = vpop.f32.mrb[3].mxu1  ;;  %v8607_v4 = vpop.xlane.xlu0 %3174  ;;  %6640 = vtanh.f32 %v2787_v26  ;;  %v3042_v38 = vmul.f32 %v8507_v42, %v6629_v18 }
 0x1e0   :  { %v2788_v41 = vadd.f32 %v8517_v50, %v2562_v33  ;;  %3387 = vadd.xlane.f32.xlu1 %v3386_v36  ;;  %v3040_v50 = vmul.f32 %v8507_v42, %v6625_v46  ;;  %v6631_v48 = vpop.eup %6630  ;;  %6642 = vtanh.f32 %v2784_v5  ;;  %v3401_v57 = vsel %vm9931_vm1, %v3041_v0, 0.0 }
 0x1e1   :  { %v8610_v52 = vpop.xlane.xlu1 %3177  ;;  %v6633_v60 = vpop.eup %6632  ;;  %v3043_v62 = vmul.f32 %v8507_v42, %v6631_v48  ;;  %6644 = vtanh.f32 %v2785_v40  ;;  %v3404_v26 = vsel %vm9931_vm1, %v3042_v38, 0.0 }
 0x1e2   :  { %3390 = vadd.xlane.f32.xlu0 %v3389_v51  ;;  %v3398_v6 = vsel %vm9931_vm1, %v3040_v50, 0.0  ;;  %v3044_v54 = vmul.f32 %v8507_v42, %v6633_v60  ;;  %6646 = vtanh.f32 %v2788_v41 }
 0x1e3   :  { %v8615_v39 = vpop.xlane.xlu0 %3180  ;;  %v3407_v7 = vsel %vm9931_vm1, %v3043_v62, 0.0  ;;  %6648 = vtanh.f32 %v2789_v10 }
 0x1e4   :  { %3393 = vadd.xlane.f32.xlu1 %v3392_v31  ;;  %v6635_v58 = vpop.eup %6634  ;;  %v3410_v40 = vsel %vm9931_vm1, %v3044_v54, 0.0 }
 0x1e5   :  { %v8618_v43 = vpop.xlane.xlu1 %3183  ;;  %v6637_v61 = vpop.eup %6636  ;;  %v3045_v33 = vmul.f32 %v8507_v42, %v6635_v58 }
 0x1e6   :  { %3396 = vadd.xlane.f32.xlu0 %v3395_v59  ;;  %v3046_v46 = vmul.f32 %v8507_v42, %v6637_v61 }
 0x1e7   :  { %v8623_v30 = vpop.xlane.xlu0 %3186  ;;  %v3413_v41 = vsel %vm9931_vm1, %v3045_v33, 0.0 }
 0x1e8   :  { %3399 = vadd.xlane.f32.xlu1 %v3398_v6  ;;  %v6639_v36 = vpop.eup %6638  ;;  %v3416_v50 = vsel %vm9931_vm1, %v3046_v46, 0.0 }
 0x1e9   :  { %v8626_v15 = vpop.xlane.xlu1 %3189  ;;  %v6641_v51 = vpop.eup %6640  ;;  %v3049_v49 = vmul.f32 %v8507_v42, %v6639_v36 }
 0x1ea   :  { %3402 = vadd.xlane.f32.xlu0 %v3401_v57  ;;  %v6643_v31 = vpop.eup %6642  ;;  %v3050_v18 = vmul.f32 %v8507_v42, %v6641_v51 }
 0x1eb   :  { %v8631_v53 = vpop.xlane.xlu0 %3192  ;;  %v6645_v59 = vpop.eup %6644  ;;  %v3425_v48 = vsel %vm9931_vm1, %v3049_v49, 0.0  ;;  %v3047_v6 = vmul.f32 %v8507_v42, %v6643_v31 }
 0x1ec   :  { %9938 = vst [vmem:[#allocation18_spill] sm:$0xff] %v8631_v53  ;;  %3405 = vadd.xlane.f32.xlu1 %v3404_v26  ;;  %v6647_v38 = vpop.eup %6646  ;;  %v3428_v60 = vsel %vm9931_vm1, %v3050_v18, 0.0  ;;  %v3048_v62 = vmul.f32 %v8507_v42, %v6645_v59 }
 0x1ed   :  { %v8634_v5 = vpop.xlane.xlu1 %3195  ;;  %v6649_v58 = vpop.eup %6648  ;;  %v3419_v54 = vsel %vm9931_vm1, %v3047_v6, 0.0  ;;  %v3051_v61 = vmul.f32 %v8507_v42, %v6647_v38 }
 0x1ee   :  { %9939 = vst [vmem:[#allocation19_spill] sm:$0xff] %v8634_v5  ;;  %3408 = vadd.xlane.f32.xlu0 %v3407_v7  ;;  %v3422_v7 = vsel %vm9931_vm1, %v3048_v62, 0.0  ;;  %v3052_v36 = vmul.f32 %v8507_v42, %v6649_v58  ;;  %v6841_v62 = vmov -1e+30  }
 0x1ef   :  { %v8639_v35 = vpop.xlane.xlu0 %3198  ;;  %v3431_v46 = vsel %vm9931_vm1, %v3051_v61, 0.0  ;;  %128 = vst.msk [vmem:[#allocation3] sm:$0xff] %vm127_vm14, %v6841_v62 }
 0x1f0   :  { %3411 = vadd.xlane.f32.xlu1 %v3410_v40  ;;  %v3434_v51 = vsel %vm9931_vm1, %v3052_v36, 0.0  ;;  %vm9965_vm1 = vcmask 851712  }
 0x1f1   :  { %v8642_v14 = vpop.xlane.xlu1 %3201 }
 0x1f2   :  { %3414 = vadd.xlane.f32.xlu0 %v3413_v41 }
 0x1f3   :  { %v8647_v10 = vpop.xlane.xlu0 %3204 }
 0x1f4   :  { %3417 = vadd.xlane.f32.xlu1 %v3416_v50 }
 0x1f5   :  { %v8650_v0 = vpop.xlane.xlu1 %3207 }
 0x1f6   :  { %3426 = vadd.xlane.f32.xlu0 %v3425_v48 }
 0x1f7   :  { %v8655_v57 = vpop.xlane.xlu0 %3210 }
 0x1f8   :  { %3429 = vadd.xlane.f32.xlu1 %v3428_v60 }
 0x1f9   :  { %v8658_v26 = vpop.xlane.xlu1 %3213 }
 0x1fa   :  { %3420 = vadd.xlane.f32.xlu0 %v3419_v54 }
 0x1fb   :  { %v8663_v33 = vpop.xlane.xlu0 %3216 }
 0x1fc   :  { %3423 = vadd.xlane.f32.xlu1 %v3422_v7 }
 0x1fd   :  { %v8666_v40 = vpop.xlane.xlu1 %3219 }
 0x1fe   :  { %3432 = vadd.xlane.f32.xlu0 %v3431_v46 }
 0x1ff   :  { %v8670_v41 = vpop.xlane.xlu0 %3222 }
 0x200   :  { %3435 = vadd.xlane.f32.xlu1 %v3434_v51 }
 0x201   :  { %v8672_v49 = vpop.xlane.xlu1 %3225 }
 0x203   :  { %v8674_v31 = vpop.xlane.xlu0 %3228 }
 0x205   :  { %v8676_v50 = vpop.xlane.xlu1 %3231 }
 0x207   :  { %v8678_v18 = vpop.xlane.xlu0 %3234 }
 0x208   :  { %9940 = vst [vmem:[#allocation20_spill] sm:$0xff] %v8678_v18 }
 0x209   :  { %v8680_v42 = vpop.xlane.xlu1 %3237 }
 0x20a   :  { %9941 = vst [vmem:[#allocation21_spill] sm:$0xff] %v8680_v42 }
 0x20b   :  { %v8682_v59 = vpop.xlane.xlu0 %3240 }
 0x20c   :  { %9942 = vst [vmem:[#allocation22_spill] sm:$0xff] %v8682_v59 }
 0x20d   :  { %v8684_v48 = vpop.xlane.xlu1 %3243 }
 0x20e   :  { %9943 = vst [vmem:[#allocation23_spill] sm:$0xff] %v8684_v48 }
 0x20f   :  { %v8686_v6 = vpop.xlane.xlu0 %3246 }
 0x211   :  { %v8688_v38 = vpop.xlane.xlu1 %3249 }
 0x213   :  { %v8690_v60 = vpop.xlane.xlu0 %3252 }
 0x215   :  { %v8693_v58 = vpop.xlane.xlu1 %3255 }
 0x217   :  { %v8695_v54 = vpop.xlane.xlu0 %3258 }
 0x219   :  { %v8697_v61 = vpop.xlane.xlu1 %3261 }
 0x21b   :  { %v8699_v7 = vpop.xlane.xlu0 %3264 }
 0x21d   :  { %v8701_v36 = vpop.xlane.xlu1 %3267 }
 0x21e   :  { %9944 = vst [vmem:[#allocation24_spill] sm:$0xff] %v8701_v36 }
 0x21f   :  { %v8703_v46 = vpop.xlane.xlu0 %3270 }
 0x220   :  { %9945 = vst [vmem:[#allocation25_spill] sm:$0xff] %v8703_v46 }
 0x221   :  { %v8705_v51 = vpop.xlane.xlu1 %3273 }
 0x222   :  { %9946 = vst [vmem:[#allocation26_spill] sm:$0xff] %v8705_v51 }
 0x223   :  { %v8707_v56 = vpop.xlane.xlu0 %3276 }
 0x224   :  { %9947 = vst [vmem:[#allocation27_spill] sm:$0xff] %v8707_v56 }
 0x225   :  { %v8709_v19 = vpop.xlane.xlu1 %3279 }
 0x226   :  { %9948 = vst [vmem:[#allocation28_spill] sm:$0xff] %v8709_v19 }
 0x227   :  { %v8711_v16 = vpop.xlane.xlu0 %3282 }
 0x228   :  { %9949 = vst [vmem:[#allocation29_spill] sm:$0xff] %v8711_v16 }
 0x229   :  { %v8713_v62 = vpop.xlane.xlu1 %3285 }
 0x22a   :  { %9950 = vst [vmem:[#allocation30_spill] sm:$0xff] %v8713_v62 }
 0x22b   :  { %v8715_v28 = vpop.xlane.xlu0 %3288 }
 0x22c   :  { %9951 = vst [vmem:[#allocation31_spill] sm:$0xff] %v8715_v28 }
 0x22d   :  { %v8717_v37 = vpop.xlane.xlu1 %3291 }
 0x22e   :  { %9952 = vst [vmem:[#allocation32_spill] sm:$0xff] %v8717_v37 }
 0x22f   :  { %v8719_v48 = vpop.xlane.xlu0 %3294 }
 0x231   :  { %v8721_v59 = vpop.xlane.xlu1 %3297 }
 0x233   :  { %v8723_v42 = vpop.xlane.xlu0 %3300 }
 0x235   :  { %v8725_v46 = vpop.xlane.xlu1 %3303 }
 0x237   :  { %v8727_v51 = vpop.xlane.xlu0 %3306 }
 0x239   :  { %v8729_v56 = vpop.xlane.xlu1 %3309 }
 0x23a   :  { %9953 = vst [vmem:[#allocation33_spill] sm:$0xff] %v8729_v56 }
 0x23b   :  { %v8731_v19 = vpop.xlane.xlu0 %3312 }
 0x23c   :  { %9954 = vst [vmem:[#allocation34_spill] sm:$0xff] %v8731_v19  ;;  %v3790_v19 = vrot.slane %v8588_v45, %v8285_v27 }
 0x23d   :  { %v8733_v16 = vpop.xlane.xlu1 %3315 }
 0x23e   :  { %9955 = vst [vmem:[#allocation35_spill] sm:$0xff] %v8733_v16  ;;  %v3770_v16 = vrot.slane %v8566_v2, %v8275_v34  ;;  %v3785_v2 = vrot.slane %v8585_v22, %v8293_v47  ;;  %v3795_v22 = vrot.slane %v8597_v12, %v8314_v63  ;;  %v3805_v12 = vrot.slane %v8607_v4, %v8326_v25 }
 0x23f   :  { %v8735_v62 = vpop.xlane.xlu0 %3318 }
 0x240   :  { %9956 = vst [vmem:[#allocation36_spill] sm:$0xff] %v8735_v62 }
 0x241   :  { %v8737_v28 = vpop.xlane.xlu1 %3321 }
 0x242   :  { %9957 = vst [vmem:[#allocation37_spill] sm:$0xff] %v8737_v28  ;;  %v3766_v28 = vrot.slane %v8558_v17, %v8267_v21 }
 0x243   :  { %v8739_v37 = vpop.xlane.xlu0 %3324 }
 0x244   :  { %9958 = vst [vmem:[#allocation38_spill] sm:$0xff] %v8739_v37 }
 0x245   :  { %v8741_v36 = vpop.xlane.xlu1 %3327 }
 0x246   :  { %9959 = vst [vmem:[#allocation39_spill] sm:$0xff] %v8741_v36  ;;  %v3775_v36 = vrot.slane %v8574_v1, %v8270_v32 }
 0x247   :  { %v8743_v18 = vpop.xlane.xlu0 %3330 }
 0x248   :  { %9960 = vst [vmem:[#allocation40_spill] sm:$0xff] %v8743_v18 }
 0x249   :  { %v8745_v53 = vpop.xlane.xlu1 %3333 }
 0x24a   :  { %9961 = vst [vmem:[#allocation41_spill] sm:$0xff] %v8745_v53  ;;  %v3771_v53 = vsel %vm3584_vm3, %v3770_v16, %v3766_v28  ;;  %v3849_v16 = vrot.slane %v8642_v14, %v8275_v34  ;;  %v3845_v28 = vrot.slane %v8639_v35, %v8267_v21  ;;  %v3859_v35 = vrot.slane %v8650_v0, %v8282_v24 }
 0x24b   :  { %v8747_v9 = vpop.xlane.xlu0 %3336  ;;  %v3776_v37 = vsel %vm3591_vm4, %v3775_v36, %v3771_v53  ;;  %v3854_v36 = vrot.slane %v8647_v10, %v8270_v32  ;;  %v3869_v0 = vrot.slane %v8658_v26, %v8285_v27 }
 0x24c   :  { %9962 = vst [vmem:[#allocation42_spill] sm:$0xff] %v8747_v9 }
 0x24d   :  { %v8749_v5 = vpop.xlane.xlu1 %3339 }
 0x24e   :  { %9963 = vst [vmem:[#allocation43_spill] sm:$0xff] %v8749_v5  ;;  %v3780_v5 = vrot.slane %v8577_v55, %v8282_v24 }
 0x24f   :  { %v8751_v56 = vpop.xlane.xlu0 %3342 }
 0x250   :  { %v3781_v1 = vsel %vm3598_vm5, %v3780_v5, %v3776_v37  ;;  %v3800_v37 = vrot.slane %v8600_v11, %v8311_v3  ;;  %v3850_v5 = vsel %vm3584_vm3, %v3849_v16, %v3845_v28 }
 0x251   :  { %v8757_v62 = vpop.xlane.xlu1 %3345  ;;  %v3786_v53 = vsel %vm3605_vm6, %v3785_v2, %v3781_v1  ;;  %v3855_v10 = vsel %vm3591_vm4, %v3854_v36, %v3850_v5  ;;  %v3864_v1 = vrot.slane %v8655_v57, %v8293_v47  ;;  %v3874_v36 = vrot.slane %v8663_v33, %v8314_v63 }
 0x252   :  { %v3791_v45 = vsel %vm3612_vm7, %v3790_v19, %v3786_v53  ;;  %v3810_v19 = vrot.slane %v8610_v52, %v8319_v23  ;;  %v3860_v28 = vsel %vm3598_vm5, %v3859_v35, %v3855_v10 }
 0x253   :  { %v8761_v18 = vpop.xlane.xlu0 %3348  ;;  %v3796_v2 = vsel %vm3619_vm8, %v3795_v22, %v3791_v45  ;;  %v3815_v22 = vrot.slane %v8615_v39, %v8335_v13  ;;  %v3865_v57 = vsel %vm3605_vm6, %v3864_v1, %v3860_v28  ;;  %v3879_v45 = vrot.slane %v8666_v40, %v8311_v3 }
 0x254   :  { %v3801_v16 = vsel %vm3626_vm9, %v3800_v37, %v3796_v2  ;;  %v3820_v37 = vrot.slane %v8618_v43, %v8329_v29  ;;  %v3870_v5 = vsel %vm3612_vm7, %v3869_v0, %v3865_v57  ;;  %v3825_v2 = vrot.slane %v8623_v30, %v8384_v8 }
 0x255   :  { %v8766_v9 = vpop.xlane.xlu1 %3351  ;;  %v3806_v4 = vsel %vm3633_vm10, %v3805_v12, %v3801_v16  ;;  %v3875_v33 = vsel %vm3619_vm8, %v3874_v36, %v3870_v5  ;;  %v3884_v12 = vrot.slane %v8670_v41, %v8326_v25  ;;  %v3928_v43 = vrot.slane %v8688_v38, %v8275_v34 }
 0x256   :  { %v3811_v26 = vsel %vm3640_vm11, %v3810_v19, %v3806_v4  ;;  %v3924_v40 = vrot.slane %v8686_v6, %v8267_v21  ;;  %v3933_v1 = vrot.slane %v8690_v60, %v8270_v32  ;;  %v3889_v30 = vrot.slane %v8672_v49, %v8319_v23 }
 0x257   :  { %v8771_v17 = vpop.xlane.xlu0 %3354  ;;  %v3816_v39 = vsel %vm3647_vm12, %v3815_v22, %v3811_v26  ;;  %v3880_v16 = vsel %vm3626_vm9, %v3879_v45, %v3875_v33  ;;  %v3830_v41 = vrot.slane %v8626_v15, %v8372_v44  ;;  %v3894_v28 = vrot.slane %v8674_v31, %v8335_v13 }
 0x258   :  { %9964 = vst [vmem:[#allocation44_spill] sm:$0xff] %v8771_v17  ;;  %v3821_v19 = vsel %vm3654_vm13, %v3820_v37, %v3816_v39  ;;  %v3885_v6 = vsel %vm3633_vm10, %v3884_v12, %v3880_v16  ;;  %v3929_v60 = vsel %vm3584_vm3, %v3928_v43, %v3924_v40  ;;  %v3938_v4 = vrot.slane %v8693_v58, %v8282_v24  ;;  %v9967_v40 = vld [vmem:[#allocation16_spill] sm:$0xff] }
 0x259   :  { %v8780_v55 = vpop.xlane.xlu1 %3357  ;;  %v3826_v38 = vsel %vm9965_vm1, %v3825_v2, %v3821_v19  ;;  %v4007_v49 = vrot.slane %v8721_v59, %v8275_v34  ;;  %v4003_v22 = vrot.slane %v8719_v48, %v8267_v21  ;;  %v3934_v15 = vsel %vm3591_vm4, %v3933_v1, %v3929_v60  ;;  %v9968_v1 = vld [vmem:[#allocation18_spill] sm:$0xff]  ;;  %v9971_v60 = vld [vmem:[#allocation24_spill] sm:$0xff] }
 0x25a   :  { %v3943_v36 = vrot.slane %v8695_v54, %v8293_v47  ;;  %v4012_v31 = vrot.slane %v8723_v42, %v8270_v32  ;;  %v3890_v37 = vsel %vm3640_vm11, %v3889_v30, %v3885_v6  ;;  %v4086_v58 = vrot.slane %v8757_v62, %v8275_v34 }
 0x25b   :  { %v8787_v17 = vpop.xlane.xlu0 %3360  ;;  %v4082_v59 = vrot.slane %v8751_v56, %v8267_v21  ;;  %v8877_v48 = vsel %vm3668_vm15, %v3830_v41, %v3826_v38  ;;  %v3899_v45 = vrot.slane %v8676_v50, %v8329_v29  ;;  %v3895_v54 = vsel %vm3647_vm12, %v3894_v28, %v3890_v37  ;;  %v9973_v37 = vld [vmem:[#allocation25_spill] sm:$0xff] }
 0x25c   :  { %v4091_v42 = vrot.slane %v8761_v18, %v8270_v32  ;;  %v3948_v5 = vrot.slane %v8697_v61, %v8285_v27  ;;  %v3939_v62 = vsel %vm3598_vm5, %v3938_v4, %v3934_v15  ;;  %v4008_v56 = vsel %vm3584_vm3, %v4007_v49, %v4003_v22  ;;  %v9966_v61 = vld [vmem:[#allocation19_spill] sm:$0xff]  ;;  %v9972_v22 = vld [vmem:[#allocation33_spill] sm:$0xff] }
 0x25d   :  { %v8795_v14 = vpop.xlane.xlu1 %3363  ;;  %v4017_v39 = vrot.slane %v8725_v46, %v8282_v24  ;;  %v3944_v33 = vsel %vm3605_vm6, %v3943_v36, %v3939_v62  ;;  %v3953_v50 = vrot.slane %v8699_v7, %v8314_v63  ;;  %v4013_v12 = vsel %vm3591_vm4, %v4012_v31, %v4008_v56  ;;  %v9969_v7 = vld [vmem:[#allocation20_spill] sm:$0xff] }
 0x25e   :  { %v4022_v18 = vrot.slane %v8727_v51, %v8293_v47  ;;  %v3840_v43 = vrot.slane %v9966_v61, %v8421_v20  ;;  %v3835_v19 = vrot.slane %v9968_v1, %v9967_v40  ;;  %v4087_v30 = vsel %vm3584_vm3, %v4086_v58, %v4082_v59  ;;  %v9985_v1 = vld [vmem:[#allocation40_spill] sm:$0xff] }
 0x25f   :  { %v8803_v11 = vpop.xlane.xlu0 %3366  ;;  %v4096_v46 = vrot.slane %v8766_v9, %v8282_v24  ;;  %v3900_v41 = vsel %vm3654_vm13, %v3899_v45, %v3895_v54  ;;  %v3904_v38 = vrot.slane %v9969_v7, %v8384_v8  ;;  %v4092_v6 = vsel %vm3591_vm4, %v4091_v42, %v4087_v30  ;;  %v9970_v51 = vld [vmem:[#allocation44_spill] sm:$0xff]  ;;  %v9974_v45 = vld [vmem:[#allocation34_spill] sm:$0xff] }
 0x260   :  { %v4101_v28 = vrot.slane %v9970_v51, %v8293_v47  ;;  %v3958_v4 = vrot.slane %v9971_v60, %v8311_v3  ;;  %v3949_v49 = vsel %vm3612_vm7, %v3948_v5, %v3944_v33  ;;  %v4027_v15 = vrot.slane %v9972_v22, %v8285_v27  ;;  %v9975_v33 = vld [vmem:[#allocation21_spill] sm:$0xff]  ;;  %v9976_v7 = vld [vmem:[#allocation26_spill] sm:$0xff]  ;;  %v9978_v51 = vld [vmem:[#allocation27_spill] sm:$0xff] }
 0x261   :  { %v8811_v53 = vpop.xlane.xlu1 %3369  ;;  %v4018_v9 = vsel %vm3598_vm5, %v4017_v39, %v4013_v12  ;;  %v3954_v31 = vsel %vm3619_vm8, %v3953_v50, %v3949_v49  ;;  %v3963_v58 = vrot.slane %v9973_v37, %v8326_v25  ;;  %v4032_v54 = vrot.slane %v9974_v45, %v8314_v63  ;;  %v9980_v45 = vld [vmem:[#allocation37_spill] sm:$0xff] }
 0x262   :  { %v4023_v59 = vsel %vm3605_vm6, %v4022_v18, %v4018_v9  ;;  %v4106_v42 = vrot.slane %v8780_v55, %v8285_v27  ;;  %v4097_v5 = vsel %vm3598_vm5, %v4096_v46, %v4092_v6  ;;  %v3909_v50 = vrot.slane %v9975_v33, %v8372_v44 }
 0x263   :  { %v8819_v52 = vpop.xlane.xlu0 %3372  ;;  %v4102_v12 = vsel %vm3605_vm6, %v4101_v28, %v4097_v5  ;;  %v4111_v18 = vrot.slane %v8787_v17, %v8314_v63  ;;  %v3968_v55 = vrot.slane %v9976_v7, %v8319_v23  ;;  %v3959_v46 = vsel %vm3626_vm9, %v3958_v4, %v3954_v31  ;;  %v9981_v5 = vld [vmem:[#allocation28_spill] sm:$0xff] }
 0x264   :  { %v3964_v6 = vsel %vm3633_vm10, %v3963_v58, %v3959_v46  ;;  %v3973_v28 = vrot.slane %v9978_v51, %v8335_v13  ;;  %v4116_v49 = vrot.slane %v8795_v14, %v8311_v3  ;;  %v4107_v4 = vsel %vm3612_vm7, %v4106_v42, %v4102_v12 }
 0x265   :  { %v8827_v35 = vpop.xlane.xlu1 %3375  ;;  %v4121_v31 = vrot.slane %v8803_v11, %v8326_v25  ;;  %v3969_v14 = vsel %vm3640_vm11, %v3968_v55, %v3964_v6  ;;  %v4131_v7 = vrot.slane %v8819_v52, %v8335_v13 }
 0x267   :  { %v8839_v10 = vpop.xlane.xlu0 %3378 }
 0x269   :  { %v8847_v0 = vpop.xlane.xlu1 %3381 }
 0x26b   :  { %v8862_v57 = vpop.xlane.xlu0 %3384 }
 0x26d   :  { %v8874_v26 = vpop.xlane.xlu1 %3387 }
 0x26f   :  { %v3391_v2 = vpop.xlane.xlu0 %3390 }
 0x270   :  { %v4161_v56 = vrot.slane %v3391_v2, %v8267_v21  ;;  %v4028_v21 = vsel %vm3612_vm7, %v4027_v15, %v4023_v59  ;;  %v3905_v59 = vsel %vm9965_vm1, %v3904_v38, %v3900_v41  ;;  %v4126_v41 = vrot.slane %v8811_v53, %v8319_v23 }
 0x271   :  { %v3394_v16 = vpop.xlane.xlu1 %3393  ;;  %v4033_v17 = vsel %vm3619_vm8, %v4032_v54, %v4028_v21  ;;  %v4047_v54 = vrot.slane %v9980_v45, %v8319_v23  ;;  %v3836_v53 = vsel %vm3675_vm0, %v3835_v19, %v8877_v48  ;;  %v3910_v52 = vsel %vm3668_vm15, %v3909_v50, %v3905_v59  ;;  %v9992_v45 = vld [vmem:[#allocation42_spill] sm:$0xff] }
 0x272   :  { %v4165_v62 = vrot.slane %v3394_v16, %v8275_v34  ;;  %v9977_v34 = vld [vmem:[#allocation35_spill] sm:$0xff]  ;;  %v4136_v48 = vrot.slane %v8827_v35, %v8329_v29 }
 0x273   :  { %v3397_v36 = vpop.xlane.xlu0 %3396  ;;  %v4037_v16 = vrot.slane %v9977_v34, %v8311_v3 }
 0x274   :  { %v4170_v30 = vrot.slane %v3397_v36, %v8270_v32  ;;  %v9979_v32 = vld [vmem:[#allocation36_spill] sm:$0xff]  ;;  %v4166_v22 = vsel %vm3584_vm3, %v4165_v62, %v4161_v56  ;;  %v4112_v36 = vsel %vm3619_vm8, %v4111_v18, %v4107_v4  ;;  %v3978_v62 = vrot.slane %v9981_v5, %v8329_v29 }
 0x275   :  { %v3400_v39 = vpop.xlane.xlu1 %3399  ;;  %v4042_v60 = vrot.slane %v9979_v32, %v8326_v25  ;;  %v4038_v42 = vsel %vm3626_vm9, %v4037_v16, %v4033_v17  ;;  %v3974_v56 = vsel %vm3647_vm12, %v3973_v28, %v3969_v14  ;;  %v4117_v38 = vsel %vm3626_vm9, %v4116_v49, %v4112_v36  ;;  %v9984_v16 = vld [vmem:[#allocation39_spill] sm:$0xff] }
 0x276   :  { %v4175_v15 = vrot.slane %v3400_v39, %v8282_v24  ;;  %v4171_v37 = vsel %vm3591_vm4, %v4170_v30, %v4166_v22  ;;  %v9982_v39 = vld [vmem:[#allocation38_spill] sm:$0xff]  ;;  %v4122_v30 = vsel %vm3633_vm10, %v4121_v31, %v4117_v38  ;;  %v4057_v21 = vrot.slane %v9984_v16, %v8329_v29 }
 0x277   :  { %v3403_v2 = vpop.xlane.xlu0 %3402  ;;  %v4043_v11 = vsel %vm3633_vm10, %v4042_v60, %v4038_v42  ;;  %vm4239_vm3 = vcmask 1042434   ;;  %v4062_v28 = vrot.slane %v9985_v1, %v8384_v8  ;;  %v4127_v19 = vsel %vm3640_vm11, %v4126_v41, %v4122_v30 }
 0x278   :  { %v4180_v58 = vrot.slane %v3403_v2, %v8293_v47  ;;  %v4052_v47 = vrot.slane %v9982_v39, %v8335_v13  ;;  %v4176_v12 = vsel %vm3598_vm5, %v4175_v15, %v4171_v37  ;;  %v4048_v2 = vsel %vm3640_vm11, %v4047_v54, %v4043_v11  ;;  %v9986_v15 = vld [vmem:[#allocation22_spill] sm:$0xff]  ;;  %vm9988_vm5 = vmmov %vm9965_vm1  ;;  %v9993_v11 = vld [vmem:[#allocation23_spill] sm:$0xff] }
 0x279   :  { %v3406_v9 = vpop.xlane.xlu1 %3405  ;;  %vm4241_vm4 = vcmask 1043459   ;;  %v4132_v50 = vsel %vm3647_vm12, %v4131_v7, %v4127_v19  ;;  %v4141_v49 = vrot.slane %v8839_v10, %v8384_v8  ;;  %v3914_v35 = vrot.slane %v9986_v15, %v9967_v40  ;;  %v9990_v10 = vld [vmem:[#allocation41_spill] sm:$0xff] }
 0x27a   :  { %v4185_v33 = vrot.slane %v3406_v9, %v8285_v27  ;;  %v4181_v55 = vsel %vm3605_vm6, %v4180_v58, %v4176_v12  ;;  %v9983_v27 = vld [vmem:[#allocation29_spill] sm:$0xff]  ;;  %v4053_v51 = vsel %vm3647_vm12, %v4052_v47, %v4048_v2  ;;  %v9987_v9 = vld [vmem:[#allocation30_spill] sm:$0xff]  ;;  %vm4243_vm6 = vcmask 1044484   ;;  %v9989_v58 = vld [vmem:[#allocation31_spill] sm:$0xff] }
 0x27b   :  { %v3409_v24 = vpop.xlane.xlu0 %3408  ;;  %v3983_v34 = vrot.slane %v9983_v27, %v8384_v8  ;;  %v3988_v36 = vrot.slane %v9987_v9, %v8372_v44  ;;  %v4058_v31 = vsel %vm3654_vm13, %v4057_v21, %v4053_v51  ;;  %v3993_v59 = vrot.slane %v9989_v58, %v9967_v40  ;;  %v10000_v9 = vld [vmem:[#allocation14_spill] sm:$0xff] }
 0x27c   :  { %v4190_v46 = vrot.slane %v3409_v24, %v8314_v63  ;;  %v3979_v63 = vsel %vm3654_vm13, %v3978_v62, %v3974_v56  ;;  %v4186_v32 = vsel %vm3612_vm7, %v4185_v33, %v4181_v55  ;;  %v4067_v14 = vrot.slane %v9990_v10, %v8372_v44  ;;  %vm9991_vm7 = vmmov %vm9965_vm1  ;;  %v9995_v33 = vld [vmem:[#allocation32_spill] sm:$0xff]  ;;  %v9996_v55 = vld [vmem:[#allocation43_spill] sm:$0xff] }
 0x27d   :  { %v3412_v18 = vpop.xlane.xlu1 %3411  ;;  %v4072_v54 = vrot.slane %v9992_v45, %v9967_v40  ;;  %v4146_v42 = vrot.slane %v8847_v0, %v8372_v44  ;;  %v4137_v24 = vsel %vm3654_vm13, %v4136_v48, %v4132_v50  ;;  %v3919_v39 = vrot.slane %v9993_v11, %v8421_v20 }
 0x27e   :  { %v4195_v17 = vrot.slane %v3412_v18, %v8311_v3  ;;  %v4191_v4 = vsel %vm3619_vm8, %v4190_v46, %v4186_v32  ;;  %v3984_v3 = vsel %vm9988_vm5, %v3983_v34, %v3979_v63  ;;  %vm9994_vm8 = vmmov %vm9965_vm1  ;;  %v4151_v41 = vrot.slane %v8862_v57, %v9967_v40  ;;  %v9997_v63 = vld [vmem:[#allocation17_spill] sm:$0xff] }
 0x27f   :  { %v3415_v6 = vpop.xlane.xlu0 %3414  ;;  %v4142_v47 = vsel %vm9994_vm8, %v4141_v49, %v4137_v24  ;;  %v3841_v0 = vsel %vm3682_vm2, %v3840_v43, %v3836_v53  ;;  %v3998_v12 = vrot.slane %v9995_v33, %v8421_v20  ;;  %v3989_v18 = vsel %vm3668_vm15, %v3988_v36, %v3984_v3  ;;  %v10002_v24 = vld [vmem:[#allocation12_spill] sm:$0xff] }
 0x280   :  { %v4200_v22 = vrot.slane %v3415_v6, %v8326_v25  ;;  %v4063_v25 = vsel %vm9991_vm7, %v4062_v28, %v4058_v31  ;;  %v4196_v62 = vsel %vm3626_vm9, %v4195_v17, %v4191_v4  ;;  %v3994_v7 = vsel %vm3675_vm0, %v3993_v59, %v3989_v18 }
 0x281   :  { %v3418_v60 = vpop.xlane.xlu1 %3417  ;;  %v4077_v57 = vrot.slane %v9996_v55, %v8421_v20  ;;  %v4068_v46 = vsel %vm3668_vm15, %v4067_v14, %v4063_v25  ;;  %v4156_v43 = vrot.slane %v8874_v26, %v8421_v20  ;;  %v4147_v53 = vsel %vm3668_vm15, %v4146_v42, %v4142_v47 }
 0x282   :  { %v4205_v5 = vrot.slane %v3418_v60, %v8319_v23  ;;  %v4201_v38 = vsel %vm3633_vm10, %v4200_v22, %v4196_v62  ;;  %v3915_v23 = vsel %vm3675_vm0, %v3914_v35, %v3910_v52  ;;  %v4073_v61 = vsel %vm3675_vm0, %v4072_v54, %v4068_v46  ;;  %vm9998_vm10 = vmmov %vm9965_vm1  ;;  %v9999_v35 = vld [vmem:[#allocation15_spill] sm:$0xff]  ;;  %v10001_v54 = vld [vmem:[#allocation13_spill] sm:$0xff] }
 0x283   :  { %v3427_v37 = vpop.xlane.xlu0 %3426  ;;  %v3920_v21 = vsel %vm3682_vm2, %v3919_v39, %v3915_v23  ;;  %v4152_v2 = vsel %vm3675_vm0, %v4151_v41, %v4147_v53  ;;  %v3999_v51 = vsel %vm3682_vm2, %v3998_v12, %v3994_v7  ;;  %vm4245_vm9 = vcmask 1045509  }
 0x284   :  { %v4206_v16 = vsel %vm3640_vm11, %v4205_v5, %v4201_v38  ;;  %v4220_v26 = vrot.slane %v3427_v37, %v8384_v8  ;;  %v4078_v28 = vsel %vm3682_vm2, %v4077_v57, %v4073_v61  ;;  %v4157_v50 = vsel %vm3682_vm2, %v4156_v43, %v4152_v2 }
 0x285   :  { %v3430_v56 = vpop.xlane.xlu1 %3429  ;;  %vm4247_vm11 = vcmask 1046534   ;;  %v4341_v5 = vsub.s32 1, %v10002_v24  ;;  %v4475_v39 = vsub.s32 3, %v10002_v24  ;;  %v4542_v23 = vsub.s32 4, %v10002_v24 }
 0x286   :  { %v4225_v48 = vrot.slane %v3430_v56, %v8372_v44  ;;  %v4408_v56 = vsub.s32 2, %v10002_v24  ;;  %v4609_v2 = vsub.s32 5, %v10002_v24 }
 0x287   :  { %v3421_v30 = vpop.xlane.xlu0 %3420 }
 0x288   :  { %v4210_v27 = vrot.slane %v3421_v30, %v8335_v13  ;;  %v4240_v13 = vsel %vm4239_vm3, %v3841_v0, %v9997_v63 }
 0x289   :  { %v3424_v34 = vpop.xlane.xlu1 %3423 }
 0x28a   :  { %v4215_v6 = vrot.slane %v3424_v34, %v8329_v29  ;;  %v4211_v52 = vsel %vm3647_vm12, %v4210_v27, %v4206_v16  ;;  %v4242_v29 = vsel %vm4241_vm4, %v3920_v21, %v4240_v13  ;;  %vm4249_vm12 = vcmask 1047559  }
 0x28b   :  { %v3433_v1 = vpop.xlane.xlu0 %3432  ;;  %v4244_v4 = vsel %vm4243_vm6, %v3999_v51, %v4242_v29  ;;  %v4676_v13 = vsub.s32 6, %v10002_v24  ;;  %v4743_v29 = vsub.s32 7, %v10002_v24 }
 0x28c   :  { %v4216_v19 = vsel %vm3654_vm13, %v4215_v6, %v4211_v52  ;;  %v4230_v17 = vrot.slane %v3433_v1, %v9967_v40  ;;  %v4246_v22 = vsel %vm4245_vm9, %v4078_v28, %v4244_v4  ;;  %vm3446_vm13 = vcmp.ge.s32.totalorder %v10000_v9, %v9999_v35  ;;  %v6660_v28 = vld [vmem:[%s9910_s0 + $0x8] sm:$0xff] }
 0x28d   :  { %v3436_v32 = vpop.xlane.xlu1 %3435  ;;  %v4221_v60 = vsel %vm9998_vm10, %v4220_v26, %v4216_v19  ;;  %v4248_v15 = vsel %vm4247_vm11, %v4157_v50, %v4246_v22  ;;  %v6662_v50 = vld [vmem:[%s9910_s0 + $0x10] sm:$0xff]  ;;  %v6664_v22 = vld [vmem:[%s9910_s0 + $0x18] sm:$0xff] }
 0x28e   :  { %v4235_v8 = vrot.slane %v3436_v32, %v8421_v20  ;;  %v4226_v49 = vsel %vm3668_vm15, %v4225_v48, %v4221_v60  ;;  %v9070_v20 = vld [vmem:[#allocation3] sm:$0xff]  ;;  %v6661_v32 = vld [vmem:[%s9910_s0] sm:$0xff] }
 0x28f   :  { %v4231_v44 = vsel %vm3675_vm0, %v4230_v17, %v4226_v49  ;;  %v6663_v49 = vld [vmem:[%s9910_s0 + $0x80] sm:$0xff] }
 0x290   :  { %v4236_v40 = vsel %vm3682_vm2, %v4235_v8, %v4231_v44 }
 0x291   :  { %v4250_v36 = vsel %vm4249_vm12, %v4236_v40, %v4248_v15 }
 0x292   :  { %v9067_v3 = vsel %vm3446_vm13, -1e+30, %v4250_v36  ;;  %v6665_v36 = vld [vmem:[%s9910_s0 + $0x90] sm:$0xff] }
 0x293   :  { %4258 = vmax.xlane.f32.xlu1 %v9067_v3 }
 0x320   :  { %v4259_v31 = vpop.xlane.xlu1 %4258 }
 0x321   :  { %v9073_v37 = vmax.f32 %v9070_v20, %v4259_v31 }
 0x323   :  { %v4269_v58 = vsub.f32 %v9070_v20, %v9073_v37  ;;  %5258 = vst.msk [vmem:[#allocation3] sm:$0xff] %vm127_vm14, %v9073_v37  ;;  %4263 = vperm.xlu1 %6392, %v9073_v37   ;;  %vm10003_vm14 = vcmask 261120   ;;  %v6716_v20 = vld [vmem:[%s9910_s0 + $0x1b8] sm:$0xff] }
 0x324   :  { %vm10004_vm15 = vmmov %vm10003_vm14 }
 0x325   :  { %vm10005_vm0 = vmmov %vm10003_vm14 }
 0x326   :  { %vm10006_vm2 = vmmov %vm10005_vm0 }
 0x327   :  { %vm10007_vm1 = vmmov %vm10005_vm0 }
 0x328   :  { %vm10008_vm5 = vmmov %vm10005_vm0 }
 0x329   :  { %vm10009_vm7 = vmmov %vm10005_vm0 }
 0x32a   :  { %v5263_v59 = vld [vmem:[#allocation3] sm:$0xff]  ;;  %vm10010_vm8 = vmmov %vm10005_vm0 }
 0x32b   :  { %5266 = vperm.xlu1 %6392, %v5263_v59   ;;  %v6666_v59 = vld [vmem:[%s9910_s0 + $0x88] sm:$0xff]  ;;  %vm10011_vm10 = vmmov %vm10005_vm0 }
 0x32c   :  { %vm10012_vm13 = vmmov %vm10005_vm0 }
 0x3a2   :  { %v4264_v10 = vpop.permute.xlu1 %4263 }
 0x3a3   :  { %v4266_v14 = vsub.f32 %v9067_v3, %v4264_v10 }
 0x3a5   :  { %v4267_v25 = vmul.f32 1.442695, %v4266_v14 }
 0x3a7   :  { %6650 = vpow2.f32 %v4267_v25 }
 0x3aa   :  { %v9091_v41 = vpop.permute.xlu1 %5266 }
 0x3b1   :  { %v9081_v45 = vpop.eup %6650 }
 0x3b2   :  { %v4275_v42 = vrot.slane %v9081_v45, %v10001_v54  ;;  %v4342_v62 = vrot.slane %v9081_v45, %v4341_v5  ;;  %v4409_v11 = vrot.slane %v9081_v45, %v4408_v56  ;;  %v4476_v47 = vrot.slane %v9081_v45, %v4475_v39  ;;  %v6667_v54 = vld [vmem:[%s9910_s0 + $0x20] sm:$0xff]  ;;  %v6668_v56 = vld [vmem:[%s9910_s0 + $0x28] sm:$0xff] }
 0x3b3   :  { %v9099_v18 = vrot.slane %v9081_v45, %v4542_v23  ;;  %v9127_v63 = vrot.slane %v9081_v45, %v4609_v2  ;;  %v9137_v1 = vrot.slane %v9081_v45, %v4676_v13  ;;  %v9167_v9 = vrot.slane %v9081_v45, %v4743_v29 }
 0x3b4   :  { %4301 = vbcast.lane.b32.xlu0 %v4275_v42, 304  ;;  %4277 = vbcast.lane.b32.xlu1 %v4275_v42, 256 }
 0x3b8   :  { %4309 = vbcast.lane.b32.xlu0 %v4275_v42, 320  ;;  %4281 = vbcast.lane.b32.xlu1 %v4275_v42, 264 }
 0x3bc   :  { %4317 = vbcast.lane.b32.xlu0 %v4275_v42, 336  ;;  %4285 = vbcast.lane.b32.xlu1 %v4275_v42, 272 }
 0x3c0   :  { %4325 = vbcast.lane.b32.xlu0 %v4275_v42, 352  ;;  %4289 = vbcast.lane.b32.xlu1 %v4275_v42, 280 }
 0x3c4   :  { %4333 = vbcast.lane.b32.xlu0 %v4275_v42, 368  ;;  %4293 = vbcast.lane.b32.xlu1 %v4275_v42, 288 }
 0x3c8   :  { %4344 = vbcast.lane.b32.xlu0 %v4342_v62, 256  ;;  %4297 = vbcast.lane.b32.xlu1 %v4275_v42, 296 }
 0x3cc   :  { %4352 = vbcast.lane.b32.xlu0 %v4342_v62, 272  ;;  %4305 = vbcast.lane.b32.xlu1 %v4275_v42, 312 }
 0x3d0   :  { %4360 = vbcast.lane.b32.xlu0 %v4342_v62, 288  ;;  %4313 = vbcast.lane.b32.xlu1 %v4275_v42, 328 }
 0x3d4   :  { %4368 = vbcast.lane.b32.xlu0 %v4342_v62, 304  ;;  %4321 = vbcast.lane.b32.xlu1 %v4275_v42, 344 }
 0x3d8   :  { %4376 = vbcast.lane.b32.xlu0 %v4342_v62, 320  ;;  %4329 = vbcast.lane.b32.xlu1 %v4275_v42, 360 }
 0x3dc   :  { %4384 = vbcast.lane.b32.xlu0 %v4342_v62, 336  ;;  %4337 = vbcast.lane.b32.xlu1 %v4275_v42, 376 }
 0x3e0   :  { %4392 = vbcast.lane.b32.xlu0 %v4342_v62, 352  ;;  %4348 = vbcast.lane.b32.xlu1 %v4342_v62, 264 }
 0x3e4   :  { %4400 = vbcast.lane.b32.xlu0 %v4342_v62, 368  ;;  %4356 = vbcast.lane.b32.xlu1 %v4342_v62, 280 }
 0x3e8   :  { %4411 = vbcast.lane.b32.xlu0 %v4409_v11, 256  ;;  %4364 = vbcast.lane.b32.xlu1 %v4342_v62, 296 }
 0x3ec   :  { %4419 = vbcast.lane.b32.xlu0 %v4409_v11, 272  ;;  %4372 = vbcast.lane.b32.xlu1 %v4342_v62, 312 }
 0x3f0   :  { %4427 = vbcast.lane.b32.xlu0 %v4409_v11, 288  ;;  %4380 = vbcast.lane.b32.xlu1 %v4342_v62, 328 }
 0x3f4   :  { %4435 = vbcast.lane.b32.xlu0 %v4409_v11, 304  ;;  %4388 = vbcast.lane.b32.xlu1 %v4342_v62, 344 }
 0x3f8   :  { %4443 = vbcast.lane.b32.xlu0 %v4409_v11, 320  ;;  %4396 = vbcast.lane.b32.xlu1 %v4342_v62, 360 }
 0x3fc   :  { %4451 = vbcast.lane.b32.xlu0 %v4409_v11, 336  ;;  %4404 = vbcast.lane.b32.xlu1 %v4342_v62, 376 }
 0x400   :  { %4459 = vbcast.lane.b32.xlu0 %v4409_v11, 352  ;;  %4415 = vbcast.lane.b32.xlu1 %v4409_v11, 264 }
 0x404   :  { %4467 = vbcast.lane.b32.xlu0 %v4409_v11, 368  ;;  %4423 = vbcast.lane.b32.xlu1 %v4409_v11, 280 }
 0x408   :  { %4478 = vbcast.lane.b32.xlu0 %v4476_v47, 256  ;;  %4431 = vbcast.lane.b32.xlu1 %v4409_v11, 296 }
 0x40c   :  { %4486 = vbcast.lane.b32.xlu0 %v4476_v47, 272  ;;  %4439 = vbcast.lane.b32.xlu1 %v4409_v11, 312 }
 0x410   :  { %4494 = vbcast.lane.b32.xlu0 %v4476_v47, 288  ;;  %4447 = vbcast.lane.b32.xlu1 %v4409_v11, 328 }
 0x414   :  { %4502 = vbcast.lane.b32.xlu0 %v4476_v47, 304  ;;  %4455 = vbcast.lane.b32.xlu1 %v4409_v11, 344 }
 0x418   :  { %4510 = vbcast.lane.b32.xlu0 %v4476_v47, 320  ;;  %4463 = vbcast.lane.b32.xlu1 %v4409_v11, 360 }
 0x41c   :  { %4514 = vbcast.lane.b32.xlu0 %v4476_v47, 328  ;;  %4471 = vbcast.lane.b32.xlu1 %v4409_v11, 376 }
 0x420   :  { %4522 = vbcast.lane.b32.xlu0 %v4476_v47, 344  ;;  %4482 = vbcast.lane.b32.xlu1 %v4476_v47, 264 }
 0x424   :  { %4530 = vbcast.lane.b32.xlu0 %v4476_v47, 360  ;;  %4490 = vbcast.lane.b32.xlu1 %v4476_v47, 280 }
 0x426   :  { %v9093_v38 = vpop.permute.xlu0 %4301  ;;  %v4278_v0 = vpop.permute.xlu1 %4277 }
 0x427   :  { %v4808_v60 = vmul.f32 %v6661_v32, %v4278_v0 }
 0x428   :  { %4538 = vbcast.lane.b32.xlu0 %v4476_v47, 376  ;;  %4498 = vbcast.lane.b32.xlu1 %v4476_v47, 296 }
 0x429   :  { %v4936_v14 = vsel %vm10004_vm15, %v4808_v60, 0.0  ;;  %vm10014_vm15 = vmmov %vm10005_vm0 }
 0x42a   :  { %v9096_v33 = vpop.permute.xlu0 %4309  ;;  %v4282_v12 = vpop.permute.xlu1 %4281 }
 0x42b   :  { %v4809_v48 = vmul.f32 %v6660_v28, %v4282_v12 }
 0x42c   :  { %4549 = vbcast.lane.b32.xlu0 %v9099_v18, 264  ;;  %4506 = vbcast.lane.b32.xlu1 %v4476_v47, 312 }
 0x42d   :  { %v4937_v44 = vsel %vm10003_vm14, %v4809_v48, 0.0  ;;  %vm10013_vm14 = vmmov %vm10005_vm0 }
 0x42e   :  { %v9102_v30 = vpop.permute.xlu0 %4317  ;;  %v4286_v7 = vpop.permute.xlu1 %4285  ;;  %v4938_v42 = vadd.f32 %v4937_v44, %v4936_v14  ;;  %v6673_v44 = vld [vmem:[%s9910_s0 + $0x30] sm:$0xff] }
 0x42f   :  { %v4810_v8 = vmul.f32 %v6662_v50, %v4286_v7  ;;  %v6669_v7 = vld [vmem:[%s9910_s0 + $0xa0] sm:$0xff]  ;;  %v6671_v50 = vld [vmem:[%s9910_s0 + $0xb0] sm:$0xff] }
 0x430   :  { %4557 = vbcast.lane.b32.xlu0 %v9099_v18, 280  ;;  %4518 = vbcast.lane.b32.xlu1 %v4476_v47, 336 }
 0x431   :  { %v4939_v25 = vsel %vm10005_vm0, %v4810_v8, 0.0 }
 0x432   :  { %v9105_v55 = vpop.permute.xlu0 %4325  ;;  %v4290_v57 = vpop.permute.xlu1 %4289  ;;  %v4940_v23 = vadd.f32 %v4939_v25, %v4938_v42  ;;  %v6675_v25 = vld [vmem:[%s9910_s0 + $0xb8] sm:$0xff] }
 0x433   :  { %v4811_v40 = vmul.f32 %v6664_v22, %v4290_v57  ;;  %v4814_v22 = vmul.f32 %v6673_v44, %v9093_v38  ;;  %v6682_v44 = vld [vmem:[%s9910_s0 + $0xd8] sm:$0xff] }
 0x434   :  { %4565 = vbcast.lane.b32.xlu0 %v9099_v18, 296  ;;  %4526 = vbcast.lane.b32.xlu1 %v4476_v47, 352 }
 0x435   :  { %v4941_v62 = vsel %vm10008_vm5, %v4811_v40, 0.0  ;;  %vm10017_vm5 = vmmov %vm10005_vm0 }
 0x436   :  { %v9108_v46 = vpop.permute.xlu0 %4333  ;;  %v4294_v27 = vpop.permute.xlu1 %4293  ;;  %v4942_v2 = vadd.f32 %v4941_v62, %v4940_v23  ;;  %v6676_v62 = vld [vmem:[%s9910_s0 + $0xc0] sm:$0xff] }
 0x437   :  { %v4812_v45 = vmul.f32 %v6667_v54, %v4294_v27  ;;  %v6670_v27 = vld [vmem:[%s9910_s0 + $0x98] sm:$0xff]  ;;  %v6677_v23 = vld [vmem:[%s9910_s0 + $0x40] sm:$0xff] }
 0x438   :  { %4573 = vbcast.lane.b32.xlu0 %v9099_v18, 312  ;;  %4534 = vbcast.lane.b32.xlu1 %v4476_v47, 368 }
 0x43a   :  { %v4345_v61 = vpop.permute.xlu0 %4344  ;;  %v4298_v43 = vpop.permute.xlu1 %4297 }
 0x43b   :  { %v4824_v4 = vmul.f32 %v6663_v49, %v4345_v61  ;;  %v4813_v11 = vmul.f32 %v6668_v56, %v4298_v43  ;;  %v6672_v49 = vld [vmem:[%s9910_s0 + $0xa8] sm:$0xff] }
 0x43c   :  { %4581 = vbcast.lane.b32.xlu0 %v9099_v18, 328  ;;  %4545 = vbcast.lane.b32.xlu1 %v9099_v18, 256 }
 0x43d   :  { %v4973_v24 = vsel %vm10006_vm2, %v4824_v4, 0.0  ;;  %v4945_v28 = vsel %vm10012_vm13, %v4813_v11, 0.0  ;;  %vm10015_vm2 = vmmov %vm10005_vm0 }
 0x43e   :  { %v4353_v53 = vpop.permute.xlu0 %4352  ;;  %v9113_v34 = vpop.permute.xlu1 %4305  ;;  %vm10021_vm13 = vmmov %vm10005_vm0 }
 0x43f   :  { %v4826_v31 = vmul.f32 %v6665_v36, %v4353_v53  ;;  %v4943_v53 = vsel %vm10010_vm8, %v4812_v45, 0.0  ;;  %v4947_v45 = vsel %vm10015_vm2, %v4814_v22, 0.0  ;;  %vm10019_vm8 = vmmov %vm10005_vm0 }
 0x440   :  { %4589 = vbcast.lane.b32.xlu0 %v9099_v18, 344  ;;  %4553 = vbcast.lane.b32.xlu1 %v9099_v18, 272  ;;  %v4944_v32 = vadd.f32 %v4943_v53, %v4942_v2  ;;  %vm10024_vm2 = vmmov %vm10005_vm0 }
 0x441   :  { %v4976_v12 = vsel %vm10009_vm7, %v4826_v31, 0.0  ;;  %vm10018_vm7 = vmmov %vm10005_vm0 }
 0x442   :  { %v4361_v16 = vpop.permute.xlu0 %4360  ;;  %v9117_v21 = vpop.permute.xlu1 %4313 }
 0x443   :  { %v4828_v57 = vmul.f32 %v6669_v7, %v4361_v16  ;;  %v6678_v7 = vld [vmem:[%s9910_s0 + $0xc8] sm:$0xff] }
 0x444   :  { %4597 = vbcast.lane.b32.xlu0 %v9099_v18, 360  ;;  %4561 = vbcast.lane.b32.xlu1 %v9099_v18, 288 }
 0x445   :  { %v4980_v60 = vsel %vm10013_vm14, %v4828_v57, 0.0  ;;  %vm10022_vm14 = vmmov %vm10005_vm0 }
 0x446   :  { %v9122_v6 = vpop.permute.xlu0 %4368  ;;  %v9124_v52 = vpop.permute.xlu1 %4321 }
 0x447   :  { %v4830_v8 = vmul.f32 %v6671_v50, %v9122_v6  ;;  %v6674_v6 = vld [vmem:[%s9910_s0 + $0x38] sm:$0xff] }
 0x448   :  { %4612 = vbcast.lane.b32.xlu0 %v9127_v63, 256  ;;  %4569 = vbcast.lane.b32.xlu1 %v9099_v18, 304  ;;  %v4815_v31 = vmul.f32 %v6674_v6, %v9113_v34 }
 0x449   :  { %v4984_v38 = vsel %vm10005_vm0, %v4830_v8, 0.0 }
 0x44a   :  { %v9132_v51 = vpop.permute.xlu0 %4376  ;;  %v9134_v26 = vpop.permute.xlu1 %4329 }
 0x44b   :  { %v4832_v56 = vmul.f32 %v6676_v62, %v9132_v51 }
 0x44c   :  { %4679 = vbcast.lane.b32.xlu0 %v9137_v1, 256  ;;  %4577 = vbcast.lane.b32.xlu1 %v9099_v18, 320 }
 0x44d   :  { %v4988_v53 = vsel %vm10018_vm7, %v4832_v56, 0.0  ;;  %vm10027_vm7 = vmmov %vm10005_vm0 }
 0x44e   :  { %v9144_v19 = vpop.permute.xlu0 %4384  ;;  %v9146_v17 = vpop.permute.xlu1 %4337 }
 0x450   :  { %4620 = vbcast.lane.b32.xlu0 %v9127_v63, 272  ;;  %4585 = vbcast.lane.b32.xlu1 %v9099_v18, 336 }
 0x452   :  { %v9164_v15 = vpop.permute.xlu0 %4392  ;;  %v4349_v35 = vpop.permute.xlu1 %4348 }
 0x453   :  { %v4825_v10 = vmul.f32 %v6666_v59, %v4349_v35  ;;  %v4946_v35 = vadd.f32 %v4945_v28, %v4944_v32 }
 0x454   :  { %4750 = vbcast.lane.b32.xlu0 %v9167_v9, 264  ;;  %4593 = vbcast.lane.b32.xlu1 %v9099_v18, 352 }
 0x455   :  { %v4974_v5 = vsel %vm10007_vm1, %v4825_v10, 0.0  ;;  %vm10016_vm1 = vmmov %vm10005_vm0 }
 0x456   :  { %v4975_v39 = vadd.f32 %v4974_v5, %v4973_v24  ;;  %v9188_v47 = vpop.permute.xlu0 %4400  ;;  %v4357_v0 = vpop.permute.xlu1 %4356  ;;  %v4948_v24 = vadd.f32 %v4947_v45, %v4946_v35  ;;  %v4949_v5 = vsel %vm10017_vm5, %v4815_v31, 0.0  ;;  %v6685_v45 = vld [vmem:[%s9910_s0 + $0xe0] sm:$0xff]  ;;  %vm10026_vm5 = vmmov %vm10005_vm0 }
 0x457   :  { %v4827_v61 = vmul.f32 %v6670_v27, %v4357_v0  ;;  %v6679_v27 = vld [vmem:[%s9910_s0 + $0x48] sm:$0xff] }
 0x458   :  { %v4977_v43 = vadd.f32 %v4976_v12, %v4975_v39  ;;  %4624 = vbcast.lane.b32.xlu0 %v9127_v63, 280  ;;  %4601 = vbcast.lane.b32.xlu1 %v9099_v18, 368  ;;  %v4816_v12 = vmul.f32 %v6677_v23, %v9096_v33  ;;  %v4950_v51 = vadd.f32 %v4949_v5, %v4948_v24  ;;  %v6686_v5 = vld [vmem:[%s9910_s0 + $0x110] sm:$0xff]  ;;  %v6689_v23 = vld [vmem:[%s9910_s0 + $0xe8] sm:$0xff] }
 0x459   :  { %v4978_v13 = vsel %vm10011_vm10, %v4827_v61, 0.0  ;;  %v4817_v61 = vmul.f32 %v6679_v27, %v9117_v21  ;;  %vm10020_vm10 = vmmov %vm10005_vm0  ;;  %v6680_v21 = vld [vmem:[%s9910_s0 + $0xd0] sm:$0xff] }
 0x45a   :  { %v4979_v48 = vadd.f32 %v4978_v13, %v4977_v43  ;;  %v9202_v29 = vpop.permute.xlu0 %4411  ;;  %v4365_v16 = vpop.permute.xlu1 %4364  ;;  %v4951_v13 = vsel %vm10019_vm8, %v4816_v12, 0.0  ;;  %v4834_v32 = vmul.f32 %v6680_v21, %v9144_v19  ;;  %vm10028_vm8 = vmmov %vm10005_vm0 }
 0x45b   :  { %v4829_v4 = vmul.f32 %v6672_v49, %v4365_v16  ;;  %v4953_v16 = vsel %vm10021_vm13, %v4817_v61, 0.0  ;;  %v6681_v49 = vld [vmem:[%s9910_s0 + $0x50] sm:$0xff]  ;;  %vm10030_vm13 = vmmov %vm10005_vm0 }
 0x45c   :  { %v4981_v40 = vadd.f32 %v4980_v60, %v4979_v48  ;;  %4691 = vbcast.lane.b32.xlu0 %v9137_v1, 280  ;;  %4616 = vbcast.lane.b32.xlu1 %v9127_v63, 264  ;;  %v4952_v48 = vadd.f32 %v4951_v13, %v4950_v51  ;;  %v6690_v51 = vld [vmem:[%s9910_s0 + $0x68] sm:$0xff]  ;;  %v6691_v13 = vld [vmem:[%s9910_s0 + $0x120] sm:$0xff] }
 0x45d   :  { %v4982_v36 = vsel %vm10014_vm15, %v4829_v4, 0.0  ;;  %v4818_v4 = vmul.f32 %v6681_v49, %v9102_v30  ;;  %vm10023_vm15 = vmmov %vm10005_vm0 }
 0x45e   :  { %v4983_v59 = vadd.f32 %v4982_v36, %v4981_v40  ;;  %v9223_v10 = vpop.permute.xlu0 %4419  ;;  %v4373_v14 = vpop.permute.xlu1 %4372  ;;  %v4954_v19 = vadd.f32 %v4953_v16, %v4952_v48  ;;  %v6683_v40 = vld [vmem:[%s9910_s0 + $0x58] sm:$0xff]  ;;  %v4992_v36 = vsel %vm10022_vm14, %v4834_v32, 0.0  ;;  %vm10031_vm14 = vmmov %vm10005_vm0 }
 0x45f   :  { %v4831_v54 = vmul.f32 %v6675_v25, %v4373_v14  ;;  %v4819_v35 = vmul.f32 %v6683_v40, %v9124_v52  ;;  %v6684_v25 = vld [vmem:[%s9910_s0 + $0x100] sm:$0xff]  ;;  %v4842_v62 = vmul.f32 %v6686_v5, %v9223_v10  ;;  %v6692_v16 = vld [vmem:[%s9910_s0 + $0x118] sm:$0xff] }
 0x460   :  { %v4985_v42 = vadd.f32 %v4984_v38, %v4983_v59  ;;  %4758 = vbcast.lane.b32.xlu0 %v9167_v9, 280  ;;  %4683 = vbcast.lane.b32.xlu1 %v9137_v1, 264  ;;  %v4955_v59 = vsel %vm10023_vm15, %v4818_v4, 0.0  ;;  %v4840_v52 = vmul.f32 %v6684_v25, %v9202_v29  ;;  %v6687_v29 = vld [vmem:[%s9910_s0 + $0x108] sm:$0xff]  ;;  %vm10032_vm15 = vmmov %vm10005_vm0  ;;  %v6693_v4 = vld [vmem:[%s9910_s0 + $0xf0] sm:$0xff] }
 0x461   :  { %v4986_v34 = vsel %vm10016_vm1, %v4831_v54, 0.0  ;;  %v4956_v38 = vadd.f32 %v4955_v59, %v4954_v19  ;;  %v4957_v54 = vsel %vm10024_vm2, %v4819_v35, 0.0  ;;  %vm10025_vm1 = vmmov %vm10005_vm0 }
 0x462   :  { %v9238_v11 = vpop.permute.xlu0 %4427  ;;  %v4381_v39 = vpop.permute.xlu1 %4380  ;;  %v4987_v0 = vadd.f32 %v4986_v34, %v4985_v42  ;;  %v4836_v42 = vmul.f32 %v6685_v45, %v9164_v15  ;;  %vm10033_vm2 = vmmov %vm10005_vm0 }
 0x463   :  { %v4833_v57 = vmul.f32 %v6678_v7, %v4381_v39  ;;  %v4958_v10 = vadd.f32 %v4957_v54, %v4956_v38  ;;  %v5010_v7 = vsel %vm10025_vm1, %v4840_v52, 0.0  ;;  %v6697_v52 = vld [vmem:[%s9910_s0 + $0xf8] sm:$0xff]  ;;  %vm10034_vm1 = vmmov %vm10005_vm0 }
 0x464   :  { %4632 = vbcast.lane.b32.xlu0 %v9127_v63, 296  ;;  %4746 = vbcast.lane.b32.xlu1 %v9167_v9, 256  ;;  %v4989_v2 = vadd.f32 %v4988_v53, %v4987_v0  ;;  %v6688_v0 = vld [vmem:[%s9910_s0 + $0x60] sm:$0xff]  ;;  %v4996_v27 = vsel %vm10027_vm7, %v4836_v42, 0.0  ;;  %vm10036_vm7 = vmmov %vm10005_vm0 }
 0x465   :  { %v4990_v28 = vsel %vm10020_vm10, %v4833_v57, 0.0  ;;  %v4820_v15 = vmul.f32 %v6688_v0, %v9105_v55  ;;  %v4821_v55 = vmul.f32 %v6690_v51, %v9134_v26  ;;  %vm10029_vm10 = vmmov %vm10005_vm0 }
 0x466   :  { %v9254_v43 = vpop.permute.xlu0 %4435  ;;  %v4389_v33 = vpop.permute.xlu1 %4388  ;;  %v4991_v8 = vadd.f32 %v4990_v28, %v4989_v2  ;;  %v5013_v2 = vsel %vm10028_vm8, %v4842_v62, 0.0  ;;  %v4844_v28 = vmul.f32 %v6691_v13, %v9238_v11  ;;  %vm10037_vm8 = vmmov %vm10005_vm0 }
 0x467   :  { %v4835_v22 = vmul.f32 %v6682_v44, %v4389_v33  ;;  %v4959_v21 = vsel %vm10029_vm10, %v4820_v15, 0.0  ;;  %v4961_v11 = vsel %vm10032_vm15, %v4821_v55, 0.0  ;;  %v4838_v44 = vmul.f32 %v6693_v4, %v9188_v47  ;;  %v6696_v47 = vld [vmem:[%s9910_s0 + $0x70] sm:$0xff]  ;;  %vm10038_vm10 = vmmov %vm10005_vm0  ;;  %v6703_v4 = vld [vmem:[%s9910_s0 + $0x160] sm:$0xff] }
 0x468   :  { %4699 = vbcast.lane.b32.xlu0 %v9137_v1, 296  ;;  %4687 = vbcast.lane.b32.xlu1 %v9137_v1, 272  ;;  %v4993_v31 = vadd.f32 %v4992_v36, %v4991_v8  ;;  %v4960_v8 = vadd.f32 %v4959_v21, %v4958_v10  ;;  %v5017_v35 = vsel %vm10005_vm0, %v4844_v28, 0.0  ;;  %v6694_v36 = vld [vmem:[%s9910_s0 + $0x130] sm:$0xff]  ;;  %v4822_v25 = vmul.f32 %v6696_v47, %v9108_v46  ;;  %vm10041_vm15 = vmmov %vm10005_vm0 }
 0x469   :  { %v4994_v14 = vsel %vm10005_vm0, %v4835_v22, 0.0  ;;  %v5000_v46 = vsel %vm10034_vm1, %v4838_v44, 0.0  ;;  %vm10043_vm1 = vmmov %vm10005_vm0 }
 0x46a   :  { %v9265_v60 = vpop.permute.xlu0 %4443  ;;  %v4397_v50 = vpop.permute.xlu1 %4396  ;;  %v4995_v56 = vadd.f32 %v4994_v14, %v4993_v31  ;;  %v4846_v31 = vmul.f32 %v6694_v36, %v9254_v43  ;;  %v6695_v14 = vld [vmem:[%s9910_s0 + $0x128] sm:$0xff]  ;;  %v4962_v43 = vadd.f32 %v4961_v11, %v4960_v8 }
 0x46b   :  { %v4837_v12 = vmul.f32 %v6689_v23, %v4397_v50  ;;  %v6700_v23 = vld [vmem:[%s9910_s0 + $0x138] sm:$0xff] }
 0x46c   :  { %4766 = vbcast.lane.b32.xlu0 %v9167_v9, 296  ;;  %4754 = vbcast.lane.b32.xlu1 %v9167_v9, 272  ;;  %v4997_v48 = vadd.f32 %v4996_v27, %v4995_v56 }
 0x46d   :  { %v4998_v32 = vsel %vm10030_vm13, %v4837_v12, 0.0  ;;  %v4963_v12 = vsel %vm10036_vm7, %v4822_v25, 0.0  ;;  %vm10039_vm13 = vmmov %vm10005_vm0  ;;  %v6705_v25 = vld [vmem:[%s9910_s0 + $0x170] sm:$0xff] }
 0x46e   :  { %v9281_v6 = vpop.permute.xlu0 %4451  ;;  %v4405_v30 = vpop.permute.xlu1 %4404  ;;  %v4999_v59 = vadd.f32 %v4998_v32, %v4997_v48  ;;  %v6702_v48 = vld [vmem:[%s9910_s0 + $0x148] sm:$0xff]  ;;  %vm10045_vm7 = vmmov %vm10005_vm0 }
 0x46f   :  { %v4839_v54 = vmul.f32 %v6697_v52, %v4405_v30 }
 0x470   :  { %4640 = vbcast.lane.b32.xlu0 %v9127_v63, 312  ;;  %4628 = vbcast.lane.b32.xlu1 %v9127_v63, 288  ;;  %v5001_v15 = vadd.f32 %v5000_v46, %v4999_v59 }
 0x471   :  { %v5002_v10 = vsel %vm10037_vm8, %v4839_v54, 0.0  ;;  %v6706_v54 = vld [vmem:[%s9910_s0 + $0x168] sm:$0xff]  ;;  %vm10046_vm8 = vmmov %vm10005_vm0 }
 0x472   :  { %v9296_v24 = vpop.permute.xlu0 %4459  ;;  %v4416_v34 = vpop.permute.xlu1 %4415  ;;  %v5003_v28 = vadd.f32 %v5002_v10, %v5001_v15 }
 0x473   :  { %v4841_v39 = vmul.f32 %v6687_v29, %v4416_v34  ;;  %v6698_v34 = vld [vmem:[%s9910_s0 + $0x78] sm:$0xff]  ;;  %v4852_v44 = vmul.f32 %v6703_v4, %v9296_v24 }
 0x474   :  { %4707 = vbcast.lane.b32.xlu0 %v9137_v1, 312  ;;  %4695 = vbcast.lane.b32.xlu1 %v9137_v1, 288  ;;  %v4823_v5 = vmul.f32 %v6698_v34, %v9146_v17  ;;  %v5004_v11 = vrot.slane %v5003_v28, 4 }
 0x475   :  { %v5011_v57 = vsel %vm10026_vm5, %v4841_v39, 0.0  ;;  %vm10035_vm5 = vmmov %vm10005_vm0  ;;  %v6699_v39 = vld [vmem:[%s9910_s0 + $0x140] sm:$0xff]  ;;  %v5033_v24 = vsel %vm10043_vm1, %v4852_v44, 0.0  ;;  %vm10052_vm1 = vcmask 1041409  }
 0x476   :  { %v5012_v61 = vadd.f32 %v5011_v57, %v5010_v7  ;;  %v9321_v53 = vpop.permute.xlu0 %4467  ;;  %v4424_v33 = vpop.permute.xlu1 %4423  ;;  %v5021_v29 = vsel %vm10035_vm5, %v4846_v31, 0.0  ;;  %v4848_v0 = vmul.f32 %v6699_v39, %v9265_v60  ;;  %v4964_v57 = vadd.f32 %v4963_v12, %v4962_v43  ;;  %vm10044_vm5 = vmmov %vm10005_vm0 }
 0x477   :  { %v4843_v26 = vmul.f32 %v6692_v16, %v4424_v33  ;;  %v4965_v60 = vsel %vm10039_vm13, %v4823_v5, 0.0  ;;  %v5005_v47 = vadd.f32 %v5004_v11, %v5003_v28  ;;  %v4854_v52 = vmul.f32 %v6705_v25, %v9321_v53  ;;  %vm10048_vm13 = vmmov %vm10005_vm0  ;;  %v6714_v25 = vld [vmem:[%s9910_s0 + $0x1a8] sm:$0xff] }
 0x478   :  { %v5014_v50 = vadd.f32 %v5013_v2, %v5012_v61  ;;  %4774 = vbcast.lane.b32.xlu0 %v9167_v9, 312  ;;  %4762 = vbcast.lane.b32.xlu1 %v9167_v9, 288  ;;  %v6701_v2 = vld [vmem:[%s9910_s0 + $0x150] sm:$0xff]  ;;  %v4966_v21 = vadd.f32 %v4965_v60, %v4964_v57 }
 0x479   :  { %v5015_v49 = vsel %vm10031_vm14, %v4843_v26, 0.0  ;;  %vm10040_vm14 = vmmov %vm10005_vm0  ;;  %v4850_v13 = vmul.f32 %v6701_v2, %v9281_v6  ;;  %v5037_v53 = vsel %vm10045_vm7, %v4854_v52, 0.0  ;;  %v6709_v60 = vld [vmem:[%s9910_s0 + $0x190] sm:$0xff] }
 0x47a   :  { %v5016_v22 = vadd.f32 %v5015_v49, %v5014_v50  ;;  %v9341_v19 = vpop.permute.xlu0 %4478  ;;  %v4432_v40 = vpop.permute.xlu1 %4431  ;;  %v5025_v33 = vsel %vm10040_vm14, %v4848_v0, 0.0  ;;  %v4967_v36 = vrot.slane %v4966_v21, 4  ;;  %vm10049_vm14 = vmmov %vm10005_vm0 }
 0x47b   :  { %v4845_v38 = vmul.f32 %v6695_v14, %v4432_v40  ;;  %v5029_v6 = vsel %vm10005_vm0, %v4850_v13, 0.0  ;;  %vm10054_vm7 = vmmov %vm10005_vm0 }
 0x47c   :  { %v5018_v45 = vadd.f32 %v5017_v35, %v5016_v22  ;;  %4648 = vbcast.lane.b32.xlu0 %v9127_v63, 328  ;;  %4636 = vbcast.lane.b32.xlu1 %v9127_v63, 304  ;;  %v6704_v22 = vld [vmem:[%s9910_s0 + $0x158] sm:$0xff] }
 0x47d   :  { %v5019_v42 = vsel %vm10033_vm2, %v4845_v38, 0.0  ;;  %vm10042_vm2 = vmmov %vm10005_vm0 }
 0x47e   :  { %v5020_v62 = vadd.f32 %v5019_v42, %v5018_v45  ;;  %v9366_v56 = vpop.permute.xlu0 %4486  ;;  %v4440_v30 = vpop.permute.xlu1 %4439  ;;  %v4968_v42 = vadd.f32 %v4967_v36, %v4966_v21 }
 0x47f   :  { %v4847_v17 = vmul.f32 %v6700_v23, %v4440_v30  ;;  %v5006_v30 = vrot.slane %v5005_v47, 2  ;;  %v6708_v23 = vld [vmem:[%s9910_s0 + $0x180] sm:$0xff] }
 0x480   :  { %v5022_v7 = vadd.f32 %v5021_v29, %v5020_v62  ;;  %4715 = vbcast.lane.b32.xlu0 %v9137_v1, 328  ;;  %4703 = vbcast.lane.b32.xlu1 %v9137_v1, 304  ;;  %v6707_v29 = vld [vmem:[%s9910_s0 + $0x178] sm:$0xff]  ;;  %v4969_v15 = vrot.slane %v4968_v42, 2 }
 0x481   :  { %v5023_v51 = vsel %vm10038_vm10, %v4847_v17, 0.0  ;;  %v4856_v17 = vmul.f32 %v6708_v23, %v9341_v19  ;;  %vm10047_vm10 = vmmov %vm10005_vm0  ;;  %v6717_v23 = vld [vmem:[%s9910_s0 + $0x1c8] sm:$0xff] }
 0x482   :  { %v5024_v55 = vadd.f32 %v5023_v51, %v5022_v7  ;;  %v9382_v27 = vpop.permute.xlu0 %4494  ;;  %v4448_v61 = vpop.permute.xlu1 %4447  ;;  %v5007_v51 = vadd.f32 %v5006_v30, %v5005_v47  ;;  %v4970_v19 = vadd.f32 %v4969_v15, %v4968_v42  ;;  %v6713_v47 = vld [vmem:[%s9910_s0 + $0x1b0] sm:$0xff] }
 0x483   :  { %v4849_v16 = vmul.f32 %v6702_v48, %v4448_v61  ;;  %v6710_v61 = vld [vmem:[%s9910_s0 + $0x188] sm:$0xff]  ;;  %v5047_v13 = vsel %vm10047_vm10, %v4856_v17, 0.0  ;;  %vm10057_vm10 = vmmov %vm10005_vm0 }
 0x484   :  { %v5026_v26 = vadd.f32 %v5025_v33, %v5024_v55  ;;  %4782 = vbcast.lane.b32.xlu0 %v9167_v9, 328  ;;  %4770 = vbcast.lane.b32.xlu1 %v9167_v9, 304  ;;  %v4858_v55 = vmul.f32 %v6709_v60, %v9366_v56  ;;  %v5008_v21 = vrot.slane %v5007_v51, 1  ;;  %v6718_v60 = vld [vmem:[%s9910_s0 + $0x1d0] sm:$0xff] }
 0x485   :  { %v5027_v32 = vsel %vm10041_vm15, %v4849_v16, 0.0  ;;  %vm10050_vm15 = vmmov %vm10005_vm0 }
 0x486   :  { %v5028_v50 = vadd.f32 %v5027_v32, %v5026_v26  ;;  %v9395_v8 = vpop.permute.xlu0 %4502  ;;  %v4456_v49 = vpop.permute.xlu1 %4455  ;;  %v5050_v32 = vsel %vm10049_vm14, %v4858_v55, 0.0  ;;  %vm10059_vm14 = vmmov %vm10005_vm0 }
 0x487   :  { %v4851_v40 = vmul.f32 %v6704_v22, %v4456_v49  ;;  %v4971_v22 = vrot.slane %v4970_v19, 1 }
 0x488   :  { %v5030_v35 = vadd.f32 %v5029_v6, %v5028_v50  ;;  %4656 = vbcast.lane.b32.xlu0 %v9127_v63, 344  ;;  %4644 = vbcast.lane.b32.xlu1 %v9127_v63, 320  ;;  %v6711_v50 = vld [vmem:[%s9910_s0 + $0x1a0] sm:$0xff]  ;;  %v6712_v6 = vld [vmem:[%s9910_s0 + $0x198] sm:$0xff] }
 0x489   :  { %v5031_v31 = vsel %vm10042_vm2, %v4851_v40, 0.0  ;;  %v4860_v49 = vmul.f32 %v6711_v50, %v9382_v27  ;;  %v5009_v27 = vadd.f32 %v5008_v21, %v5007_v51  ;;  %v4972_v42 = vadd.f32 %v4971_v22, %v4970_v19  ;;  %vm10051_vm2 = vmmov %vm10005_vm0  ;;  %v6722_v22 = vld [vmem:[%s9910_s0 + $0x1f0] sm:$0xff] }
 0x48a   :  { %v5032_v59 = vadd.f32 %v5031_v31, %v5030_v35  ;;  %v9408_v14 = vpop.permute.xlu0 %4510  ;;  %v4464_v38 = vpop.permute.xlu1 %4463 }
 0x48b   :  { %v4853_v45 = vmul.f32 %v6706_v54, %v4464_v38  ;;  %v5054_v38 = vsel %vm10005_vm0, %v4860_v49, 0.0 }
 0x48c   :  { %v5034_v43 = vadd.f32 %v5033_v24, %v5032_v59  ;;  %4723 = vbcast.lane.b32.xlu0 %v9137_v1, 344  ;;  %4711 = vbcast.lane.b32.xlu1 %v9137_v1, 320  ;;  %v4862_v24 = vmul.f32 %v6713_v47, %v9395_v8 }
 0x48d   :  { %v5035_v34 = vsel %vm10044_vm5, %v4853_v45, 0.0  ;;  %vm10053_vm5 = vmmov %vm10005_vm0 }
 0x48e   :  { %v5036_v5 = vadd.f32 %v5035_v34, %v5034_v43  ;;  %v9421_v46 = vpop.permute.xlu0 %4514  ;;  %v4472_v62 = vpop.permute.xlu1 %4471  ;;  %v4270_v43 = vmul.f32 1.442695, %v4269_v58 }
 0x48f   :  { %v4855_v39 = vmul.f32 %v6707_v29, %v4472_v62  ;;  %v5058_v29 = vsel %vm10053_vm5, %v4862_v24, 0.0  ;;  %vm10063_vm5 = vmmov %vm10005_vm0 }
 0x490   :  { %v5038_v0 = vadd.f32 %v5037_v53, %v5036_v5  ;;  %4790 = vbcast.lane.b32.xlu0 %v9167_v9, 344  ;;  %4778 = vbcast.lane.b32.xlu1 %v9167_v9, 320  ;;  %v5247_v53 = vsel %vm10052_vm1, %v5009_v27, %v4972_v42  ;;  %6652 = vpow2.f32 %v4270_v43  ;;  %vm10062_vm1 = vmmov %vm10005_vm0 }
 0x491   :  { %v5039_v12 = vsel %vm10046_vm8, %v4855_v39, 0.0  ;;  %v6715_v39 = vld [vmem:[%s9910_s0 + $0x1c0] sm:$0xff]  ;;  %vm10055_vm8 = vmmov %vm10005_vm0 }
 0x492   :  { %v5040_v10 = vadd.f32 %v5039_v12, %v5038_v0  ;;  %v9434_v7 = vpop.permute.xlu0 %4522  ;;  %v4483_v57 = vpop.permute.xlu1 %4482  ;;  %v4864_v0 = vmul.f32 %v6715_v39, %v9408_v14  ;;  %v4865_v14 = vmul.f32 %v6717_v23, %v9421_v46  ;;  %v6719_v46 = vld [vmem:[%s9910_s0 + $0x1d8] sm:$0xff] }
 0x493   :  { %v4857_v33 = vmul.f32 %v6710_v61, %v4483_v57 }
 0x494   :  { %v5041_v2 = vrot.slane %v5040_v10, 4  ;;  %4664 = vbcast.lane.b32.xlu0 %v9127_v63, 360  ;;  %4652 = vbcast.lane.b32.xlu1 %v9127_v63, 336  ;;  %v5062_v51 = vsel %vm10055_vm8, %v4864_v0, 0.0  ;;  %vm10065_vm8 = vmmov %vm10005_vm0 }
 0x495   :  { %v5048_v28 = vsel %vm10048_vm13, %v4857_v33, 0.0  ;;  %vm10058_vm13 = vmmov %vm10005_vm0 }
 0x496   :  { %v5042_v48 = vadd.f32 %v5041_v2, %v5040_v10  ;;  %v5049_v16 = vadd.f32 %v5048_v28, %v5047_v13  ;;  %v9447_v26 = vpop.permute.xlu0 %4530  ;;  %v4491_v56 = vpop.permute.xlu1 %4490  ;;  %v4867_v2 = vmul.f32 %v6719_v46, %v9434_v7  ;;  %v6721_v7 = vld [vmem:[%s9910_s0 + $0x1e8] sm:$0xff] }
 0x497   :  { %v4859_v11 = vmul.f32 %v6712_v6, %v4491_v56  ;;  %v4869_v50 = vmul.f32 %v6721_v7, %v9447_v26  ;;  %v6723_v26 = vld [vmem:[%s9910_s0 + $0x1f8] sm:$0xff] }
 0x498   :  { %v5043_v4 = vrot.slane %v5042_v48, 2  ;;  %v5051_v44 = vadd.f32 %v5050_v32, %v5049_v16  ;;  %4731 = vbcast.lane.b32.xlu0 %v9137_v1, 360  ;;  %4719 = vbcast.lane.b32.xlu1 %v9137_v1, 336  ;;  %v6720_v16 = vld [vmem:[%s9910_s0 + $0x1e0] sm:$0xff]  ;;  %v5068_v32 = vsel %vm10058_vm13, %v4867_v2, 0.0  ;;  %vm10068_vm13 = vmmov %vm10005_vm0 }
 0x499   :  { %v5052_v40 = vsel %vm10050_vm15, %v4859_v11, 0.0  ;;  %vm10060_vm15 = vmmov %vm10005_vm0 }
 0x49a   :  { %v5044_v35 = vadd.f32 %v5043_v4, %v5042_v48  ;;  %v5053_v36 = vadd.f32 %v5052_v40, %v5051_v44  ;;  %v9460_v31 = vpop.permute.xlu0 %4538  ;;  %v4499_v59 = vpop.permute.xlu1 %4498 }
 0x49b   :  { %v4861_v52 = vmul.f32 %v6714_v25, %v4499_v59  ;;  %v6653_v4 = vpop.eup %6652  ;;  %v6724_v59 = vld [vmem:[%s9910_s0 + $0x208] sm:$0xff] }
 0x49c   :  { %v5045_v54 = vrot.slane %v5044_v35, 1  ;;  %v5055_v45 = vadd.f32 %v5054_v38, %v5053_v36  ;;  %4798 = vbcast.lane.b32.xlu0 %v9167_v9, 360  ;;  %4786 = vbcast.lane.b32.xlu1 %v9167_v9, 336  ;;  %v4871_v36 = vmul.f32 %v6723_v26, %v9460_v31 }
 0x49d   :  { %v5056_v34 = vsel %vm10051_vm2, %v4861_v52, 0.0  ;;  %v6725_v52 = vld [vmem:[%s9910_s0 + $0x200] sm:$0xff]  ;;  %vm10061_vm2 = vmmov %vm10005_vm0 }
 0x49e   :  { %v5046_v5 = vadd.f32 %v5045_v54, %v5044_v35  ;;  %v5057_v8 = vadd.f32 %v5056_v34, %v5055_v45  ;;  %v4550_v62 = vpop.permute.xlu0 %4549  ;;  %v4507_v30 = vpop.permute.xlu1 %4506  ;;  %v5072_v35 = vsel %vm10060_vm15, %v4869_v50, 0.0  ;;  %v5076_v31 = vsel %vm10061_vm2, %v4871_v36, 0.0  ;;  %vm10070_vm15 = vmmov %vm10005_vm0 }
 0x49f   :  { %v4863_v37 = vmul.f32 %v6716_v20, %v4507_v30  ;;  %v4873_v27 = vmul.f32 %v6724_v59, %v4550_v62  ;;  %v6726_v30 = vld [vmem:[%s9910_s0 + $0x218] sm:$0xff]  ;;  %vm10072_vm2 = vmmov %vm10005_vm0 }
 0x4a0   :  { %v9486_v58 = vsel %vm4239_vm3, %v5046_v5, %v5247_v53  ;;  %v5059_v15 = vadd.f32 %v5058_v29, %v5057_v8  ;;  %4735 = vbcast.lane.b32.xlu0 %v9137_v1, 368  ;;  %4660 = vbcast.lane.b32.xlu1 %v9127_v63, 352  ;;  %vm10056_vm3 = vmmov %vm10005_vm0  ;;  %v6727_v29 = vld [vmem:[%s9910_s0 + $0x210] sm:$0xff] }
 0x4a1   :  { %v5060_v17 = vsel %vm10054_vm7, %v4863_v37, 0.0  ;;  %v5064_v33 = vsel %vm10056_vm3, %v4865_v14, 0.0  ;;  %v5085_v43 = vsel %vm10062_vm1, %v4873_v27, 0.0  ;;  %vm10064_vm7 = vmmov %vm10005_vm0  ;;  %v6734_v27 = vld [vmem:[%s9910_s0 + $0x258] sm:$0xff] }
 0x4a2   :  { %v5061_v12 = vadd.f32 %v5060_v17, %v5059_v15  ;;  %v4558_v10 = vpop.permute.xlu0 %4557  ;;  %v4519_v57 = vpop.permute.xlu1 %4518  ;;  %v6728_v17 = vld [vmem:[%s9910_s0 + $0x228] sm:$0xff]  ;;  %vm10066_vm3 = vmmov %vm10005_vm0 }
 0x4a3   :  { %v4866_v55 = vmul.f32 %v6718_v60, %v4519_v57  ;;  %v4875_v53 = vmul.f32 %v6726_v30, %v4558_v10  ;;  %v6729_v10 = vld [vmem:[%s9910_s0 + $0x220] sm:$0xff]  ;;  %vm10073_vm1 = vmmov %vm10005_vm0 }
 0x4a4   :  { %v5063_v61 = vadd.f32 %v5062_v51, %v5061_v12  ;;  %4802 = vbcast.lane.b32.xlu0 %v9167_v9, 368  ;;  %4727 = vbcast.lane.b32.xlu1 %v9137_v1, 352 }
 0x4a5   :  { %v5066_v48 = vsel %vm10057_vm10, %v4866_v55, 0.0  ;;  %v5089_v14 = vsel %vm10065_vm8, %v4875_v53, 0.0  ;;  %vm10067_vm10 = vmmov %vm10005_vm0 }
 0x4a6   :  { %v5065_v19 = vadd.f32 %v5064_v33, %v5063_v61  ;;  %v4566_v13 = vpop.permute.xlu0 %4565  ;;  %v4527_v28 = vpop.permute.xlu1 %4526  ;;  %vm10076_vm8 = vmmov %vm10005_vm0 }
 0x4a7   :  { %v4868_v56 = vmul.f32 %v6720_v16, %v4527_v28  ;;  %v4877_v12 = vmul.f32 %v6728_v17, %v4566_v13  ;;  %v6731_v28 = vld [vmem:[%s9910_s0 + $0x230] sm:$0xff] }
 0x4a8   :  { %v5067_v21 = vadd.f32 %v5066_v48, %v5065_v19  ;;  %4806 = vbcast.lane.b32.xlu0 %v9167_v9, 376  ;;  %4794 = vbcast.lane.b32.xlu1 %v9167_v9, 352  ;;  %v6730_v19 = vld [vmem:[%s9910_s0 + $0x238] sm:$0xff] }
 0x4a9   :  { %v5070_v44 = vsel %vm10059_vm14, %v4868_v56, 0.0  ;;  %v5093_v2 = vsel %vm10067_vm10, %v4877_v12, 0.0  ;;  %vm10069_vm14 = vmmov %vm10005_vm0 }
 0x4aa   :  { %v5069_v49 = vadd.f32 %v5068_v32, %v5067_v21  ;;  %v4574_v6 = vpop.permute.xlu0 %4573  ;;  %v4535_v11 = vpop.permute.xlu1 %4534  ;;  %vm10078_vm10 = vmmov %vm10005_vm0 }
 0x4ab   :  { %v4870_v40 = vmul.f32 %v6722_v22, %v4535_v11  ;;  %v4879_v13 = vmul.f32 %v6730_v19, %v4574_v6  ;;  %v6732_v6 = vld [vmem:[%s9910_s0 + $0x248] sm:$0xff] }
 0x4ac   :  { %v5071_v9 = vadd.f32 %v5070_v44, %v5069_v49  ;;  %4668 = vbcast.lane.b32.xlu1 %v9127_v63, 368  ;;  %5235 = vperm.xlu0 %6391, %v6653_v4   ;;  %v6733_v4 = vld [vmem:[%s9910_s0 + $0x240] sm:$0xff] }
 0x4ad   :  { %v5074_v25 = vsel %vm10005_vm0, %v4870_v40, 0.0  ;;  %v5097_v49 = vsel %vm10069_vm14, %v4879_v13, 0.0  ;;  %vm10080_vm14 = vmmov %vm10005_vm0 }
 0x4ae   :  { %v5073_v38 = vadd.f32 %v5072_v35, %v5071_v9  ;;  %v4582_v47 = vpop.permute.xlu0 %4581  ;;  %v4546_v24 = vpop.permute.xlu1 %4545 }
 0x4af   :  { %v4872_v54 = vmul.f32 %v6725_v52, %v4546_v24  ;;  %v4881_v11 = vmul.f32 %v6732_v6, %v4582_v47  ;;  %v6735_v47 = vld [vmem:[%s9910_s0 + $0x250] sm:$0xff] }
 0x4b0   :  { %v5075_v45 = vadd.f32 %v5074_v25, %v5073_v38  ;;  %4605 = vbcast.lane.b32.xlu1 %v9099_v18, 376 }
 0x4b1   :  { %v5084_v42 = vsel %vm10063_vm5, %v4872_v54, 0.0  ;;  %v5101_v59 = vsel %vm10005_vm0, %v4881_v11, 0.0  ;;  %vm10074_vm5 = vmmov %vm10005_vm0  ;;  %v6740_v11 = vld [vmem:[%s9910_s0 + $0x388] sm:$0xff] }
 0x4b2   :  { %v5077_v34 = vadd.f32 %v5076_v31, %v5075_v45  ;;  %v5086_v5 = vadd.f32 %v5085_v43, %v5084_v42  ;;  %v4590_v8 = vpop.permute.xlu0 %4589  ;;  %v4554_v62 = vpop.permute.xlu1 %4553  ;;  %v6736_v43 = vld [vmem:[%s9910_s0 + $0x268] sm:$0xff] }
 0x4b3   :  { %v4874_v18 = vmul.f32 %v6727_v29, %v4554_v62  ;;  %v4883_v38 = vmul.f32 %v6734_v27, %v4590_v8  ;;  %v5269_v62 = vsub.f32 %v9067_v3, %v9091_v41  ;;  %v6743_v27 = vld [vmem:[%s9910_s0 + $0x280] sm:$0xff] }
 0x4b4   :  { %v5078_v39 = vrot.slane %v5077_v34, 4  ;;  %4672 = vbcast.lane.b32.xlu1 %v9127_v63, 376 }
 0x4b5   :  { %v5087_v0 = vsel %vm10064_vm7, %v4874_v18, 0.0  ;;  %v5105_v31 = vsel %vm10072_vm2, %v4883_v38, 0.0  ;;  %vm10075_vm7 = vmmov %vm10005_vm0 }
 0x4b6   :  { %v5079_v20 = vadd.f32 %v5078_v39, %v5077_v34  ;;  %v5088_v37 = vadd.f32 %v5087_v0, %v5086_v5  ;;  %v4598_v15 = vpop.permute.xlu0 %4597  ;;  %v4562_v23 = vpop.permute.xlu1 %4561  ;;  %v6737_v34 = vld [vmem:[%s9910_s0 + $0x260] sm:$0xff]  ;;  %v6738_v0 = vld [vmem:[%s9910_s0 + $0x270] sm:$0xff]  ;;  %vm10083_vm2 = vmmov %vm10005_vm0 }
 0x4b7   :  { %v4876_v57 = vmul.f32 %v6729_v10, %v4562_v23  ;;  %v4885_v42 = vmul.f32 %v6736_v43, %v4598_v15  ;;  %v5270_v15 = vmul.f32 1.442695, %v5269_v62  ;;  %v6747_v62 = vld [vmem:[%s9910_s0 + $0x398] sm:$0xff] }
 0x4b8   :  { %v5080_v51 = vrot.slane %v5079_v20, 2  ;;  %v5090_v63 = vadd.f32 %v5089_v14, %v5088_v37  ;;  %4739 = vbcast.lane.b32.xlu1 %v9137_v1, 376 }
 0x4b9   :  { %v5091_v60 = vsel %vm10066_vm3, %v4876_v57, 0.0  ;;  %v5109_v39 = vsel %vm10074_vm5, %v4885_v42, 0.0  ;;  %6654 = vpow2.f32 %v5270_v15  ;;  %vm10077_vm3 = vmmov %vm10005_vm0 }
 0x4ba   :  { %v5081_v55 = vadd.f32 %v5080_v51, %v5079_v20  ;;  %v5092_v61 = vadd.f32 %v5091_v60, %v5090_v63  ;;  %v9555_v33 = vpop.permute.xlu0 %4612  ;;  %v4570_v46 = vpop.permute.xlu1 %4569  ;;  %vm10085_vm5 = vmmov %vm10005_vm0 }
 0x4bb   :  { %v4878_v48 = vmul.f32 %v6731_v28, %v4570_v46  ;;  %v4888_v38 = vmul.f32 %v6743_v27, %v9555_v33  ;;  %v6746_v33 = vld [vmem:[%s9910_s0 + $0x290] sm:$0xff] }
 0x4bc   :  { %v5082_v1 = vrot.slane %v5081_v55, 1  ;;  %v5094_v16 = vadd.f32 %v5093_v2, %v5092_v61  ;;  %v6755_v27 = vld [vmem:[%s9910_s0 + $0x3b0] sm:$0xff] }
 0x4bd   :  { %v5095_v56 = vsel %vm10068_vm13, %v4878_v48, 0.0  ;;  %vm10079_vm13 = vmmov %vm10005_vm0 }
 0x4be   :  { %v5083_v21 = vadd.f32 %v5082_v1, %v5081_v55  ;;  %v5096_v32 = vadd.f32 %v5095_v56, %v5094_v16  ;;  %v9565_v7 = vpop.permute.xlu0 %4679  ;;  %v4578_v50 = vpop.permute.xlu1 %4577 }
 0x4bf   :  { %v4880_v44 = vmul.f32 %v6733_v4, %v4578_v50 }
 0x4c0   :  { %v5098_v22 = vadd.f32 %v5097_v49, %v5096_v32  ;;  %v9576_v40 = vsel %vm4241_vm4, %v5083_v21, %v9486_v58  ;;  %vm10071_vm4 = vmmov %vm10005_vm0  ;;  %v6739_v49 = vld [vmem:[%s9910_s0 + $0x380] sm:$0xff] }
 0x4c1   :  { %v5099_v9 = vsel %vm10070_vm15, %v4880_v44, 0.0  ;;  %v6741_v44 = vld [vmem:[%s9910_s0 + $0x288] sm:$0xff]  ;;  %vm10081_vm15 = vmmov %vm10005_vm0 }
 0x4c2   :  { %v5100_v35 = vadd.f32 %v5099_v9, %v5098_v22  ;;  %v9579_v26 = vpop.permute.xlu0 %4620  ;;  %v4586_v36 = vpop.permute.xlu1 %4585  ;;  %v6742_v9 = vld [vmem:[%s9910_s0 + $0x390] sm:$0xff] }
 0x4c3   :  { %v4882_v24 = vmul.f32 %v6735_v47, %v4586_v36  ;;  %v9614_v60 = vpop.eup %6654  ;;  %v4890_v43 = vmul.f32 %v6746_v33, %v9579_v26  ;;  %v6749_v26 = vld [vmem:[%s9910_s0 + $0x3a0] sm:$0xff]  ;;  %v6757_v33 = vld [vmem:[%s9910_s0 + $0x2b0] sm:$0xff] }
 0x4c4   :  { %v5102_v58 = vadd.f32 %v5101_v59, %v5100_v35 }
 0x4c5   :  { %v5103_v25 = vsel %vm10071_vm4, %v4882_v24, 0.0  ;;  %vm10082_vm4 = vmmov %vm10005_vm0 }
 0x4c6   :  { %v5104_v52 = vadd.f32 %v5103_v25, %v5102_v58  ;;  %v4751_v54 = vpop.permute.xlu0 %4750  ;;  %v4594_v45 = vpop.permute.xlu1 %4593  ;;  %v6744_v25 = vld [vmem:[%s9910_s0 + $0x308] sm:$0xff]  ;;  %v5124_v15 = vsel %vm10082_vm4, %v4890_v43, 0.0  ;;  %vm10093_vm4 = vmmov %vm10005_vm0 }
 0x4c7   :  { %v4884_v5 = vmul.f32 %v6737_v34, %v4594_v45  ;;  %v4921_v4 = vmul.f32 %v6740_v11, %v4751_v54  ;;  %v6745_v45 = vld [vmem:[%s9910_s0 + $0x300] sm:$0xff] }
 0x4c8   :  { %v5106_v8 = vadd.f32 %v5105_v31, %v5104_v52  ;;  %v4904_v31 = vmul.f32 %v6745_v45, %v9565_v7  ;;  %v6748_v7 = vld [vmem:[%s9910_s0 + $0x310] sm:$0xff] }
 0x4c9   :  { %v5107_v30 = vsel %vm10073_vm1, %v4884_v5, 0.0  ;;  %v5196_v24 = vsel %vm10077_vm3, %v4921_v4, 0.0  ;;  %vm10084_vm1 = vmmov %vm10005_vm0 }
 0x4ca   :  { %v5108_v53 = vadd.f32 %v5107_v30, %v5106_v8  ;;  %v9599_v29 = vpop.permute.xlu0 %4624  ;;  %v4602_v18 = vpop.permute.xlu1 %4601  ;;  %v5121_v8 = vsel %vm10080_vm14, %v4888_v38, 0.0  ;;  %vm10088_vm3 = vmmov %vm10005_vm0 }
 0x4cb   :  { %v4886_v20 = vmul.f32 %v6738_v0, %v4602_v18  ;;  %vm10091_vm14 = vmmov %vm10005_vm0 }
 0x4cc   :  { %v5110_v37 = vadd.f32 %v5109_v39, %v5108_v53 }
 0x4cd   :  { %v5111_v23 = vsel %vm10075_vm7, %v4886_v20, 0.0  ;;  %vm10086_vm7 = vmmov %vm10005_vm0 }
 0x4ce   :  { %v9606_v14 = vadd.f32 %v5111_v23, %v5110_v37  ;;  %v9608_v3 = vpop.permute.xlu0 %4691  ;;  %v4617_v41 = vpop.permute.xlu1 %4616  ;;  %v5158_v37 = vsel %vm10005_vm0, %v4904_v31, 0.0  ;;  %v6750_v23 = vld [vmem:[%s9910_s0 + $0x298] sm:$0xff] }
 0x4cf   :  { %v4889_v22 = vmul.f32 %v6741_v44, %v4617_v41  ;;  %v4891_v41 = vmul.f32 %v6750_v23, %v9599_v29 }
 0x4d1   :  { %v5122_v58 = vsel %vm10078_vm10, %v4889_v22, 0.0  ;;  %v6753_v22 = vld [vmem:[%s9910_s0 + $0x3a8] sm:$0xff]  ;;  %vm10089_vm10 = vmmov %vm10005_vm0 }
 0x4d2   :  { %v4759_v17 = vpop.permute.xlu0 %4758  ;;  %v4684_v12 = vpop.permute.xlu1 %4683  ;;  %v5123_v39 = vadd.f32 %v5122_v58, %v5121_v8  ;;  %v6758_v8 = vld [vmem:[%s9910_s0 + $0x328] sm:$0xff] }
 0x4d3   :  { %v4905_v52 = vmul.f32 %v6744_v25, %v4684_v12  ;;  %v4923_v30 = vmul.f32 %v6747_v62, %v4759_v17  ;;  %v5126_v25 = vsel %vm10086_vm7, %v4891_v41, 0.0  ;;  %vm10097_vm7 = vmmov %vm10005_vm0 }
 0x4d4   :  { %v5125_v11 = vadd.f32 %v5124_v15, %v5123_v39  ;;  %v6760_v39 = vld [vmem:[%s9910_s0 + $0x330] sm:$0xff] }
 0x4d5   :  { %v5159_v20 = vsel %vm10081_vm15, %v4905_v52, 0.0  ;;  %vm10092_vm15 = vmmov %vm10005_vm0 }
 0x4d6   :  { %v9610_v10 = vpop.permute.xlu0 %4632  ;;  %v4747_v57 = vpop.permute.xlu1 %4746  ;;  %v5160_v4 = vadd.f32 %v5159_v20, %v5158_v37  ;;  %v5127_v45 = vadd.f32 %v5126_v25, %v5125_v11 }
 0x4d7   :  { %v4920_v6 = vmul.f32 %v6739_v49, %v4747_v57  ;;  %v5200_v57 = vsel %vm10083_vm2, %v4923_v30, 0.0  ;;  %vm10094_vm2 = vmmov %vm10005_vm0 }
 0x4d9   :  { %v5195_v47 = vsel %vm10076_vm8, %v4920_v6, 0.0  ;;  %v6752_v6 = vld [vmem:[%s9910_s0 + $0x318] sm:$0xff]  ;;  %vm10087_vm8 = vmmov %vm10005_vm0 }
 0x4da   :  { %v9612_v51 = vpop.permute.xlu0 %4699  ;;  %v4688_v63 = vpop.permute.xlu1 %4687  ;;  %v5197_v42 = vadd.f32 %v5196_v24, %v5195_v47  ;;  %v4907_v29 = vmul.f32 %v6752_v6, %v9608_v3  ;;  %v6763_v6 = vld [vmem:[%s9910_s0 + $0x2c0] sm:$0xff] }
 0x4db   :  { %v4906_v53 = vmul.f32 %v6748_v7, %v4688_v63  ;;  %v4909_v62 = vmul.f32 %v6758_v8, %v9612_v51  ;;  %v6761_v51 = vld [vmem:[%s9910_s0 + $0x3c0] sm:$0xff] }
 0x4dc   :  { %5272 = vadd.xlane.f32.xlu1 %v9614_v60  ;;  %v5163_v52 = vsel %vm10088_vm3, %v4907_v29, 0.0  ;;  %vm10099_vm3 = vmmov %vm10005_vm0 }
 0x4dd   :  { %v5161_v63 = vsel %vm10084_vm1, %v4906_v53, 0.0  ;;  %vm10095_vm1 = vmmov %vm10005_vm0 }
 0x4de   :  { %v9617_v55 = vpop.permute.xlu0 %4766  ;;  %v4755_v61 = vpop.permute.xlu1 %4754  ;;  %v5162_v38 = vadd.f32 %v5161_v63, %v5160_v4  ;;  %v6764_v4 = vld [vmem:[%s9910_s0 + $0x338] sm:$0xff] }
 0x4df   :  { %v4922_v35 = vmul.f32 %v6742_v9, %v4755_v61  ;;  %v6751_v61 = vld [vmem:[%s9910_s0 + $0x2a0] sm:$0xff]  ;;  %v4925_v9 = vmul.f32 %v6753_v22, %v9617_v55 }
 0x4e0   :  { %v5164_v30 = vadd.f32 %v5163_v52, %v5162_v38 }
 0x4e1   :  { %v5198_v54 = vsel %vm10079_vm13, %v4922_v35, 0.0  ;;  %vm10090_vm13 = vmmov %vm10005_vm0 }
 0x4e2   :  { %v9619_v46 = vpop.permute.xlu0 %4640  ;;  %v4629_v2 = vpop.permute.xlu1 %4628  ;;  %v5199_v0 = vadd.f32 %v5198_v54, %v5197_v42 }
 0x4e4   :  { %v5201_v44 = vadd.f32 %v5200_v57, %v5199_v0  ;;  %v5167_v57 = vsel %vm10093_vm4, %v4909_v62, 0.0  ;;  %vm10104_vm4 = vmmov %vm10005_vm0 }
 0x4e6   :  { %v9621_v19 = vpop.permute.xlu0 %4707  ;;  %v9623_v13 = vpop.permute.xlu1 %4695 }
 0x4ea   :  { %v9625_v28 = vpop.permute.xlu0 %4774  ;;  %v4763_v48 = vpop.permute.xlu1 %4762 }
 0x4eb   :  { %v4924_v18 = vmul.f32 %v6749_v26, %v4763_v48  ;;  %v4892_v48 = vmul.f32 %v6751_v61, %v4629_v2  ;;  %v6754_v2 = vld [vmem:[%s9910_s0 + $0x320] sm:$0xff] }
 0x4ec   :  { %v4908_v35 = vmul.f32 %v6754_v2, %v9623_v13  ;;  %v6756_v13 = vld [vmem:[%s9910_s0 + $0x2a8] sm:$0xff] }
 0x4ed   :  { %v5202_v49 = vsel %vm10085_vm5, %v4924_v18, 0.0  ;;  %v5128_v55 = vsel %vm10087_vm8, %v4892_v48, 0.0  ;;  %v4893_v54 = vmul.f32 %v6756_v13, %v9610_v10  ;;  %v6759_v18 = vld [vmem:[%s9910_s0 + $0x3b8] sm:$0xff]  ;;  %vm10096_vm5 = vmmov %vm10005_vm0  ;;  %v6765_v2 = vld [vmem:[%s9910_s0 + $0x3c8] sm:$0xff] }
 0x4ee   :  { %v9627_v1 = vpop.permute.xlu0 %4648  ;;  %v9629_v16 = vpop.permute.xlu1 %4636  ;;  %v5203_v47 = vadd.f32 %v5202_v49, %v5201_v44  ;;  %v5165_v31 = vsel %vm10090_vm13, %v4908_v35, 0.0  ;;  %v5129_v10 = vadd.f32 %v5128_v55, %v5127_v45  ;;  %vm10098_vm8 = vmmov %vm10005_vm0  ;;  %v6769_v45 = vld [vmem:[%s9910_s0 + $0x348] sm:$0xff] }
 0x4ef   :  { %v4894_v43 = vmul.f32 %v6757_v33, %v9629_v16  ;;  %v4927_v16 = vmul.f32 %v6759_v18, %v9625_v28  ;;  %v5166_v37 = vadd.f32 %v5165_v31, %v5164_v30  ;;  %v5130_v23 = vsel %vm10092_vm15, %v4893_v54, 0.0  ;;  %v6762_v28 = vld [vmem:[%s9910_s0 + $0x2b8] sm:$0xff]  ;;  %vm10101_vm13 = vmmov %vm10005_vm0 }
 0x4f0   :  { %v4895_v63 = vmul.f32 %v6762_v28, %v9619_v46  ;;  %v4911_v46 = vmul.f32 %v6764_v4, %v9621_v19  ;;  %v6771_v30 = vld [vmem:[%s9910_s0 + $0x3d8] sm:$0xff]  ;;  %vm10103_vm15 = vmmov %vm10005_vm0 }
 0x4f1   :  { %v5132_v41 = vsel %vm10005_vm0, %v4894_v43, 0.0  ;;  %v5208_v49 = vsel %vm10094_vm2, %v4927_v16, 0.0  ;;  %v5168_v22 = vadd.f32 %v5167_v57, %v5166_v37  ;;  %vm10105_vm2 = vmmov %vm10005_vm0 }
 0x4f2   :  { %v9631_v56 = vpop.permute.xlu0 %4715  ;;  %v9633_v21 = vpop.permute.xlu1 %4703  ;;  %v5134_v52 = vsel %vm10097_vm7, %v4895_v63, 0.0  ;;  %v5171_v13 = vsel %vm10099_vm3, %v4911_v46, 0.0  ;;  %v6774_v63 = vld [vmem:[%s9910_s0 + $0x3e8] sm:$0xff]  ;;  %vm10108_vm7 = vmmov %vm10005_vm0 }
 0x4f3   :  { %v4910_v0 = vmul.f32 %v6760_v39, %v9633_v21  ;;  %v5131_v21 = vadd.f32 %v5130_v23, %v5129_v10  ;;  %v6772_v39 = vld [vmem:[%s9910_s0 + $0x350] sm:$0xff]  ;;  %vm10110_vm3 = vmmov %vm10005_vm0 }
 0x4f5   :  { %v5133_v44 = vadd.f32 %v5132_v41, %v5131_v21 }
 0x4f6   :  { %v9635_v32 = vpop.permute.xlu0 %4782  ;;  %v4771_v50 = vpop.permute.xlu1 %4770 }
 0x4f7   :  { %v4926_v3 = vmul.f32 %v6755_v27, %v4771_v50  ;;  %v5204_v50 = vsel %vm10089_vm10, %v4925_v9, 0.0  ;;  %v4929_v35 = vmul.f32 %v6765_v2, %v9635_v32  ;;  %v5135_v31 = vadd.f32 %v5134_v52, %v5133_v44  ;;  %vm10100_vm10 = vmmov %vm10005_vm0  ;;  %v6778_v44 = vld [vmem:[%s9910_s0 + $0x3f0] sm:$0xff] }
 0x4f8   :  { %v5205_v7 = vadd.f32 %v5204_v50, %v5203_v47  ;;  %v4913_v50 = vmul.f32 %v6769_v45, %v9631_v56 }
 0x4f9   :  { %v5206_v42 = vsel %vm10091_vm14, %v4926_v3, 0.0  ;;  %v6767_v3 = vld [vmem:[%s9910_s0 + $0x3d0] sm:$0xff]  ;;  %v5212_v33 = vsel %vm10100_vm10, %v4929_v35, 0.0  ;;  %vm10102_vm14 = vmmov %vm10005_vm0 }
 0x4fa   :  { %v9649_v36 = vpop.permute.xlu0 %4656  ;;  %v9651_v59 = vpop.permute.xlu1 %4644  ;;  %v5207_v15 = vadd.f32 %v5206_v42, %v5205_v7  ;;  %v6770_v42 = vld [vmem:[%s9910_s0 + $0x2d0] sm:$0xff]  ;;  %vm10111_vm10 = vmmov %vm10005_vm0 }
 0x4fb   :  { %v4896_v29 = vmul.f32 %v6763_v6, %v9651_v59  ;;  %v6766_v59 = vld [vmem:[%s9910_s0 + $0x340] sm:$0xff]  ;;  %v6777_v6 = vld [vmem:[%s9910_s0 + $0x358] sm:$0xff] }
 0x4fc   :  { %v5209_v9 = vadd.f32 %v5208_v49, %v5207_v15  ;;  %v5175_v15 = vsel %vm10104_vm4, %v4913_v50, 0.0  ;;  %vm10115_vm4 = vmmov %vm10005_vm0 }
 0x4fd   :  { %v5136_v32 = vsel %vm10098_vm8, %v4896_v29, 0.0  ;;  %vm10109_vm8 = vmmov %vm10005_vm0 }
 0x4fe   :  { %v9672_v34 = vpop.permute.xlu0 %4723  ;;  %v9674_v5 = vpop.permute.xlu1 %4711 }
 0x4ff   :  { %v4912_v27 = vmul.f32 %v6766_v59, %v9674_v5  ;;  %v6768_v5 = vld [vmem:[%s9910_s0 + $0x2c8] sm:$0xff]  ;;  %v4915_v29 = vmul.f32 %v6777_v6, %v9672_v34 }
 0x500   :  { %v4897_v54 = vmul.f32 %v6768_v5, %v9627_v1  ;;  %v5137_v1 = vadd.f32 %v5136_v32, %v5135_v31  ;;  %v6781_v5 = vld [vmem:[%s9910_s0 + $0x2e8] sm:$0xff]  ;;  %v6782_v31 = vld [vmem:[%s9910_s0 + $0x2f0] sm:$0xff] }
 0x501   :  { %v5173_v43 = vsel %vm10101_vm13, %v4912_v27, 0.0  ;;  %v5179_v52 = vsel %vm10111_vm10, %v4915_v29, 0.0  ;;  %vm10112_vm13 = vmmov %vm10005_vm0 }
 0x502   :  { %v9693_v17 = vpop.permute.xlu0 %4790  ;;  %v4779_v12 = vpop.permute.xlu1 %4778 }
 0x503   :  { %v4928_v20 = vmul.f32 %v6761_v51, %v4779_v12  ;;  %v5169_v12 = vsel %vm10095_vm1, %v4910_v0, 0.0  ;;  %v4931_v56 = vmul.f32 %v6771_v30, %v9693_v17  ;;  %v6773_v17 = vld [vmem:[%s9910_s0 + $0x2d8] sm:$0xff]  ;;  %vm10106_vm1 = vmmov %vm10005_vm0 }
 0x504   :  { %v5170_v38 = vadd.f32 %v5169_v12, %v5168_v22  ;;  %v4899_v23 = vmul.f32 %v6773_v17, %v9649_v36  ;;  %v6776_v36 = vld [vmem:[%s9910_s0 + $0x3e0] sm:$0xff]  ;;  %v6784_v30 = vld [vmem:[%s9910_s0 + $0x278] sm:$0xff] }
 0x505   :  { %v5210_v11 = vsel %vm10096_vm5, %v4928_v20, 0.0  ;;  %v5138_v20 = vsel %vm10103_vm15, %v4897_v54, 0.0  ;;  %v5216_v41 = vsel %vm10105_vm2, %v4931_v56, 0.0  ;;  %vm10107_vm5 = vmmov %vm10005_vm0 }
 0x506   :  { %v9716_v24 = vpop.permute.xlu0 %4664  ;;  %v9718_v58 = vpop.permute.xlu1 %4652  ;;  %v5211_v47 = vadd.f32 %v5210_v11, %v5209_v9  ;;  %v5172_v10 = vadd.f32 %v5171_v13, %v5170_v38  ;;  %v5139_v57 = vadd.f32 %v5138_v20, %v5137_v1  ;;  %v6779_v9 = vld [vmem:[%s9910_s0 + $0x360] sm:$0xff]  ;;  %v5142_v34 = vsel %vm10108_vm7, %v4899_v23, 0.0  ;;  %v6783_v1 = vld [vmem:[%s9910_s0 + $0x368] sm:$0xff]  ;;  %vm10114_vm15 = vmmov %vm10005_vm0 }
 0x507   :  { %v4898_v8 = vmul.f32 %v6770_v42, %v9718_v58  ;;  %v4901_v54 = vmul.f32 %v6781_v5, %v9716_v24  ;;  %vm10116_vm2 = vmmov %vm10005_vm0  ;;  %v6786_v23 = vld [vmem:[%s9910_s0 + $0x2f8] sm:$0xff] }
 0x508   :  { %v5213_v7 = vadd.f32 %v5212_v33, %v5211_v47  ;;  %v5174_v51 = vadd.f32 %v5173_v43, %v5172_v10  ;;  %v6780_v47 = vld [vmem:[%s9910_s0 + $0x3f8] sm:$0xff]  ;;  %vm10119_vm7 = vmmov %vm10005_vm0 }
 0x509   :  { %v5140_v37 = vsel %vm10005_vm0, %v4898_v8, 0.0 }
 0x50a   :  { %v9738_v53 = vpop.permute.xlu0 %4731  ;;  %v4720_v26 = vpop.permute.xlu1 %4719  ;;  %v5141_v11 = vadd.f32 %v5140_v37, %v5139_v57  ;;  %v5176_v4 = vadd.f32 %v5175_v15, %v5174_v51  ;;  %v6785_v37 = vld [vmem:[%s9910_s0 + $0x370] sm:$0xff] }
 0x50b   :  { %v4914_v0 = vmul.f32 %v6772_v39, %v4720_v26  ;;  %v4917_v10 = vmul.f32 %v6783_v1, %v9738_v53 }
 0x50c   :  { %v5143_v32 = vadd.f32 %v5142_v34, %v5141_v11 }
 0x50d   :  { %v5177_v26 = vsel %vm10106_vm1, %v4914_v0, 0.0  ;;  %vm10117_vm1 = vmmov %vm10005_vm0 }
 0x50e   :  { %v4799_v61 = vpop.permute.xlu0 %4798  ;;  %v4787_v48 = vpop.permute.xlu1 %4786  ;;  %v5178_v59 = vadd.f32 %v5177_v26, %v5176_v4  ;;  %v5183_v53 = vsel %vm10117_vm1, %v4917_v10, 0.0 }
 0x50f   :  { %v4930_v19 = vmul.f32 %v6767_v3, %v4787_v48  ;;  %v4933_v21 = vmul.f32 %v6774_v63, %v4799_v61  ;;  %v6775_v48 = vld [vmem:[%s9910_s0 + $0x2e0] sm:$0xff] }
 0x510   :  { %v5180_v42 = vadd.f32 %v5179_v52, %v5178_v59 }
 0x511   :  { %v5214_v62 = vsel %vm10102_vm14, %v4930_v19, 0.0  ;;  %v5220_v19 = vsel %vm10109_vm8, %v4933_v21, 0.0  ;;  %vm10113_vm14 = vmmov %vm10005_vm0 }
 0x512   :  { %v9780_v25 = vpop.permute.xlu0 %4735  ;;  %v4661_v55 = vpop.permute.xlu1 %4660  ;;  %v5215_v58 = vadd.f32 %v5214_v62, %v5213_v7  ;;  %vm10120_vm8 = vmmov %vm10005_vm0 }
 0x513   :  { %v4900_v49 = vmul.f32 %v6775_v48, %v4661_v55  ;;  %v4918_v15 = vmul.f32 %v6785_v37, %v9780_v25  ;;  %v6787_v25 = vld [vmem:[%s9910_s0 + $0x378] sm:$0xff]  ;;  %s6842_s0 = smov [#allocation6]  }
 0x514   :  { %v5217_v61 = vadd.f32 %v5216_v41, %v5215_v58  ;;  %s5286_s14 = sshll.u32 %s6842_s0, 4  ;;  %s5287_s14 = int_to_ptr.vmem [resolvable:$true] %s5286_s14 }
 0x515   :  { %v5144_v38 = vsel %vm10110_vm3, %v4900_v49, 0.0  ;;  %v5185_v49 = vsel %vm10119_vm7, %v4918_v15, 0.0  ;;  %vm10121_vm3 = vmmov %vm10005_vm0  ;;  %s6788_s17 = scalar_lea.vmem %s5287_s14, 128  ;;  %p6793_p1 = scmp.lt.s32.totalorder %s5287_s14, %s5287_s14 }
 0x516   :  { %v4803_v18 = vpop.permute.xlu0 %4802  ;;  %v4728_v16 = vpop.permute.xlu1 %4727  ;;  %v5145_v43 = vadd.f32 %v5144_v38, %v5143_v32  ;;  %p6789_p0 = scmp.ne.s32.totalorder %s5287_s14, %s6788_s17  ;;  %p6794_p2 = scmp.lt.s32.totalorder %s6788_s17, %s6788_s17 }
 0x517   :  { %v4934_v22 = vmul.f32 %v6778_v44, %v4803_v18  ;;  %v4916_v2 = vmul.f32 %v6779_v9, %v4728_v16  ;;  %v5146_v16 = vsel %vm10005_vm0, %v4901_v54, 0.0  ;;  %v5232_v54 = vld [vmem:[#allocation4] sm:$0xff] }
 0x518   :  { %v5147_v51 = vadd.f32 %v5146_v16, %v5145_v43  ;;  %p6795_p3 = por %p6794_p2, %p6793_p1 }
 0x519   :  { %v5222_v45 = vsel %vm10112_vm13, %v4934_v22, 0.0  ;;  %v5181_v50 = vsel %vm10113_vm14, %v4916_v2, 0.0 }
 0x51a   :  { %v4795_v28 = vpop.permute.xlu1 %4794  ;;  %v4807_v46 = vpop.permute.xlu0 %4806  ;;  %v5182_v7 = vadd.f32 %v5181_v50, %v5180_v42  ;;  %p6796_p4 = pnand %p6795_p3, %p6789_p0 }
 0x51b   :  { %v4932_v12 = vmul.f32 %v6776_v36, %v4795_v28  ;;  %v4935_v55 = vmul.f32 %v6780_v47, %v4807_v46 }
 0x51c   :  { %v5184_v57 = vadd.f32 %v5183_v53, %v5182_v7 }
 0x51d   :  { %v5218_v35 = vsel %vm10107_vm5, %v4932_v12, 0.0  ;;  %v5224_v24 = vsel %vm10114_vm15, %v4935_v55, 0.0  ;;  %vm10118_vm5 = vmmov %vm10005_vm0 }
 0x51e   :  { %v5219_v27 = vadd.f32 %v5218_v35, %v5217_v61  ;;  %v4669_v3 = vpop.permute.xlu1 %4668  ;;  %v5186_v11 = vadd.f32 %v5185_v49, %v5184_v57 }
 0x51f   :  { %v4902_v33 = vmul.f32 %v6782_v31, %v4669_v3 }
 0x520   :  { %v5221_v13 = vadd.f32 %v5220_v19, %v5219_v27 }
 0x521   :  { %v5148_v39 = vsel %vm10115_vm4, %v4902_v33, 0.0 }
 0x522   :  { %v5223_v8 = vadd.f32 %v5222_v45, %v5221_v13  ;;  %v4606_v62 = vpop.permute.xlu1 %4605  ;;  %v5149_v28 = vadd.f32 %v5148_v39, %v5147_v51 }
 0x523   :  { %v4887_v56 = vmul.f32 %v6784_v30, %v4606_v62 }
 0x524   :  { %v5225_v18 = vadd.f32 %v5224_v24, %v5223_v8 }
 0x525   :  { %v5113_v0 = vsel %vm10116_vm2, %v4887_v56, 0.0 }
 0x526   :  { %v5114_v58 = vadd.f32 %v5113_v0, %v9606_v14  ;;  %v4673_v20 = vpop.permute.xlu1 %4672  ;;  %v5226_v17 = vrot.slane %v5225_v18, 4 }
 0x527   :  { %v4903_v41 = vmul.f32 %v6786_v23, %v4673_v20 }
 0x528   :  { %v5115_v26 = vrot.slane %v5114_v58, 4  ;;  %v5227_v36 = vadd.f32 %v5226_v17, %v5225_v18 }
 0x529   :  { %v5150_v14 = vsel %vm10118_vm5, %v4903_v41, 0.0 }
 0x52a   :  { %v5116_v63 = vadd.f32 %v5115_v26, %v5114_v58  ;;  %v5151_v21 = vadd.f32 %v5150_v14, %v5149_v28  ;;  %v4740_v48 = vpop.permute.xlu1 %4739  ;;  %v5228_v22 = vrot.slane %v5227_v36, 2 }
 0x52b   :  { %v4919_v12 = vmul.f32 %v6787_v25, %v4740_v48  ;;  %v5236_v45 = vpop.permute.xlu0 %5235 }
 0x52c   :  { %v5117_v6 = vrot.slane %v5116_v63, 2  ;;  %v5152_v29 = vrot.slane %v5151_v21, 4  ;;  %v5229_v34 = vadd.f32 %v5228_v22, %v5227_v36  ;;  %v5238_v43 = vmul.f32 %v5236_v45, %v5232_v54 }
 0x52d   :  { %v5187_v4 = vsel %vm10120_vm8, %v4919_v12, 0.0 }
 0x52e   :  { %v5118_v46 = vadd.f32 %v5117_v6, %v5116_v63  ;;  %v5153_v61 = vadd.f32 %v5152_v29, %v5151_v21  ;;  %v5188_v44 = vadd.f32 %v5187_v4, %v5186_v11  ;;  %v5230_v32 = vrot.slane %v5229_v34, 1 }
 0x530   :  { %v5119_v9 = vrot.slane %v5118_v46, 1  ;;  %v5154_v2 = vrot.slane %v5153_v61, 2  ;;  %v5189_v35 = vrot.slane %v5188_v44, 4  ;;  %v5231_v31 = vadd.f32 %v5230_v32, %v5229_v34 }
 0x532   :  { %v5120_v59 = vadd.f32 %v5119_v9, %v5118_v46  ;;  %v5155_v27 = vadd.f32 %v5154_v2, %v5153_v61  ;;  %v5190_v3 = vadd.f32 %v5189_v35, %v5188_v44 }
 0x534   :  { %v5156_v19 = vrot.slane %v5155_v27, 1  ;;  %v5191_v38 = vrot.slane %v5190_v3, 2  ;;  %v5250_v47 = vsel %vm4243_vm6, %v5120_v59, %v9576_v40  ;;  %vm10122_vm6 = vmmov %vm10005_vm0 }
 0x536   :  { %v5157_v55 = vadd.f32 %v5156_v19, %v5155_v27  ;;  %v5192_v52 = vadd.f32 %v5191_v38, %v5190_v3 }
 0x538   :  { %v5193_v13 = vrot.slane %v5192_v52, 1  ;;  %v5251_v5 = vsel %vm4245_vm9, %v5157_v55, %v5250_v47 }
 0x53a   :  { %v5194_v50 = vadd.f32 %v5193_v13, %v5192_v52 }
 0x53c   :  { %v5252_v33 = vsel %vm4247_vm11, %v5194_v50, %v5251_v5 }
 0x53d   :  { %v5253_v42 = vsel %vm4249_vm12, %v5231_v31, %v5252_v33 }
 0x53e   :  { %v5255_v8 = vadd.f32 %v5253_v42, %v5238_v43 }
 0x540   :  { %5256 = vst.msk [vmem:[#allocation4] sm:$0xff] %vm10121_vm3, %v5255_v8 }
 0x547   :  { %v5277_v1 = vld [vmem:[#allocation4] sm:$0xff] }
 0x569   :  { %v5273_v62 = vpop.xlane.xlu1 %5272 }
 0x56a   :  { %6656 = vrcp.f32 %v5273_v62 }
 0x574   :  { %v6657_v40 = vpop.eup %6656 }
 0x575   :  { %v5278_v10 = vmul.f32 %v6657_v40, %v5277_v1  ;;  %v5275_v24 = vmul.f32 %v6657_v40, %v9614_v60 }
 0x577   :  { %5279 = vst.msk [vmem:[#allocation6] sm:$0xff] %vm10122_vm6, %v5278_v10  ;;  %5276 = vst [vmem:[#allocation8] sm:$0xff] %v5275_v24 }
 0x578   :  { %6799 = shalt.err (!%p6796_p4)
}
 0x579   :  { %s6800_s19 = scalar_lea.hbm %s9919_s9, 128 }
 0x57a   :  { %p6801_p5 = scmp.ne.s32.totalorder %s9919_s9, %s6800_s19  ;;  %p6804_p6 = scmp.lt.u32.totalorder %s6800_s19, %s9919_s9 }
 0x57c   :  { %p6806_p7 = pnand %p6804_p6, %p6801_p5 }
 0x57e   :  { %6809 = shalt.err (!%p6806_p7)
}
 0x57f   :  { %5289 = dma.vmem_to_hbm [thread:$0]  %s5287_s14, 128, %s9919_s9, [#allocation7]  }
 0x580   :  { %s6810_s24 = scalar_lea.vmem %s5297_s16, 128  ;;  %p6815_p9 = scmp.lt.s32.totalorder %s5297_s16, %s5297_s16 }
 0x581   :  { %p6811_p8 = scmp.ne.s32.totalorder %s5297_s16, %s6810_s24  ;;  %p6816_p10 = scmp.lt.s32.totalorder %s6810_s24, %s6810_s24 }
 0x583   :  { %p6817_p11 = por %p6816_p10, %p6815_p9 }
 0x585   :  { %p6818_p12 = pnand %p6817_p11, %p6811_p8 }
 0x587   :  { %6821 = shalt.err (!%p6818_p12)
}
 0x588   :  { %s6822_s25 = scalar_lea.hbm %s9920_s10, 128 }
 0x589   :  { %p6823_p13 = scmp.ne.s32.totalorder %s9920_s10, %s6822_s25  ;;  %p6826_p0 = scmp.lt.u32.totalorder %s6822_s25, %s9920_s10 }
 0x58b   :  { %p6828_p1 = pnand %p6826_p0, %p6823_p13 }
 0x58d   :  { %6831 = shalt.err (!%p6828_p1)
}
 0x58e   :  { %5299 = dma.vmem_to_hbm [thread:$0]  %s5297_s16, 128, %s9920_s10, [#allocation9]  }
 0x58f   :  { %6832 = dma.done.wait [#allocation7], 128  }
 0x590   :  { %6833 = vsyncadd [#allocation7], 4294967168 }
 0x591   :  { %6834 = dma.done.wait [#allocation9], 128  }
 0x592   :  { %6835 = vsyncadd [#allocation9], 4294967168 }
 0x593   :  { %5306 = vsyncpa [#allocation7], 1 }
 0x594   :  { %5307 = vsyncpa [#allocation9], 1 }

</bundles_post_ra>
